<compile_context>
chip_gen: v7x
topology: tpu7x:2x2x1
jax: 0.10.0
libtpu: 0.0.40
codegen_flags: <defaults>
</compile_context>

<pallas_src>
import functools

import jax
import jax.numpy as jnp
from jax.experimental import pallas as pl
from jax.experimental.pallas import tpu as pltpu


# ------------------------------ fused kernel -------------------------------- #

def _fused_kernel(x_ref, wc_ref, bc_ref, w1_ref, b1_ref, w2_ref, b2_ref, o_ref,
                  *, H, W, Cin, Cout, block_B):
    """One grid step = one block of `block_B` images; fully independent of other steps.

    x_ref:   [block_B, H+2, W+2, Cin]  zero-padded NHWC image block
    wc_ref:  [9*Cin, Cout]             conv weight, row index = (ki*3 + kj)*Cin + cin
    bc_ref:  [1, Cout]                 conv bias
    w1_ref:  [Cout, 128], b1_ref: [1, 128]   stand-in CNN projection (+ReLU), 128-padded
    w2_ref:  [128, 128],  b2_ref: [1, 128]   self.mlp = nn.Linear(100, 10), 128-padded
    o_ref:   [block_B, 128]            padded logits block for this step
    """
    x = x_ref[...]                                   # [bB, H+2, W+2, Cin]
    npix = block_B * H * W

    # --- build the im2col patch tile in-registers: [Npix, 9*Cin] ---
    taps = []
    for ki in range(3):
        for kj in range(3):
            win = x[:, ki:ki + H, kj:kj + W, :]      # [bB, H, W, Cin]
            taps.append(win.reshape(npix, Cin))      # cheap: W % 8 == 0
    patches = jnp.concatenate(taps, axis=-1)         # [Npix, 9*Cin]

    # --- 3x3 "same" conv as one MXU dot, bias + ReLU on the VPU ---
    conv = jnp.dot(patches, wc_ref[...], preferred_element_type=jnp.float32)
    conv = jnp.maximum(conv + bc_ref[...], 0.0)      # [Npix, Cout]

    # --- global average pool per image ---
    pooled = conv.reshape(block_B, H * W, Cout).sum(axis=1) * jnp.float32(1.0 / (H * W))

    # --- head: Linear(Cout->100)+ReLU (stand-in CNN tail), then self.mlp Linear(100->10) ---
    h = jnp.dot(pooled, w1_ref[...], preferred_element_type=jnp.float32) + b1_ref[...]
    h = jnp.maximum(h, 0.0)                          # [bB, 128] (cols >=100 are exactly 0)
    o_ref[...] = (jnp.dot(h, w2_ref[...], preferred_element_type=jnp.float32)
                  + b2_ref[...])                     # [bB, 128] full-lane store


# ------------------------------- wrapper ------------------------------------ #

def ten_class_classifier_forward(x_nchw, params):
    """x_nchw: [B, Cin, H, W] float32 -> logits [B, 10] float32."""
    wc, bc, w1, b1, w2, b2 = params
    B, Cin, H, W = x_nchw.shape
    Cout = wc.shape[-1]
    HID = w1.shape[1]            # 100
    NOUT = w2.shape[1]           # 10
    HID_P, OUT_P = 128, 128      # lane-padded head widths

    block_B = min(B, 8)                       # images per grid step
    n_steps = pl.cdiv(B, block_B)
    B_pad = n_steps * block_B

    # NCHW -> NHWC + 1-pixel zero halo; pad batch up to a multiple of block_B.
    x_nhwc = jnp.transpose(x_nchw, (0, 2, 3, 1)).astype(jnp.float32)
    x_pad = jnp.pad(x_nhwc, ((0, B_pad - B), (1, 1), (1, 1), (0, 0)))

    # Zero-pad head weights to 128 lanes (values are unchanged; extra cols sliced off).
    wc32 = wc.astype(jnp.float32)
    bc32 = bc.astype(jnp.float32)
    w1p = jnp.pad(w1.astype(jnp.float32), ((0, 0), (0, HID_P - HID)))
    b1p = jnp.pad(b1.astype(jnp.float32), ((0, 0), (0, HID_P - HID)))
    w2p = jnp.pad(w2.astype(jnp.float32), ((0, HID_P - HID), (0, OUT_P - NOUT)))
    b2p = jnp.pad(b2.astype(jnp.float32), ((0, 0), (0, OUT_P - NOUT)))

    def full(a):
        nd = a.ndim
        return pl.BlockSpec(a.shape, lambda i, _nd=nd: (0,) * _nd)

    flops = (2 * B * H * W * 9 * Cin * Cout          # conv
             + 2 * B * Cout * HID                    # Linear(Cout -> 100)
             + 2 * B * HID * NOUT)                   # Linear(100 -> 10)
    bytes_accessed = 4 * (x_pad.size + wc32.size + bc32.size + w1p.size + b1p.size
                          + w2p.size + b2p.size + B_pad * OUT_P)

    kernel = functools.partial(_fused_kernel, H=H, W=W, Cin=Cin, Cout=Cout,
                               block_B=block_B)

    logits_p = pl.pallas_call(
        kernel,
        grid=(n_steps,),
        in_specs=[
            pl.BlockSpec((block_B, H + 2, W + 2, Cin), lambda i: (i, 0, 0, 0)),
            full(wc32), full(bc32),
            full(w1p), full(b1p),
            full(w2p), full(b2p),
        ],
        out_specs=pl.BlockSpec((block_B, OUT_P), lambda i: (i, 0)),
        out_shape=jax.ShapeDtypeStruct((B_pad, OUT_P), jnp.float32),
        compiler_params=pltpu.CompilerParams(
            dimension_semantics=("parallel",)),       # every step is independent now
        cost_estimate=pl.CostEstimate(
            flops=flops, transcendentals=0, bytes_accessed=bytes_accessed),
    )(x_pad, wc32, bc32, w1p, b1p, w2p, b2p)

    return logits_p[:B, :NOUT]


# --------------------------- params / reference ----------------------------- #

def init_params(key, cin=4, cout=8):
    k = jax.random.split(key, 6)

    def u(kk, shape, fan_in):
        bound = 1.0 / jnp.sqrt(fan_in)
        return jax.random.uniform(kk, shape, jnp.float32, -bound, bound)

    wc = u(k[0], (9 * cin, cout), 9 * cin)    # conv weight, row = (ki*3+kj)*cin + c
    bc = u(k[1], (1, cout), 9 * cin)
    w1 = u(k[2], (cout, 100), cout)           # stand-in CNN projection to 100 feats
    b1 = u(k[3], (1, 100), cout)
    w2 = u(k[4], (100, 10), 100)              # self.mlp = nn.Linear(100, 10)
    b2 = u(k[5], (1, 10), 100)
    return (wc, bc, w1, b1, w2, b2)


def reference_forward(x_nchw, params):
    """Pure-JAX reference with identical semantics (for verification)."""
    wc, bc, w1, b1, w2, b2 = params
    B, Cin, H, W = x_nchw.shape
    x = jnp.transpose(x_nchw, (0, 2, 3, 1)).astype(jnp.float32)
    xp = jnp.pad(x, ((0, 0), (1, 1), (1, 1), (0, 0)))
    wins = [xp[:, ki:ki + H, kj:kj + W, :] for ki in range(3) for kj in range(3)]
    cols = jnp.concatenate(wins, axis=-1)                       # (tap, cin) ordering
    conv = jnp.maximum(jnp.einsum('bhwk,kc->bhwc', cols, wc)
                       + bc.reshape(1, 1, 1, -1), 0.0)
    pooled = conv.mean(axis=(1, 2))                             # [B, Cout]
    h = jnp.maximum(pooled @ w1 + b1, 0.0)
    return h @ w2 + b2


if __name__ == "__main__":
    key = jax.random.PRNGKey(0)
    kx, kp = jax.random.split(key)

    B, Cin, H, W = 2, 4, 16, 16
    x = jax.random.normal(kx, (B, Cin, H, W), dtype=jnp.float32)
    params = init_params(kp, cin=Cin, cout=8)

    out = jax.block_until_ready(ten_class_classifier_forward(x, params))
    ref = reference_forward(x, params)

    assert out.shape == (B, 10)
    assert jnp.allclose(out, ref, atol=1e-4, rtol=1e-4)

    print("KERNEL_OK")
</pallas_src>

<mosaic_0001>
module attributes {stable_mosaic.version = 11 : i64} {
  func.func @_fused_kernel(%arg0: i32, %arg1: memref<2x18x18x4xf32, #tpu.memory_space<vmem>>, %arg2: memref<36x8xf32, #tpu.memory_space<vmem>>, %arg3: memref<1x8xf32, #tpu.memory_space<vmem>>, %arg4: memref<8x128xf32, #tpu.memory_space<vmem>>, %arg5: memref<1x128xf32, #tpu.memory_space<vmem>>, %arg6: memref<128x128xf32, #tpu.memory_space<vmem>>, %arg7: memref<1x128xf32, #tpu.memory_space<vmem>>, %arg8: memref<2x128xf32, #tpu.memory_space<vmem>>) attributes {dimension_semantics = [#tpu.dimension_semantics<parallel>], iteration_bounds = array<i64: 1>, scalar_prefetch = 0 : i64, scratch_operands = 0 : i64, tpu.core_type = #tpu.core_type<tc>, window_params = [{transform_indices = @transform_0, window_bounds = array<i64: 2, 18, 18, 4>}, {pipeline_mode = #tpu.pipeline_mode<synchronous>, transform_indices = @transform_1, window_bounds = array<i64: 36, 8>}, {pipeline_mode = #tpu.pipeline_mode<synchronous>, transform_indices = @transform_2, window_bounds = array<i64: 1, 8>}, {pipeline_mode = #tpu.pipeline_mode<synchronous>, transform_indices = @transform_3, window_bounds = array<i64: 8, 128>}, {pipeline_mode = #tpu.pipeline_mode<synchronous>, transform_indices = @transform_4, window_bounds = array<i64: 1, 128>}, {pipeline_mode = #tpu.pipeline_mode<synchronous>, transform_indices = @transform_5, window_bounds = array<i64: 128, 128>}, {pipeline_mode = #tpu.pipeline_mode<synchronous>, transform_indices = @transform_6, window_bounds = array<i64: 1, 128>}, {transform_indices = @transform_7, window_bounds = array<i64: 2, 128>}]} {
    %c0 = arith.constant 0 : index
    %c0_0 = arith.constant 0 : index
    %c0_1 = arith.constant 0 : index
    %c0_2 = arith.constant 0 : index
    %0 = vector.load %arg1[%c0, %c0_0, %c0_1, %c0_2] : memref<2x18x18x4xf32, #tpu.memory_space<vmem>>, vector<2x18x18x4xf32>
    %1 = vector.extract_strided_slice %0 {offsets = [0, 0, 0, 0], sizes = [2, 16, 16, 4], strides = [1, 1, 1, 1]} : vector<2x18x18x4xf32> to vector<2x16x16x4xf32>
    %2 = vector.shape_cast %1 : vector<2x16x16x4xf32> to vector<512x4xf32>
    %3 = vector.extract_strided_slice %0 {offsets = [0, 0, 1, 0], sizes = [2, 16, 16, 4], strides = [1, 1, 1, 1]} : vector<2x18x18x4xf32> to vector<2x16x16x4xf32>
    %4 = vector.shape_cast %3 : vector<2x16x16x4xf32> to vector<512x4xf32>
    %5 = vector.extract_strided_slice %0 {offsets = [0, 0, 2, 0], sizes = [2, 16, 16, 4], strides = [1, 1, 1, 1]} : vector<2x18x18x4xf32> to vector<2x16x16x4xf32>
    %6 = vector.shape_cast %5 : vector<2x16x16x4xf32> to vector<512x4xf32>
    %7 = vector.extract_strided_slice %0 {offsets = [0, 1, 0, 0], sizes = [2, 16, 16, 4], strides = [1, 1, 1, 1]} : vector<2x18x18x4xf32> to vector<2x16x16x4xf32>
    %8 = vector.shape_cast %7 : vector<2x16x16x4xf32> to vector<512x4xf32>
    %9 = vector.extract_strided_slice %0 {offsets = [0, 1, 1, 0], sizes = [2, 16, 16, 4], strides = [1, 1, 1, 1]} : vector<2x18x18x4xf32> to vector<2x16x16x4xf32>
    %10 = vector.shape_cast %9 : vector<2x16x16x4xf32> to vector<512x4xf32>
    %11 = vector.extract_strided_slice %0 {offsets = [0, 1, 2, 0], sizes = [2, 16, 16, 4], strides = [1, 1, 1, 1]} : vector<2x18x18x4xf32> to vector<2x16x16x4xf32>
    %12 = vector.shape_cast %11 : vector<2x16x16x4xf32> to vector<512x4xf32>
    %13 = vector.extract_strided_slice %0 {offsets = [0, 2, 0, 0], sizes = [2, 16, 16, 4], strides = [1, 1, 1, 1]} : vector<2x18x18x4xf32> to vector<2x16x16x4xf32>
    %14 = vector.shape_cast %13 : vector<2x16x16x4xf32> to vector<512x4xf32>
    %15 = vector.extract_strided_slice %0 {offsets = [0, 2, 1, 0], sizes = [2, 16, 16, 4], strides = [1, 1, 1, 1]} : vector<2x18x18x4xf32> to vector<2x16x16x4xf32>
    %16 = vector.shape_cast %15 : vector<2x16x16x4xf32> to vector<512x4xf32>
    %17 = vector.extract_strided_slice %0 {offsets = [0, 2, 2, 0], sizes = [2, 16, 16, 4], strides = [1, 1, 1, 1]} : vector<2x18x18x4xf32> to vector<2x16x16x4xf32>
    %18 = vector.shape_cast %17 : vector<2x16x16x4xf32> to vector<512x4xf32>
    %19 = tpu.concatenate %2, %4, %6, %8, %10, %12, %14, %16, %18 in 1 : vector<512x4xf32>, vector<512x4xf32>, vector<512x4xf32>, vector<512x4xf32>, vector<512x4xf32>, vector<512x4xf32>, vector<512x4xf32>, vector<512x4xf32>, vector<512x4xf32> -> vector<512x36xf32>
    %c0_3 = arith.constant 0 : index
    %c0_4 = arith.constant 0 : index
    %20 = vector.load %arg2[%c0_3, %c0_4] : memref<36x8xf32, #tpu.memory_space<vmem>>, vector<36x8xf32>
    %cst = arith.constant dense<0.000000e+00> : vector<512x8xf32>
    %21 = tpu.matmul %19, %20, %cst {dimension_numbers = #tpu.dot_dimension_numbers<[1], [0], [0], [1], [0, 0, 1, 1], [], []>} : vector<512x36xf32>, vector<36x8xf32>, vector<512x8xf32> -> vector<512x8xf32>
    %c0_5 = arith.constant 0 : index
    %c0_6 = arith.constant 0 : index
    %22 = vector.load %arg3[%c0_5, %c0_6] : memref<1x8xf32, #tpu.memory_space<vmem>>, vector<1x8xf32>
    %23 = vector.broadcast %22 : vector<1x8xf32> to vector<512x8xf32>
    %24 = arith.addf %21, %23 : vector<512x8xf32>
    %cst_7 = arith.constant 0.000000e+00 : f32
    %25 = vector.broadcast %cst_7 : f32 to vector<512x8xf32>
    %26 = arith.maximumf %24, %25 : vector<512x8xf32>
    %27 = vector.shape_cast %26 : vector<512x8xf32> to vector<2x256x8xf32>
    %cst_8 = arith.constant dense<0.000000e+00> : vector<2x8xf32>
    %28 = vector.multi_reduction <add>, %27, %cst_8 [1] : vector<2x256x8xf32> to vector<2x8xf32>
    %cst_9 = arith.constant 3.906250e-03 : f32
    %29 = vector.broadcast %cst_9 : f32 to vector<2x8xf32>
    %30 = arith.mulf %28, %29 : vector<2x8xf32>
    %c0_10 = arith.constant 0 : index
    %c0_11 = arith.constant 0 : index
    %31 = vector.load %arg4[%c0_10, %c0_11] : memref<8x128xf32, #tpu.memory_space<vmem>>, vector<8x128xf32>
    %cst_12 = arith.constant dense<0.000000e+00> : vector<2x128xf32>
    %32 = tpu.matmul %30, %31, %cst_12 {dimension_numbers = #tpu.dot_dimension_numbers<[1], [0], [0], [1], [0, 0, 1, 1], [], []>} : vector<2x8xf32>, vector<8x128xf32>, vector<2x128xf32> -> vector<2x128xf32>
    %c0_13 = arith.constant 0 : index
    %c0_14 = arith.constant 0 : index
    %33 = vector.load %arg5[%c0_13, %c0_14] : memref<1x128xf32, #tpu.memory_space<vmem>>, vector<1x128xf32>
    %34 = vector.broadcast %33 : vector<1x128xf32> to vector<2x128xf32>
    %35 = arith.addf %32, %34 : vector<2x128xf32>
    %cst_15 = arith.constant 0.000000e+00 : f32
    %36 = vector.broadcast %cst_15 : f32 to vector<2x128xf32>
    %37 = arith.maximumf %35, %36 : vector<2x128xf32>
    %c0_16 = arith.constant 0 : index
    %c0_17 = arith.constant 0 : index
    %38 = vector.load %arg6[%c0_16, %c0_17] : memref<128x128xf32, #tpu.memory_space<vmem>>, vector<128x128xf32>
    %cst_18 = arith.constant dense<0.000000e+00> : vector<2x128xf32>
    %39 = tpu.matmul %37, %38, %cst_18 {dimension_numbers = #tpu.dot_dimension_numbers<[1], [0], [0], [1], [0, 0, 1, 1], [], []>} : vector<2x128xf32>, vector<128x128xf32>, vector<2x128xf32> -> vector<2x128xf32>
    %c0_19 = arith.constant 0 : index
    %c0_20 = arith.constant 0 : index
    %40 = vector.load %arg7[%c0_19, %c0_20] : memref<1x128xf32, #tpu.memory_space<vmem>>, vector<1x128xf32>
    %41 = vector.broadcast %40 : vector<1x128xf32> to vector<2x128xf32>
    %42 = arith.addf %39, %41 : vector<2x128xf32>
    %c0_21 = arith.constant 0 : index
    %c0_22 = arith.constant 0 : index
    %43 = vector.load %arg8[%c0_21, %c0_22] : memref<2x128xf32, #tpu.memory_space<vmem>>, vector<2x128xf32>
    tpu.vector_store %arg8[%c0_21, %c0_22], %42 {strides = array<i32>} : memref<2x128xf32, #tpu.memory_space<vmem>>, vector<2x128xf32>,
    return
  }
  func.func @transform_0(%arg0: i32) -> (i32, i32, i32, i32) {
    %c0_i32 = arith.constant 0 : i32
    %c0_i32_0 = arith.constant 0 : i32
    %c0_i32_1 = arith.constant 0 : i32
    %c0_i32_2 = arith.constant 0 : i32
    return %arg0, %c0_i32, %c0_i32_0, %c0_i32_1 : i32, i32, i32, i32
  }
  func.func @transform_1(%arg0: i32) -> (i32, i32) {
    %c0_i32 = arith.constant 0 : i32
    %c0_i32_0 = arith.constant 0 : i32
    %c0_i32_1 = arith.constant 0 : i32
    return %c0_i32, %c0_i32_0 : i32, i32
  }
  func.func @transform_2(%arg0: i32) -> (i32, i32) {
    %c0_i32 = arith.constant 0 : i32
    %c0_i32_0 = arith.constant 0 : i32
    %c0_i32_1 = arith.constant 0 : i32
    return %c0_i32, %c0_i32_0 : i32, i32
  }
  func.func @transform_3(%arg0: i32) -> (i32, i32) {
    %c0_i32 = arith.constant 0 : i32
    %c0_i32_0 = arith.constant 0 : i32
    %c0_i32_1 = arith.constant 0 : i32
    return %c0_i32, %c0_i32_0 : i32, i32
  }
  func.func @transform_4(%arg0: i32) -> (i32, i32) {
    %c0_i32 = arith.constant 0 : i32
    %c0_i32_0 = arith.constant 0 : i32
    %c0_i32_1 = arith.constant 0 : i32
    return %c0_i32, %c0_i32_0 : i32, i32
  }
  func.func @transform_5(%arg0: i32) -> (i32, i32) {
    %c0_i32 = arith.constant 0 : i32
    %c0_i32_0 = arith.constant 0 : i32
    %c0_i32_1 = arith.constant 0 : i32
    return %c0_i32, %c0_i32_0 : i32, i32
  }
  func.func @transform_6(%arg0: i32) -> (i32, i32) {
    %c0_i32 = arith.constant 0 : i32
    %c0_i32_0 = arith.constant 0 : i32
    %c0_i32_1 = arith.constant 0 : i32
    return %c0_i32, %c0_i32_0 : i32, i32
  }
  func.func @transform_7(%arg0: i32) -> (i32, i32) {
    %c0_i32 = arith.constant 0 : i32
    %c0_i32_0 = arith.constant 0 : i32
    return %arg0, %c0_i32 : i32, i32
  }
}

</mosaic_0001>

<bundles_post_ra>
// kernel: tpu_custom_call.1
= control target key start
LH: loop header
LB: loop body
LE: loop exit
PB: predicated region body
PF: predicated region fallthrough
CT: control target
= control target key end

     0   :  { %vm231_vm0 = vcmask 1046528   ;;  %s4117_s19 = smov 4   ;;  %s7695_s0 = inlined_call_operand.vmem [shape: f32[2,18,18,4], index: 0, kind: input, shape index: {}]   ;;  %s7696_s1 = inlined_call_operand.vmem [shape: f32[36,8], index: 1, kind: input, shape index: {}]   ;;  %s7697_s2 = inlined_call_operand.vmem [shape: f32[1,8], index: 2, kind: input, shape index: {}]   ;;  %s7698_s3 = inlined_call_operand.vmem [shape: f32[8,128], index: 3, kind: input, shape index: {}]   ;;  %s7699_s4 = inlined_call_operand.vmem [shape: f32[1,128], index: 4, kind: input, shape index: {}]   ;;  %s7700_s5 = inlined_call_operand.vmem [shape: f32[128,128], index: 5, kind: input, shape index: {}]   ;;  %s7701_s6 = inlined_call_operand.vmem [shape: f32[1,128], index: 6, kind: input, shape index: {}]   ;;  %s7702_s7 = inlined_call_operand.hbm [shape: f32[2,128], index: 7, kind: output, shape index: {}]  }
   0x1   :  { %v4172_v0 = vld [vmem:[%s7695_s0 + $0x18] sm:$0xff]  ;;  %v4177_v1 = vld [vmem:[%s7695_s0 + $0x20] sm:$0xff]  ;;  %v4189_v5 = vld [vmem:[%s7695_s0 + $0x8] sm:$0xff] }
   0x2   :  { %v4182_v2 = vld [vmem:[%s7695_s0] sm:$0xff]  ;;  %v237_v3 = vrot.slane %v4172_v0, 1  ;;  %v238_v4 = vrot.slane %v4177_v1, 1  ;;  %v4195_v7 = vld [vmem:[%s7695_s0 + $0x28] sm:$0x3]  ;;  %v233_v8 = vrot.slane %v4189_v5, 1 }
   0x3   :  { %v232_v6 = vrot.slane %v4182_v2, 1  ;;  %v240_v9 = vrot.slane %v4195_v7, 1  ;;  %v4202_v10 = vld [vmem:[%s7695_s0 + $0x10] sm:$0x3]  ;;  %v4207_v11 = vld [vmem:[%s7695_s0 + $0x38] sm:$0xff]  ;;  %v4247_v24 = vld [vmem:[%s7695_s0 + $0x48] sm:$0xff] }
   0x4   :  { %v4210_v12 = vsel %vm231_vm0, %v237_v3, %v238_v4  ;;  %v235_v13 = vrot.slane %v4202_v10, 1  ;;  %v4216_v14 = vld [vmem:[%s7695_s0 + $0x40] sm:$0x3]  ;;  %v4221_v15 = vld [vmem:[%s7695_s0 + $0x30] sm:$0xff]  ;;  %v243_v18 = vrot.slane %v4207_v11, 1  ;;  %v247_v29 = vrot.slane %v4247_v24, 1 }
   0x5   :  { %609 = vrot.lane.b32.xlu1 %v4210_v12, %s4117_s19  ;;  %v234_v16 = vsel %vm231_vm0, %v232_v6, %v233_v8  ;;  %v4228_v17 = vsel %vm231_vm0, %v238_v4, %v240_v9  ;;  %v245_v19 = vrot.slane %v4216_v14, 1  ;;  %v242_v21 = vrot.slane %v4221_v15, 1  ;;  %v4237_v22 = vld [vmem:[%s7695_s0 + $0x50] sm:$0xff]  ;;  %v4242_v23 = vld [vmem:[%s7695_s0 + $0x58] sm:$0x3]  ;;  %v4264_v30 = vld [vmem:[%s7695_s0 + $0x68] sm:$0xff] }
   0x6   :  { %605 = vrot.lane.b32.xlu0 %v234_v16, %s4117_s19  ;;  %v236_v20 = vsel %vm231_vm0, %v233_v8, %v235_v13  ;;  %v248_v26 = vrot.slane %v4237_v22, 1  ;;  %v250_v27 = vrot.slane %v4242_v23, 1  ;;  %v4269_v31 = vld [vmem:[%s7695_s0 + $0x70] sm:$0x3]  ;;  %v4274_v32 = vld [vmem:[%s7695_s0 + $0x60] sm:$0xff]  ;;  %v253_v34 = vrot.slane %v4264_v30, 1 }
   0x7   :  { %v4253_v25 = vsel %vm231_vm0, %v243_v18, %v245_v19  ;;  %v4258_v28 = vsel %vm231_vm0, %v242_v21, %v243_v18  ;;  %v255_v35 = vrot.slane %v4269_v31, 1  ;;  %v252_v37 = vrot.slane %v4274_v32, 1  ;;  %v4292_v38 = vld [vmem:[%s7695_s0 + $0x80] sm:$0xff]  ;;  %v4297_v39 = vld [vmem:[%s7695_s0 + $0x88] sm:$0x3]  ;;  %v4302_v40 = vld [vmem:[%s7695_s0 + $0x78] sm:$0xff] }
   0x8   :  { %v4281_v33 = vsel %vm231_vm0, %v248_v26, %v250_v27  ;;  %v4286_v36 = vsel %vm231_vm0, %v247_v29, %v248_v26  ;;  %v258_v42 = vrot.slane %v4292_v38, 1  ;;  %v260_v43 = vrot.slane %v4297_v39, 1  ;;  %v4320_v46 = vld [vmem:[%s7695_s0 + $0x98] sm:$0xff]  ;;  %v4325_v47 = vld [vmem:[%s7695_s0 + $0xa0] sm:$0x3]  ;;  %v4330_v48 = vld [vmem:[%s7695_s0 + $0x90] sm:$0xff] }
   0x9   :  { %611 = vrot.lane.b32.xlu1 %v4228_v17, %s4117_s19  ;;  %v4309_v41 = vsel %vm231_vm0, %v253_v34, %v255_v35  ;;  %v4314_v44 = vsel %vm231_vm0, %v252_v37, %v253_v34  ;;  %v257_v45 = vrot.slane %v4302_v40, 1  ;;  %v263_v50 = vrot.slane %v4320_v46, 1  ;;  %v4348_v54 = vld [vmem:[%s7695_s0 + $0xb0] sm:$0xff]  ;;  %v4353_v55 = vld [vmem:[%s7695_s0 + $0xb8] sm:$0x3]  ;;  %v4358_v56 = vld [vmem:[%s7695_s0 + $0xa8] sm:$0xff] }
   0xa   :  { %607 = vrot.lane.b32.xlu0 %v236_v20, %s4117_s19  ;;  %v4337_v49 = vsel %vm231_vm0, %v258_v42, %v260_v43  ;;  %v265_v51 = vrot.slane %v4325_v47, 1  ;;  %v262_v53 = vrot.slane %v4330_v48, 1  ;;  %v268_v58 = vrot.slane %v4348_v54, 1  ;;  %v4376_v62 = vld [vmem:[%s7695_s0 + $0xc8] sm:$0xff]  ;;  %v4381_v63 = vld [vmem:[%s7695_s0 + $0xd0] sm:$0x3] }
   0xb   :  { %v4342_v52 = vsel %vm231_vm0, %v257_v45, %v258_v42  ;;  %v270_v59 = vrot.slane %v4353_v55, 1  ;;  %v267_v61 = vrot.slane %v4358_v56, 1  ;;  %v4386_v3 = vld [vmem:[%s7695_s0 + $0xc0] sm:$0xff]  ;;  %v273_v6 = vrot.slane %v4376_v62, 1  ;;  %v4409_v18 = vld [vmem:[%s7695_s0 + $0xe8] sm:$0x3] }
   0xc   :  { %v4365_v57 = vsel %vm231_vm0, %v263_v50, %v265_v51  ;;  %v4370_v60 = vsel %vm231_vm0, %v262_v53, %v263_v50  ;;  %v275_v8 = vrot.slane %v4381_v63, 1  ;;  %v272_v13 = vrot.slane %v4386_v3, 1  ;;  %v4404_v16 = vld [vmem:[%s7695_s0 + $0xe0] sm:$0xff]  ;;  %v4414_v19 = vld [vmem:[%s7695_s0 + $0xd8] sm:$0xff]  ;;  %v57_v37 = vld [vmem:[%s7695_s0 + $0xf0] sm:$0xff] }
   0xd   :  { %615 = vrot.lane.b32.xlu1 %v4253_v25, %s4117_s19  ;;  %v4393_v4 = vsel %vm231_vm0, %v268_v58, %v270_v59  ;;  %v4398_v9 = vsel %vm231_vm0, %v267_v61, %v268_v58  ;;  %v278_v21 = vrot.slane %v4404_v16, 1  ;;  %v280_v26 = vrot.slane %v4409_v18, 1  ;;  %v58_v34 = vld [vmem:[%s7695_s0 + $0xf8] sm:$0xff]  ;;  %v59_v35 = vld [vmem:[%s7695_s0 + $0x100] sm:$0x3] }
   0xe   :  { %613 = vrot.lane.b32.xlu0 %v4258_v28, %s4117_s19  ;;  %v4421_v20 = vsel %vm231_vm0, %v273_v6, %v275_v8  ;;  %v4426_v27 = vsel %vm231_vm0, %v272_v13, %v273_v6  ;;  %v277_v29 = vrot.slane %v4414_v19, 1 }
  0x11   :  { %619 = vrot.lane.b32.xlu1 %v4281_v33, %s4117_s19 }
  0x12   :  { %617 = vrot.lane.b32.xlu0 %v4286_v36, %s4117_s19 }
  0x15   :  { %623 = vrot.lane.b32.xlu1 %v4309_v41, %s4117_s19 }
  0x16   :  { %621 = vrot.lane.b32.xlu0 %v4314_v44, %s4117_s19 }
  0x19   :  { %627 = vrot.lane.b32.xlu1 %v4337_v49, %s4117_s19 }
  0x1a   :  { %625 = vrot.lane.b32.xlu0 %v4342_v52, %s4117_s19 }
  0x1d   :  { %631 = vrot.lane.b32.xlu1 %v4365_v57, %s4117_s19 }
  0x1e   :  { %629 = vrot.lane.b32.xlu0 %v4370_v60, %s4117_s19 }
  0x21   :  { %635 = vrot.lane.b32.xlu1 %v4393_v4, %s4117_s19 }
  0x22   :  { %633 = vrot.lane.b32.xlu0 %v4398_v9, %s4117_s19 }
  0x25   :  { %639 = vrot.lane.b32.xlu1 %v4421_v20, %s4117_s19 }
  0x26   :  { %12 = vsyncpa [#allocation3], 0  ;;  %637 = vrot.lane.b32.xlu0 %v4426_v27, %s4117_s19  ;;  %v4443_v42 = vsel %vm231_vm0, %v278_v21, %v280_v26  ;;  %v283_v43 = vrot.slane %v58_v34, 1  ;;  %v285_v45 = vrot.slane %v59_v35, 1  ;;  %v4446_v50 = vsel %vm231_vm0, %v277_v29, %v278_v21  ;;  %v61_v53 = vld [vmem:[%s7695_s0 + $0x110] sm:$0xff]  ;;  %v60_v59 = vld [vmem:[%s7695_s0 + $0x108] sm:$0xff] }
  0x27   :  { %7787 = vst [vmem:[#allocation5_spill] sm:$0xff] %v4443_v42  ;;  %v282_v51 = vrot.slane %v57_v37, 1  ;;  %v62_v58 = vld [vmem:[%s7695_s0 + $0x118] sm:$0x3]  ;;  %v288_v6 = vrot.slane %v61_v53, 1  ;;  %v287_v21 = vrot.slane %v60_v59, 1 }
  0x28   :  { %v4462_v61 = vsel %vm231_vm0, %v283_v43, %v285_v45  ;;  %v290_v8 = vrot.slane %v62_v58, 1  ;;  %v64_v26 = vld [vmem:[%s7695_s0 + $0x128] sm:$0xff]  ;;  %v65_v29 = vld [vmem:[%s7695_s0 + $0x130] sm:$0x3]  ;;  %v63_v34 = vld [vmem:[%s7695_s0 + $0x120] sm:$0xff]  ;;  %vm392_vm1 = vcmask 1045504  }
  0x29   :  { %643 = vrot.lane.b32.xlu1 %v4443_v42, %s4117_s19  ;;  %7788 = vst [vmem:[#allocation6_spill] sm:$0xff] %v4462_v61  ;;  %v4465_v13 = vsel %vm231_vm0, %v282_v51, %v283_v43  ;;  %v293_v37 = vrot.slane %v64_v26, 1  ;;  %v295_v43 = vrot.slane %v65_v29, 1  ;;  %v4484_v45 = vsel %vm231_vm0, %v287_v21, %v288_v6  ;;  %v67_v53 = vld [vmem:[%s7695_s0 + $0x140] sm:$0xff]  ;;  %v68_v58 = vld [vmem:[%s7695_s0 + $0x148] sm:$0x3] }
  0x2a   :  { %641 = vrot.lane.b32.xlu0 %v4446_v50, %s4117_s19  ;;  %7789 = vst [vmem:[#allocation7_spill] sm:$0xff] %v4465_v13  ;;  %v4481_v35 = vsel %vm231_vm0, %v288_v6, %v290_v8  ;;  %7791 = vst [vmem:[#allocation9_spill] sm:$0xff] %v4484_v45  ;;  %v292_v51 = vrot.slane %v63_v34, 1  ;;  %v66_v59 = vld [vmem:[%s7695_s0 + $0x138] sm:$0xff]  ;;  %v298_v8 = vrot.slane %v67_v53, 1  ;;  %v300_v21 = vrot.slane %v68_v58, 1 }
  0x2b   :  { %7790 = vst [vmem:[#allocation8_spill] sm:$0xff] %v4481_v35  ;;  %v4500_v6 = vsel %vm231_vm0, %v293_v37, %v295_v43  ;;  %v297_v29 = vrot.slane %v66_v59, 1  ;;  %v70_v34 = vld [vmem:[%s7695_s0 + $0x158] sm:$0xff]  ;;  %v73_v59 = vld [vmem:[%s7695_s0 + $0x170] sm:$0xff]  ;;  %s4118_s17 = smov 8   ;;  %s4120_s18 = smov 16  }
  0x2c   :  { %7792 = vst [vmem:[#allocation10_spill] sm:$0xff] %v4500_v6  ;;  %v4503_v26 = vsel %vm231_vm0, %v292_v51, %v293_v37  ;;  %v4519_v37 = vsel %vm231_vm0, %v298_v8, %v300_v21  ;;  %v303_v43 = vrot.slane %v70_v34, 1  ;;  %v82_v34 = vld [vmem:[%s7695_s0 + $0x1b8] sm:$0xff]  ;;  %s4121_s20 = smov 20   ;;  %s4122_s29 = smov 24   ;;  %vm2866_vm2 = vcmask 1043456  }
  0x2d   :  { %647 = vrot.lane.b32.xlu1 %v4462_v61, %s4117_s19  ;;  %7793 = vst [vmem:[#allocation11_spill] sm:$0xff] %v4503_v26  ;;  %7794 = vst [vmem:[#allocation12_spill] sm:$0xff] %v4519_v37  ;;  %v4522_v53 = vsel %vm231_vm0, %v297_v29, %v298_v8  ;;  %v89_v61 = vld [vmem:[%s7695_s0 + $0x1f0] sm:$0x3]  ;;  %s4123_s30 = smov 28   ;;  %vm2141_vm3 = vcmask 31744  }
  0x2e   :  { %645 = vrot.lane.b32.xlu0 %v4465_v13, %s4117_s19  ;;  %7795 = vst [vmem:[#allocation13_spill] sm:$0xff] %v4522_v53  ;;  %vm2206_vm4 = vcmask 64512   ;;  %vm2271_vm5 = vcmask 97280   ;;  %vm2336_vm6 = vcmask 130048   ;;  %vm2401_vm7 = vcmask 162816   ;;  %s4128_s9 = smov [#allocation2]  }
  0x2f   :  { %vm2466_vm8 = vcmask 195584   ;;  %vm2531_vm9 = vcmask 228352   ;;  %vm2596_vm10 = vcmask 261120   ;;  %vm2673_vm11 = vcmask 293888   ;;  %s3644_s10 = sshll.u32 %s4128_s9, 4  ;;  %s3645_s10 = int_to_ptr.vmem [resolvable:$true] %s3644_s10 }
  0x30   :  { %vm4126_vm12 = vmmov 0   ;;  %vm3469_vm13 = vcmask 1041409   ;;  %p4098_p1 = scmp.lt.s32.totalorder %s3645_s10, %s3645_s10 }
  0x31   :  { %651 = vrot.lane.b32.xlu1 %v4481_v35, %s4117_s19  ;;  %v71_v35 = vld [vmem:[%s7695_s0 + $0x160] sm:$0x3] }
  0x32   :  { %649 = vrot.lane.b32.xlu0 %v4484_v45, %s4117_s19  ;;  %v69_v45 = vld [vmem:[%s7695_s0 + $0x150] sm:$0xff]  ;;  %v305_v51 = vrot.slane %v71_v35, 1 }
  0x33   :  { %v302_v58 = vrot.slane %v69_v45, 1  ;;  %v308_v45 = vrot.slane %v73_v59, 1  ;;  %v85_v59 = vld [vmem:[%s7695_s0 + $0x1d0] sm:$0xff] }
  0x34   :  { %v4538_v35 = vsel %vm231_vm0, %v303_v43, %v305_v51 }
  0x35   :  { %655 = vrot.lane.b32.xlu1 %v4500_v6, %s4117_s19  ;;  %v74_v6 = vld [vmem:[%s7695_s0 + $0x178] sm:$0x3]  ;;  %7796 = vst [vmem:[#allocation14_spill] sm:$0xff] %v4538_v35  ;;  %v4541_v21 = vsel %vm231_vm0, %v302_v58, %v303_v43 }
  0x36   :  { %653 = vrot.lane.b32.xlu0 %v4503_v26, %s4117_s19  ;;  %v72_v26 = vld [vmem:[%s7695_s0 + $0x168] sm:$0xff]  ;;  %v310_v8 = vrot.slane %v74_v6, 1  ;;  %7797 = vst [vmem:[#allocation15_spill] sm:$0xff] %v4541_v21 }
  0x37   :  { %v307_v29 = vrot.slane %v72_v26, 1  ;;  %v313_v26 = vrot.slane %v82_v34, 1  ;;  %v88_v34 = vld [vmem:[%s7695_s0 + $0x1e8] sm:$0xff] }
  0x38   :  { %v4557_v6 = vsel %vm231_vm0, %v308_v45, %v310_v8 }
  0x39   :  { %659 = vrot.lane.b32.xlu1 %v4519_v37, %s4117_s19  ;;  %v83_v37 = vld [vmem:[%s7695_s0 + $0x1c0] sm:$0x3]  ;;  %7798 = vst [vmem:[#allocation16_spill] sm:$0xff] %v4557_v6  ;;  %v4560_v51 = vsel %vm231_vm0, %v307_v29, %v308_v45 }
  0x3a   :  { %657 = vrot.lane.b32.xlu0 %v4522_v53, %s4117_s19  ;;  %v81_v53 = vld [vmem:[%s7695_s0 + $0x1b0] sm:$0xff]  ;;  %v315_v43 = vrot.slane %v83_v37, 1  ;;  %7799 = vst [vmem:[#allocation17_spill] sm:$0xff] %v4560_v51 }
  0x3b   :  { %v312_v58 = vrot.slane %v81_v53, 1  ;;  %v318_v53 = vrot.slane %v85_v59, 1  ;;  %v91_v59 = vld [vmem:[%s7695_s0 + $0x200] sm:$0xff] }
  0x3c   :  { %v316_v37 = vsel %vm231_vm0, %v313_v26, %v315_v43 }
  0x3d   :  { %663 = vrot.lane.b32.xlu1 %v4538_v35, %s4117_s19  ;;  %v86_v35 = vld [vmem:[%s7695_s0 + $0x1d8] sm:$0x3]  ;;  %v314_v8 = vsel %vm231_vm0, %v312_v58, %v313_v26  ;;  %v325_v26 = vrot.slane %v89_v61, 1 }
  0x3e   :  { %661 = vrot.lane.b32.xlu0 %v4541_v21, %s4117_s19  ;;  %v84_v21 = vld [vmem:[%s7695_s0 + $0x1c8] sm:$0xff]  ;;  %v320_v45 = vrot.slane %v86_v35, 1 }
  0x3f   :  { %v317_v29 = vrot.slane %v84_v21, 1  ;;  %v323_v21 = vrot.slane %v88_v34, 1  ;;  %v95_v34 = vld [vmem:[%s7695_s0 + $0x220] sm:$0x3] }
  0x40   :  { %v4589_v35 = vsel %vm231_vm0, %v318_v53, %v320_v45 }
  0x41   :  { %667 = vrot.lane.b32.xlu1 %v4557_v6, %s4117_s19  ;;  %v87_v6 = vld [vmem:[%s7695_s0 + $0x1e0] sm:$0xff]  ;;  %7800 = vst [vmem:[#allocation18_spill] sm:$0xff] %v4589_v35  ;;  %v4592_v43 = vsel %vm231_vm0, %v317_v29, %v318_v53  ;;  %v4608_v61 = vsel %vm231_vm0, %v323_v21, %v325_v26  ;;  %v94_v29 = vld [vmem:[%s7695_s0 + $0x218] sm:$0xff]  ;;  %v335_v26 = vrot.slane %v95_v34, 1  ;;  %v100_v34 = vld [vmem:[%s7695_s0 + $0x248] sm:$0xff] }
  0x42   :  { %665 = vrot.lane.b32.xlu0 %v4560_v51, %s4117_s19  ;;  %7801 = vst [vmem:[#allocation19_spill] sm:$0xff] %v4592_v43  ;;  %v322_v58 = vrot.slane %v87_v6, 1  ;;  %v92_v51 = vld [vmem:[%s7695_s0 + $0x208] sm:$0x3]  ;;  %7802 = vst [vmem:[#allocation20_spill] sm:$0xff] %v4608_v61  ;;  %v328_v6 = vrot.slane %v91_v59, 1 }
  0x43   :  { %v330_v53 = vrot.slane %v92_v51, 1 }
  0x44   :  { %v4611_v45 = vsel %vm231_vm0, %v322_v58, %v323_v21  ;;  %v333_v21 = vrot.slane %v94_v29, 1 }
  0x45   :  { %671 = vrot.lane.b32.xlu1 %v316_v37, %s4117_s19  ;;  %v90_v37 = vld [vmem:[%s7695_s0 + $0x1f8] sm:$0xff]  ;;  %7803 = vst [vmem:[#allocation21_spill] sm:$0xff] %v4611_v45  ;;  %v4627_v51 = vsel %vm231_vm0, %v328_v6, %v330_v53 }
  0x46   :  { %669 = vrot.lane.b32.xlu0 %v314_v8, %s4117_s19  ;;  %v327_v8 = vrot.slane %v90_v37, 1  ;;  %7804 = vst [vmem:[#allocation22_spill] sm:$0xff] %v4627_v51  ;;  %v97_v37 = vld [vmem:[%s7695_s0 + $0x230] sm:$0xff] }
  0x48   :  { %v4630_v58 = vsel %vm231_vm0, %v327_v8, %v328_v6  ;;  %v338_v6 = vrot.slane %v97_v37, 1  ;;  %v103_v37 = vld [vmem:[%s7695_s0 + $0x260] sm:$0xff] }
  0x49   :  { %675 = vrot.lane.b32.xlu1 %v4589_v35, %s4117_s19  ;;  %v93_v35 = vld [vmem:[%s7695_s0 + $0x210] sm:$0xff]  ;;  %7805 = vst [vmem:[#allocation23_spill] sm:$0xff] %v4630_v58 }
  0x4a   :  { %673 = vrot.lane.b32.xlu0 %v4592_v43, %s4117_s19  ;;  %v332_v59 = vrot.slane %v93_v35, 1  ;;  %v4646_v35 = vsel %vm231_vm0, %v333_v21, %v335_v26  ;;  %v127_v43 = vld [vmem:[%s7695_s0 + $0x320] sm:$0xff] }
  0x4b   :  { %7806 = vst [vmem:[#allocation24_spill] sm:$0xff] %v4646_v35 }
  0x4c   :  { %v4649_v8 = vsel %vm231_vm0, %v332_v59, %v333_v21 }
  0x4d   :  { %679 = vrot.lane.b32.xlu1 %v4608_v61, %s4117_s19  ;;  %v98_v61 = vld [vmem:[%s7695_s0 + $0x238] sm:$0x3]  ;;  %7807 = vst [vmem:[#allocation25_spill] sm:$0xff] %v4649_v8 }
  0x4e   :  { %677 = vrot.lane.b32.xlu0 %v4611_v45, %s4117_s19  ;;  %v96_v45 = vld [vmem:[%s7695_s0 + $0x228] sm:$0xff]  ;;  %v340_v53 = vrot.slane %v98_v61, 1 }
  0x4f   :  { %v337_v29 = vrot.slane %v96_v45, 1  ;;  %v343_v45 = vrot.slane %v100_v34, 1  ;;  %v106_v34 = vld [vmem:[%s7695_s0 + $0x278] sm:$0xff] }
  0x50   :  { %v4665_v61 = vsel %vm231_vm0, %v338_v6, %v340_v53 }
  0x51   :  { %683 = vrot.lane.b32.xlu1 %v4627_v51, %s4117_s19  ;;  %v101_v51 = vld [vmem:[%s7695_s0 + $0x250] sm:$0x3]  ;;  %7808 = vst [vmem:[#allocation26_spill] sm:$0xff] %v4665_v61  ;;  %v4668_v26 = vsel %vm231_vm0, %v337_v29, %v338_v6 }
  0x52   :  { %681 = vrot.lane.b32.xlu0 %v4630_v58, %s4117_s19  ;;  %v99_v58 = vld [vmem:[%s7695_s0 + $0x240] sm:$0xff]  ;;  %v345_v21 = vrot.slane %v101_v51, 1  ;;  %7809 = vst [vmem:[#allocation27_spill] sm:$0xff] %v4668_v26 }
  0x53   :  { %v342_v59 = vrot.slane %v99_v58, 1  ;;  %v348_v58 = vrot.slane %v103_v37, 1  ;;  %v109_v37 = vld [vmem:[%s7695_s0 + $0x290] sm:$0xff] }
  0x54   :  { %v4684_v51 = vsel %vm231_vm0, %v343_v45, %v345_v21 }
  0x55   :  { %687 = vrot.lane.b32.xlu1 %v4646_v35, %s4117_s19  ;;  %v104_v35 = vld [vmem:[%s7695_s0 + $0x268] sm:$0x3]  ;;  %7810 = vst [vmem:[#allocation28_spill] sm:$0xff] %v4684_v51  ;;  %v4687_v53 = vsel %vm231_vm0, %v342_v59, %v343_v45 }
  0x56   :  { %685 = vrot.lane.b32.xlu0 %v4649_v8, %s4117_s19  ;;  %v102_v8 = vld [vmem:[%s7695_s0 + $0x258] sm:$0xff]  ;;  %v350_v6 = vrot.slane %v104_v35, 1  ;;  %7811 = vst [vmem:[#allocation29_spill] sm:$0xff] %v4687_v53 }
  0x57   :  { %v347_v29 = vrot.slane %v102_v8, 1  ;;  %v353_v8 = vrot.slane %v106_v34, 1  ;;  %v112_v34 = vld [vmem:[%s7695_s0 + $0x2a8] sm:$0xff] }
  0x58   :  { %v4703_v35 = vsel %vm231_vm0, %v348_v58, %v350_v6 }
  0x59   :  { %691 = vrot.lane.b32.xlu1 %v4665_v61, %s4117_s19  ;;  %v107_v61 = vld [vmem:[%s7695_s0 + $0x280] sm:$0x3]  ;;  %7812 = vst [vmem:[#allocation30_spill] sm:$0xff] %v4703_v35  ;;  %v4706_v21 = vsel %vm231_vm0, %v347_v29, %v348_v58 }
  0x5a   :  { %689 = vrot.lane.b32.xlu0 %v4668_v26, %s4117_s19  ;;  %v105_v26 = vld [vmem:[%s7695_s0 + $0x270] sm:$0xff]  ;;  %v355_v45 = vrot.slane %v107_v61, 1  ;;  %7813 = vst [vmem:[#allocation31_spill] sm:$0xff] %v4706_v21 }
  0x5b   :  { %v352_v59 = vrot.slane %v105_v26, 1  ;;  %v358_v26 = vrot.slane %v109_v37, 1  ;;  %v115_v37 = vld [vmem:[%s7695_s0 + $0x2c0] sm:$0xff] }
  0x5c   :  { %v4722_v61 = vsel %vm231_vm0, %v353_v8, %v355_v45 }
  0x5d   :  { %695 = vrot.lane.b32.xlu1 %v4684_v51, %s4117_s19  ;;  %v110_v51 = vld [vmem:[%s7695_s0 + $0x298] sm:$0x3]  ;;  %7814 = vst [vmem:[#allocation32_spill] sm:$0xff] %v4722_v61  ;;  %v4725_v6 = vsel %vm231_vm0, %v352_v59, %v353_v8 }
  0x5e   :  { %693 = vrot.lane.b32.xlu0 %v4687_v53, %s4117_s19  ;;  %v108_v53 = vld [vmem:[%s7695_s0 + $0x288] sm:$0xff]  ;;  %v360_v58 = vrot.slane %v110_v51, 1  ;;  %7815 = vst [vmem:[#allocation33_spill] sm:$0xff] %v4725_v6 }
  0x5f   :  { %v357_v29 = vrot.slane %v108_v53, 1  ;;  %v363_v53 = vrot.slane %v112_v34, 1  ;;  %v118_v34 = vld [vmem:[%s7695_s0 + $0x2d8] sm:$0xff] }
  0x60   :  { %v4741_v51 = vsel %vm231_vm0, %v358_v26, %v360_v58 }
  0x61   :  { %699 = vrot.lane.b32.xlu1 %v4703_v35, %s4117_s19  ;;  %v113_v35 = vld [vmem:[%s7695_s0 + $0x2b0] sm:$0x3]  ;;  %7816 = vst [vmem:[#allocation34_spill] sm:$0xff] %v4741_v51  ;;  %v4744_v45 = vsel %vm231_vm0, %v357_v29, %v358_v26 }
  0x62   :  { %697 = vrot.lane.b32.xlu0 %v4706_v21, %s4117_s19  ;;  %v111_v21 = vld [vmem:[%s7695_s0 + $0x2a0] sm:$0xff]  ;;  %v365_v8 = vrot.slane %v113_v35, 1  ;;  %7817 = vst [vmem:[#allocation35_spill] sm:$0xff] %v4744_v45 }
  0x63   :  { %v362_v59 = vrot.slane %v111_v21, 1  ;;  %v368_v21 = vrot.slane %v115_v37, 1  ;;  %v121_v37 = vld [vmem:[%s7695_s0 + $0x2f0] sm:$0xff] }
  0x64   :  { %v4760_v35 = vsel %vm231_vm0, %v363_v53, %v365_v8 }
  0x65   :  { %703 = vrot.lane.b32.xlu1 %v4722_v61, %s4117_s19  ;;  %v116_v61 = vld [vmem:[%s7695_s0 + $0x2c8] sm:$0x3]  ;;  %7818 = vst [vmem:[#allocation36_spill] sm:$0xff] %v4760_v35  ;;  %v4763_v58 = vsel %vm231_vm0, %v362_v59, %v363_v53 }
  0x66   :  { %701 = vrot.lane.b32.xlu0 %v4725_v6, %s4117_s19  ;;  %v114_v6 = vld [vmem:[%s7695_s0 + $0x2b8] sm:$0xff]  ;;  %v370_v26 = vrot.slane %v116_v61, 1  ;;  %7819 = vst [vmem:[#allocation37_spill] sm:$0xff] %v4763_v58 }
  0x67   :  { %v367_v29 = vrot.slane %v114_v6, 1  ;;  %v373_v6 = vrot.slane %v118_v34, 1  ;;  %v124_v34 = vld [vmem:[%s7695_s0 + $0x308] sm:$0xff] }
  0x68   :  { %v4779_v61 = vsel %vm231_vm0, %v368_v21, %v370_v26 }
  0x69   :  { %707 = vrot.lane.b32.xlu1 %v4741_v51, %s4117_s19  ;;  %v119_v51 = vld [vmem:[%s7695_s0 + $0x2e0] sm:$0x3]  ;;  %7820 = vst [vmem:[#allocation38_spill] sm:$0xff] %v4779_v61  ;;  %v4782_v8 = vsel %vm231_vm0, %v367_v29, %v368_v21 }
  0x6a   :  { %705 = vrot.lane.b32.xlu0 %v4744_v45, %s4117_s19  ;;  %v117_v45 = vld [vmem:[%s7695_s0 + $0x2d0] sm:$0xff]  ;;  %v375_v53 = vrot.slane %v119_v51, 1  ;;  %7821 = vst [vmem:[#allocation39_spill] sm:$0xff] %v4782_v8 }
  0x6b   :  { %v372_v59 = vrot.slane %v117_v45, 1  ;;  %v378_v45 = vrot.slane %v121_v37, 1 }
  0x6c   :  { %v4798_v51 = vsel %vm231_vm0, %v373_v6, %v375_v53 }
  0x6d   :  { %711 = vrot.lane.b32.xlu1 %v4760_v35, %s4117_s19  ;;  %v122_v35 = vld [vmem:[%s7695_s0 + $0x2f8] sm:$0x3]  ;;  %7822 = vst [vmem:[#allocation40_spill] sm:$0xff] %v4798_v51  ;;  %v4801_v26 = vsel %vm231_vm0, %v372_v59, %v373_v6 }
  0x6e   :  { %709 = vrot.lane.b32.xlu0 %v4763_v58, %s4117_s19  ;;  %v120_v58 = vld [vmem:[%s7695_s0 + $0x2e8] sm:$0xff]  ;;  %v380_v21 = vrot.slane %v122_v35, 1  ;;  %7823 = vst [vmem:[#allocation41_spill] sm:$0xff] %v4801_v26 }
  0x6f   :  { %v377_v29 = vrot.slane %v120_v58, 1  ;;  %v383_v58 = vrot.slane %v124_v34, 1 }
  0x70   :  { %v4817_v35 = vsel %vm231_vm0, %v378_v45, %v380_v21 }
  0x71   :  { %715 = vrot.lane.b32.xlu1 %v4779_v61, %s4117_s19  ;;  %v125_v61 = vld [vmem:[%s7695_s0 + $0x310] sm:$0x3]  ;;  %7824 = vst [vmem:[#allocation42_spill] sm:$0xff] %v4817_v35  ;;  %v4822_v59 = vsel %vm231_vm0, %v377_v29, %v378_v45  ;;  %v388_v45 = vrot.slane %v127_v43, 1  ;;  %v394_v43 = vrot.slane %v4189_v5, 2 }
  0x72   :  { %713 = vrot.lane.b32.xlu0 %v4782_v8, %s4117_s19  ;;  %v123_v8 = vld [vmem:[%s7695_s0 + $0x300] sm:$0xff]  ;;  %v385_v6 = vrot.slane %v125_v61, 1  ;;  %7825 = vst [vmem:[#allocation43_spill] sm:$0xff] %v4822_v59  ;;  %v126_v61 = vld [vmem:[%s7695_s0 + $0x318] sm:$0xff] }
  0x73   :  { %v382_v37 = vrot.slane %v123_v8, 1  ;;  %v387_v13 = vrot.slane %v126_v61, 1 }
  0x74   :  { %v4840_v8 = vsel %vm231_vm0, %v383_v58, %v385_v6 }
  0x75   :  { %719 = vrot.lane.b32.xlu1 %v4798_v51, %s4117_s19  ;;  %v128_v51 = vld [vmem:[%s7695_s0 + $0x328] sm:$0x3]  ;;  %7826 = vst [vmem:[#allocation44_spill] sm:$0xff] %v4840_v8  ;;  %v4845_v34 = vsel %vm231_vm0, %v382_v37, %v383_v58  ;;  %v4861_v58 = vsel %vm231_vm0, %v387_v13, %v388_v45  ;;  %v393_v37 = vrot.slane %v4182_v2, 2  ;;  %v398_v2 = vrot.slane %v4172_v0, 2 }
  0x76   :  { %717 = vrot.lane.b32.xlu0 %v4801_v26, %s4117_s19  ;;  %v390_v21 = vrot.slane %v128_v51, 1  ;;  %7827 = vst [vmem:[#allocation45_spill] sm:$0xff] %v4845_v34  ;;  %v396_v51 = vrot.slane %v4202_v10, 2  ;;  %7829 = vst [vmem:[#allocation47_spill] sm:$0xff] %v4861_v58  ;;  %v399_v10 = vrot.slane %v4177_v1, 2 }
  0x77   :  { %v4819_v53 = vpop.permute.xlu1 %609  ;;  %v395_v13 = vsel %vm392_vm1, %v393_v37, %v394_v43  ;;  %v403_v37 = vrot.slane %v4221_v15, 2 }
  0x78   :  { %v4830_v26 = vpop.permute.xlu0 %605  ;;  %v397_v5 = vsel %vm392_vm1, %v394_v43, %v396_v51  ;;  %v404_v51 = vrot.slane %v4207_v11, 2  ;;  %v4889_v43 = vsel %vm392_vm1, %v398_v2, %v399_v10  ;;  %v408_v2 = vrot.slane %v4247_v24, 2 }
  0x79   :  { %723 = vrot.lane.b32.xlu1 %v4817_v35, %s4117_s19  ;;  %v4854_v35 = vsel %vm231_vm0, %v388_v45, %v390_v21  ;;  %v401_v21 = vrot.slane %v4195_v7, 2  ;;  %v406_v7 = vrot.slane %v4216_v14, 2  ;;  %v409_v14 = vrot.slane %v4237_v22, 2 }
  0x7a   :  { %721 = vrot.lane.b32.xlu0 %v4822_v59, %s4117_s19  ;;  %7828 = vst [vmem:[#allocation46_spill] sm:$0xff] %v4854_v35 }
  0x7b   :  { %v4842_v29 = vpop.permute.xlu1 %611 }
  0x7c   :  { %v4847_v42 = vpop.permute.xlu0 %607 }
  0x7d   :  { %727 = vrot.lane.b32.xlu1 %v4840_v8, %s4117_s19 }
  0x7e   :  { %725 = vrot.lane.b32.xlu0 %v4845_v34, %s4117_s19 }
  0x7f   :  { %v4858_v6 = vpop.permute.xlu1 %615 }
  0x80   :  { %v4864_v61 = vpop.permute.xlu0 %613 }
  0x81   :  { %731 = vrot.lane.b32.xlu1 %v4854_v35, %s4117_s19  ;;  %v4882_v35 = vsel %vm392_vm1, %v399_v10, %v401_v21  ;;  %v411_v21 = vrot.slane %v4242_v23, 2  ;;  %v4906_v10 = vsel %vm392_vm1, %v403_v37, %v404_v51  ;;  %v414_v23 = vrot.slane %v4264_v30, 2 }
  0x82   :  { %729 = vrot.lane.b32.xlu0 %v4861_v58, %s4117_s19  ;;  %v413_v37 = vrot.slane %v4274_v32, 2  ;;  %s4119_s19 = smov 12  }
  0x83   :  { %v4873_v8 = vpop.permute.xlu1 %619 }
  0x84   :  { %7830 = vst [vmem:[#allocation48_spill] sm:$0xff] %v4873_v8  ;;  %v4877_v45 = vpop.permute.xlu0 %617 }
  0x85   :  { %7831 = vst [vmem:[#allocation49_spill] sm:$0xff] %v4877_v45  ;;  %799 = vrot.lane.b32.xlu1 %v397_v5, %s4118_s17  ;;  %v4899_v5 = vsel %vm392_vm1, %v404_v51, %v406_v7  ;;  %v4916_v7 = vsel %vm392_vm1, %v409_v14, %v411_v21  ;;  %v4923_v51 = vsel %vm392_vm1, %v408_v2, %v409_v14  ;;  %v418_v2 = vrot.slane %v4302_v40, 2 }
  0x86   :  { %797 = vrot.lane.b32.xlu0 %v395_v13, %s4118_s17  ;;  %v4940_v14 = vsel %vm392_vm1, %v413_v37, %v414_v23  ;;  %v423_v37 = vrot.slane %v4330_v48, 2 }
  0x87   :  { %v4886_v58 = vpop.permute.xlu1 %623 }
  0x88   :  { %7832 = vst [vmem:[#allocation50_spill] sm:$0xff] %v4886_v58  ;;  %v4892_v34 = vpop.permute.xlu0 %621 }
  0x89   :  { %7833 = vst [vmem:[#allocation51_spill] sm:$0xff] %v4892_v34  ;;  %803 = vrot.lane.b32.xlu1 %v4882_v35, %s4118_s17 }
  0x8a   :  { %801 = vrot.lane.b32.xlu0 %v4889_v43, %s4118_s17 }
  0x8b   :  { %v4903_v13 = vpop.permute.xlu1 %627 }
  0x8c   :  { %7834 = vst [vmem:[#allocation52_spill] sm:$0xff] %v4903_v13  ;;  %v4909_v59 = vpop.permute.xlu0 %625  ;;  %v416_v13 = vrot.slane %v4269_v31, 2  ;;  %v419_v31 = vrot.slane %v4292_v38, 2 }
  0x8d   :  { %7835 = vst [vmem:[#allocation53_spill] sm:$0xff] %v4909_v59  ;;  %807 = vrot.lane.b32.xlu1 %v4899_v5, %s4118_s17 }
  0x8e   :  { %805 = vrot.lane.b32.xlu0 %v4906_v10, %s4118_s17  ;;  %v4933_v21 = vsel %vm392_vm1, %v414_v23, %v416_v13  ;;  %v4957_v23 = vsel %vm392_vm1, %v418_v2, %v419_v31  ;;  %v428_v2 = vrot.slane %v4358_v56, 2  ;;  %v433_v56 = vrot.slane %v4386_v3, 2 }
  0x8f   :  { %v4920_v58 = vpop.permute.xlu1 %631  ;;  %v438_v3 = vrot.slane %v4414_v19, 2 }
  0x90   :  { %7836 = vst [vmem:[#allocation54_spill] sm:$0xff] %v4920_v58  ;;  %v4926_v59 = vpop.permute.xlu0 %629  ;;  %v421_v58 = vrot.slane %v4297_v39, 2  ;;  %v424_v39 = vrot.slane %v4320_v46, 2 }
  0x91   :  { %7837 = vst [vmem:[#allocation55_spill] sm:$0xff] %v4926_v59  ;;  %811 = vrot.lane.b32.xlu1 %v4916_v7, %s4118_s17 }
  0x92   :  { %809 = vrot.lane.b32.xlu0 %v4923_v51, %s4118_s17  ;;  %v4950_v13 = vsel %vm392_vm1, %v419_v31, %v421_v58  ;;  %v4974_v31 = vsel %vm392_vm1, %v423_v37, %v424_v39 }
  0x93   :  { %v4937_v34 = vpop.permute.xlu1 %635 }
  0x94   :  { %7838 = vst [vmem:[#allocation56_spill] sm:$0xff] %v4937_v34  ;;  %v4943_v59 = vpop.permute.xlu0 %633  ;;  %v426_v34 = vrot.slane %v4325_v47, 2  ;;  %v429_v47 = vrot.slane %v4348_v54, 2  ;;  %v434_v54 = vrot.slane %v4376_v62, 2  ;;  %v439_v62 = vrot.slane %v4404_v16, 2 }
  0x95   :  { %7839 = vst [vmem:[#allocation57_spill] sm:$0xff] %v4943_v59  ;;  %815 = vrot.lane.b32.xlu1 %v4933_v21, %s4118_s17 }
  0x96   :  { %813 = vrot.lane.b32.xlu0 %v4940_v14, %s4118_s17  ;;  %v4967_v58 = vsel %vm392_vm1, %v424_v39, %v426_v34  ;;  %v4991_v39 = vsel %vm392_vm1, %v428_v2, %v429_v47 }
  0x97   :  { %v4954_v8 = vpop.permute.xlu1 %639 }
  0x98   :  { %7840 = vst [vmem:[#allocation58_spill] sm:$0xff] %v4954_v8  ;;  %v4960_v59 = vpop.permute.xlu0 %637  ;;  %v431_v8 = vrot.slane %v4353_v55, 2  ;;  %v436_v55 = vrot.slane %v4381_v63, 2  ;;  %v441_v63 = vrot.slane %v4409_v18, 2  ;;  %v5023_v18 = vsel %vm392_vm1, %v438_v3, %v439_v62 }
  0x99   :  { %7841 = vst [vmem:[#allocation59_spill] sm:$0xff] %v4960_v59  ;;  %819 = vrot.lane.b32.xlu1 %v4950_v13, %s4118_s17 }
  0x9a   :  { %817 = vrot.lane.b32.xlu0 %v4957_v23, %s4118_s17  ;;  %v4984_v34 = vsel %vm392_vm1, %v429_v47, %v431_v8  ;;  %v5001_v8 = vsel %vm392_vm1, %v434_v54, %v436_v55  ;;  %v5008_v47 = vsel %vm392_vm1, %v433_v56, %v434_v54  ;;  %v5018_v55 = vsel %vm392_vm1, %v439_v62, %v441_v63 }
  0x9b   :  { %v4971_v45 = vpop.permute.xlu1 %643 }
  0x9c   :  { %7842 = vst [vmem:[#allocation60_spill] sm:$0xff] %v4971_v45  ;;  %v4977_v59 = vpop.permute.xlu0 %641 }
  0x9d   :  { %823 = vrot.lane.b32.xlu1 %v4967_v58, %s4118_s17 }
  0x9e   :  { %821 = vrot.lane.b32.xlu0 %v4974_v31, %s4118_s17 }
  0x9f   :  { %v4988_v45 = vpop.permute.xlu1 %647 }
  0xa0   :  { %7843 = vst [vmem:[#allocation61_spill] sm:$0xff] %v4988_v45  ;;  %v4994_v37 = vpop.permute.xlu0 %645 }
  0xa1   :  { %827 = vrot.lane.b32.xlu1 %v4984_v34, %s4118_s17 }
  0xa2   :  { %825 = vrot.lane.b32.xlu0 %v4991_v39, %s4118_s17 }
  0xa3   :  { %v5005_v45 = vpop.permute.xlu1 %651 }
  0xa4   :  { %v5011_v2 = vpop.permute.xlu0 %649 }
  0xa5   :  { %831 = vrot.lane.b32.xlu1 %v5001_v8, %s4118_s17 }
  0xa6   :  { %829 = vrot.lane.b32.xlu0 %v5008_v47, %s4118_s17 }
  0xa7   :  { %v5020_v16 = vpop.permute.xlu1 %655 }
  0xa8   :  { %v5025_v54 = vpop.permute.xlu0 %653 }
  0xa9   :  { %835 = vrot.lane.b32.xlu1 %v5018_v55, %s4118_s17 }
  0xaa   :  { %833 = vrot.lane.b32.xlu0 %v5023_v18, %s4118_s17 }
  0xab   :  { %v5031_v19 = vpop.permute.xlu1 %659 }
  0xac   :  { %7844 = vst [vmem:[#allocation62_spill] sm:$0xff] %v5031_v19  ;;  %v5033_v56 = vpop.permute.xlu0 %657 }
  0xad   :  { %991 = vrot.lane.b32.xlu1 %v4177_v1, %s4119_s19  ;;  %v2662_v1 = vld [vmem:[%s7696_s1 + $0x8] sm:$0xff] }
  0xae   :  { %989 = vrot.lane.b32.xlu0 %v4172_v0, %s4119_s19  ;;  %v2661_v0 = vld [vmem:[%s7696_s1] sm:$0xff] }
  0xaf   :  { %v5039_v62 = vpop.permute.xlu1 %663 }
  0xb0   :  { %v5041_v63 = vpop.permute.xlu0 %661 }
  0xb1   :  { %1183 = vrot.lane.b32.xlu1 %v4228_v17, %s4120_s18 }
  0xb2   :  { %1181 = vrot.lane.b32.xlu0 %v4210_v12, %s4120_s18  ;;  %v3955_v12 = vpack.c.bf16 %v2662_v1, %v2661_v0 }
  0xb3   :  { %v5047_v3 = vpop.permute.xlu1 %667 }
  0xb4   :  { %7845 = vst [vmem:[#allocation63_spill] sm:$0xff] %v5047_v3  ;;  %v5049_v19 = vpop.permute.xlu0 %665  ;;  %3956 = vmatprep.subr.bf16.mxu0 %v3955_v12  ;;  %3987 = vmatprep.subr.bf16.mxu1 %v3955_v12 }
  0xb5   :  { %7846 = vst [vmem:[#allocation64_spill] sm:$0xff] %v5049_v19  ;;  %1375 = vrot.lane.b32.xlu1 %v4882_v35, %s4121_s20  ;;  %3958 = vmatpush3.bf16.msra.mxu0 %v3955_v12  ;;  %v2663_v35 = vld [vmem:[%s7696_s1 + $0x10] sm:$0xff]  ;;  %v2664_v19 = vld [vmem:[%s7696_s1 + $0x18] sm:$0xff] }
  0xb6   :  { %1373 = vrot.lane.b32.xlu0 %v4889_v43, %s4121_s20  ;;  %v3959_v43 = vpack.c.bf16 %v2664_v19, %v2663_v35  ;;  %3990 = vmatpush3.bf16.msra.mxu1 %v3955_v12 }
  0xb7   :  { %v5061_v17 = vpop.permute.xlu1 %671 }
  0xb8   :  { %7847 = vst [vmem:[#allocation65_spill] sm:$0xff] %v5061_v17  ;;  %v5063_v3 = vpop.permute.xlu0 %669  ;;  %3960 = vmatprep.subr.bf16.mxu0 %v3959_v43  ;;  %3988 = vmatprep.subr.bf16.mxu1 %v3959_v43 }
  0xb9   :  { %993 = vrot.lane.b32.xlu1 %v4221_v15, %s4119_s19  ;;  %3962 = vmatpush3.bf16.msra.mxu0 %v3959_v43 }
  0xba   :  { %1565 = vrot.lane.b32.xlu0 %v4221_v15, %s4122_s29  ;;  %v2665_v15 = vld [vmem:[%s7696_s1 + $0x20] sm:$0xf]  ;;  %3991 = vmatpush3.bf16.msra.mxu1 %v3959_v43  ;;  %s4124_s1 = smov 32  }
  0xbb   :  { %v5075_v0 = vpop.permute.xlu1 %675  ;;  %3817 = vmatprep.subr.msk.mxu0 %vm2866_vm2, %v2665_v15  ;;  %3989 = vmatprep.subr.msk.mxu1 %vm2866_vm2, %v2665_v15 }
  0xbc   :  { %7848 = vst [vmem:[#allocation66_spill] sm:$0xff] %v5075_v0  ;;  %v5077_v1 = vpop.permute.xlu0 %673 }
  0xbd   :  { %7849 = vst [vmem:[#allocation67_spill] sm:$0xff] %v5077_v1  ;;  %1757 = vrot.lane.b32.xlu1 %v4258_v28, %s4123_s30  ;;  %3818 = vmatpush3.msk.msra.mxu0 %vm2866_vm2, %v2665_v15 }
  0xbe   :  { %1567 = vrot.lane.b32.xlu0 %v4207_v11, %s4122_s29  ;;  %3992 = vmatpush3.msk.msra.mxu1 %vm2866_vm2, %v2665_v15 }
  0xbf   :  { %v5086_v19 = vpop.permute.xlu1 %679 }
  0xc0   :  { %7850 = vst [vmem:[#allocation68_spill] sm:$0xff] %v5086_v19  ;;  %v5088_v12 = vpop.permute.xlu0 %677 }
  0xc1   :  { %7851 = vst [vmem:[#allocation69_spill] sm:$0xff] %v5088_v12  ;;  %1185 = vrot.lane.b32.xlu1 %v4258_v28, %s4120_s18 }
  0xc2   :  { %995 = vrot.lane.b32.xlu0 %v4207_v11, %s4119_s19 }
  0xc3   :  { %v5094_v35 = vpop.permute.xlu1 %683 }
  0xc4   :  { %7852 = vst [vmem:[#allocation70_spill] sm:$0xff] %v5094_v35  ;;  %v5096_v0 = vpop.permute.xlu0 %681 }
  0xc5   :  { %7853 = vst [vmem:[#allocation71_spill] sm:$0xff] %v5096_v0  ;;  %1949 = vrot.lane.b32.xlu1 %v4906_v10, %s4124_s1  ;;  %v5304_v0 = vld [vmem:[%s7695_s0 + $0xa8] sm:$0xff] }
  0xc6   :  { %1759 = vrot.lane.b32.xlu0 %v4253_v25, %s4123_s30 }
  0xc7   :  { %v5102_v43 = vpop.permute.xlu1 %687 }
  0xc8   :  { %7854 = vst [vmem:[#allocation72_spill] sm:$0xff] %v5102_v43  ;;  %v5104_v19 = vpop.permute.xlu0 %685 }
  0xc9   :  { %7855 = vst [vmem:[#allocation73_spill] sm:$0xff] %v5104_v19  ;;  %1377 = vrot.lane.b32.xlu1 %v4906_v10, %s4121_s20 }
  0xca   :  { %1187 = vrot.lane.b32.xlu0 %v4253_v25, %s4120_s18 }
  0xcb   :  { %v5110_v11 = vpop.permute.xlu1 %691 }
  0xcc   :  { %7856 = vst [vmem:[#allocation74_spill] sm:$0xff] %v5110_v11  ;;  %v5112_v28 = vpop.permute.xlu0 %689 }
  0xcd   :  { %7857 = vst [vmem:[#allocation75_spill] sm:$0xff] %v5112_v28  ;;  %1379 = vrot.lane.b32.xlu1 %v4899_v5, %s4121_s20 }
  0xce   :  { %1951 = vrot.lane.b32.xlu0 %v4899_v5, %s4124_s1 }
  0xcf   :  { %v5118_v15 = vpop.permute.xlu1 %695 }
  0xd0   :  { %7858 = vst [vmem:[#allocation76_spill] sm:$0xff] %v5118_v15  ;;  %v5120_v43 = vpop.permute.xlu0 %693 }
  0xd1   :  { %7859 = vst [vmem:[#allocation77_spill] sm:$0xff] %v5120_v43  ;;  %997 = vrot.lane.b32.xlu1 %v4247_v24, %s4119_s19 }
  0xd2   :  { %1569 = vrot.lane.b32.xlu0 %v4247_v24, %s4122_s29 }
  0xd3   :  { %v5126_v25 = vpop.permute.xlu1 %699 }
  0xd4   :  { %7860 = vst [vmem:[#allocation78_spill] sm:$0xff] %v5126_v25  ;;  %v5128_v10 = vpop.permute.xlu0 %697 }
  0xd5   :  { %7861 = vst [vmem:[#allocation79_spill] sm:$0xff] %v5128_v10  ;;  %1761 = vrot.lane.b32.xlu1 %v4286_v36, %s4123_s30 }
  0xd6   :  { %1571 = vrot.lane.b32.xlu0 %v4237_v22, %s4122_s29 }
  0xd7   :  { %v5134_v5 = vpop.permute.xlu1 %703 }
  0xd8   :  { %7862 = vst [vmem:[#allocation80_spill] sm:$0xff] %v5134_v5  ;;  %v5136_v15 = vpop.permute.xlu0 %701 }
  0xd9   :  { %7863 = vst [vmem:[#allocation81_spill] sm:$0xff] %v5136_v15  ;;  %1189 = vrot.lane.b32.xlu1 %v4286_v36, %s4120_s18 }
  0xda   :  { %999 = vrot.lane.b32.xlu0 %v4237_v22, %s4119_s19 }
  0xdb   :  { %v5142_v24 = vpop.permute.xlu1 %707 }
  0xdc   :  { %7864 = vst [vmem:[#allocation82_spill] sm:$0xff] %v5142_v24  ;;  %v5144_v25 = vpop.permute.xlu0 %705 }
  0xdd   :  { %7865 = vst [vmem:[#allocation83_spill] sm:$0xff] %v5144_v25  ;;  %1953 = vrot.lane.b32.xlu1 %v4923_v51, %s4124_s1 }
  0xde   :  { %1763 = vrot.lane.b32.xlu0 %v4281_v33, %s4123_s30 }
  0xdf   :  { %v5150_v10 = vpop.permute.xlu1 %711 }
  0xe0   :  { %7866 = vst [vmem:[#allocation84_spill] sm:$0xff] %v5150_v10  ;;  %v5152_v5 = vpop.permute.xlu0 %709 }
  0xe1   :  { %7867 = vst [vmem:[#allocation85_spill] sm:$0xff] %v5152_v5  ;;  %1381 = vrot.lane.b32.xlu1 %v4923_v51, %s4121_s20 }
  0xe2   :  { %1191 = vrot.lane.b32.xlu0 %v4281_v33, %s4120_s18 }
  0xe3   :  { %v5158_v22 = vpop.permute.xlu1 %715 }
  0xe4   :  { %7868 = vst [vmem:[#allocation86_spill] sm:$0xff] %v5158_v22  ;;  %v5160_v36 = vpop.permute.xlu0 %713 }
  0xe5   :  { %7869 = vst [vmem:[#allocation87_spill] sm:$0xff] %v5160_v36  ;;  %1383 = vrot.lane.b32.xlu1 %v4916_v7, %s4121_s20 }
  0xe6   :  { %1955 = vrot.lane.b32.xlu0 %v4916_v7, %s4124_s1 }
  0xe7   :  { %v5166_v24 = vpop.permute.xlu1 %719 }
  0xe8   :  { %7870 = vst [vmem:[#allocation88_spill] sm:$0xff] %v5166_v24  ;;  %v5168_v10 = vpop.permute.xlu0 %717 }
  0xe9   :  { %7871 = vst [vmem:[#allocation89_spill] sm:$0xff] %v5168_v10  ;;  %1001 = vrot.lane.b32.xlu1 %v4274_v32, %s4119_s19 }
  0xea   :  { %1573 = vrot.lane.b32.xlu0 %v4274_v32, %s4122_s29 }
  0xeb   :  { %v5174_v33 = vpop.permute.xlu1 %723 }
  0xec   :  { %7872 = vst [vmem:[#allocation90_spill] sm:$0xff] %v5174_v33  ;;  %v5176_v51 = vpop.permute.xlu0 %721 }
  0xed   :  { %7873 = vst [vmem:[#allocation91_spill] sm:$0xff] %v5176_v51  ;;  %1765 = vrot.lane.b32.xlu1 %v4314_v44, %s4123_s30 }
  0xee   :  { %1575 = vrot.lane.b32.xlu0 %v4264_v30, %s4122_s29 }
  0xef   :  { %v5182_v7 = vpop.permute.xlu1 %727 }
  0xf0   :  { %7874 = vst [vmem:[#allocation92_spill] sm:$0xff] %v5182_v7  ;;  %v5184_v24 = vpop.permute.xlu0 %725 }
  0xf1   :  { %7875 = vst [vmem:[#allocation93_spill] sm:$0xff] %v5184_v24  ;;  %1193 = vrot.lane.b32.xlu1 %v4314_v44, %s4120_s18 }
  0xf2   :  { %1003 = vrot.lane.b32.xlu0 %v4264_v30, %s4119_s19 }
  0xf3   :  { %v5190_v32 = vpop.permute.xlu1 %731 }
  0xf4   :  { %7876 = vst [vmem:[#allocation94_spill] sm:$0xff] %v5190_v32  ;;  %v5192_v33 = vpop.permute.xlu0 %729 }
  0xf5   :  { %7877 = vst [vmem:[#allocation95_spill] sm:$0xff] %v5192_v33  ;;  %1957 = vrot.lane.b32.xlu1 %v4940_v14, %s4124_s1 }
  0xf6   :  { %1767 = vrot.lane.b32.xlu0 %v4309_v41, %s4123_s30 }
  0xf7   :  { %v5198_v51 = vpop.permute.xlu1 %799 }
  0xf8   :  { %v5200_v7 = vpop.permute.xlu0 %797 }
  0xf9   :  { %1385 = vrot.lane.b32.xlu1 %v4940_v14, %s4121_s20 }
  0xfa   :  { %1195 = vrot.lane.b32.xlu0 %v4309_v41, %s4120_s18 }
  0xfb   :  { %v5206_v30 = vpop.permute.xlu1 %803 }
  0xfc   :  { %v5208_v44 = vpop.permute.xlu0 %801 }
  0xfd   :  { %1387 = vrot.lane.b32.xlu1 %v4933_v21, %s4121_s20 }
  0xfe   :  { %1959 = vrot.lane.b32.xlu0 %v4933_v21, %s4124_s1 }
  0xff   :  { %v5214_v33 = vpop.permute.xlu1 %807 }
 0x100   :  { %v5216_v32 = vpop.permute.xlu0 %805 }
 0x101   :  { %1005 = vrot.lane.b32.xlu1 %v4302_v40, %s4119_s19 }
 0x102   :  { %1577 = vrot.lane.b32.xlu0 %v4302_v40, %s4122_s29 }
 0x103   :  { %v5222_v41 = vpop.permute.xlu1 %811 }
 0x104   :  { %v5224_v14 = vpop.permute.xlu0 %809 }
 0x105   :  { %1769 = vrot.lane.b32.xlu1 %v4342_v52, %s4123_s30 }
 0x106   :  { %1579 = vrot.lane.b32.xlu0 %v4292_v38, %s4122_s29 }
 0x107   :  { %v5230_v21 = vpop.permute.xlu1 %815 }
 0x108   :  { %v5232_v24 = vpop.permute.xlu0 %813 }
 0x109   :  { %1197 = vrot.lane.b32.xlu1 %v4342_v52, %s4120_s18 }
 0x10a   :  { %1007 = vrot.lane.b32.xlu0 %v4292_v38, %s4119_s19 }
 0x10b   :  { %v5238_v40 = vpop.permute.xlu1 %819 }
 0x10c   :  { %v5240_v10 = vpop.permute.xlu0 %817 }
 0x10d   :  { %1961 = vrot.lane.b32.xlu1 %v4957_v23, %s4124_s1 }
 0x10e   :  { %1771 = vrot.lane.b32.xlu0 %v4337_v49, %s4123_s30 }
 0x10f   :  { %v5246_v22 = vpop.permute.xlu1 %823 }
 0x110   :  { %v5248_v36 = vpop.permute.xlu0 %821 }
 0x111   :  { %1389 = vrot.lane.b32.xlu1 %v4957_v23, %s4121_s20 }
 0x112   :  { %1199 = vrot.lane.b32.xlu0 %v4337_v49, %s4120_s18 }
 0x113   :  { %v5254_v38 = vpop.permute.xlu1 %827 }
 0x114   :  { %v5256_v52 = vpop.permute.xlu0 %825 }
 0x115   :  { %1391 = vrot.lane.b32.xlu1 %v4950_v13, %s4121_s20 }
 0x116   :  { %1963 = vrot.lane.b32.xlu0 %v4950_v13, %s4124_s1 }
 0x117   :  { %v5262_v5 = vpop.permute.xlu1 %831 }
 0x118   :  { %v5264_v25 = vpop.permute.xlu0 %829 }
 0x119   :  { %1009 = vrot.lane.b32.xlu1 %v4330_v48, %s4119_s19 }
 0x11a   :  { %1581 = vrot.lane.b32.xlu0 %v4330_v48, %s4122_s29 }
 0x11b   :  { %v5270_v49 = vpop.permute.xlu1 %835 }
 0x11c   :  { %v5272_v23 = vpop.permute.xlu0 %833 }
 0x11d   :  { %1773 = vrot.lane.b32.xlu1 %v4370_v60, %s4123_s30 }
 0x11e   :  { %1583 = vrot.lane.b32.xlu0 %v4320_v46, %s4122_s29 }
 0x11f   :  { %v992_v13 = vpop.permute.xlu1 %991 }
 0x120   :  { %v990_v15 = vpop.permute.xlu0 %989 }
 0x121   :  { %1201 = vrot.lane.b32.xlu1 %v4370_v60, %s4120_s18 }
 0x122   :  { %1011 = vrot.lane.b32.xlu0 %v4320_v46, %s4119_s19 }
 0x123   :  { %v1184_v43 = vpop.permute.xlu1 %1183 }
 0x124   :  { %v1182_v48 = vpop.permute.xlu0 %1181 }
 0x125   :  { %1965 = vrot.lane.b32.xlu1 %v4974_v31, %s4124_s1 }
 0x126   :  { %1775 = vrot.lane.b32.xlu0 %v4365_v57, %s4123_s30 }
 0x127   :  { %v1376_v11 = vpop.permute.xlu1 %1375 }
 0x128   :  { %v1374_v28 = vpop.permute.xlu0 %1373 }
 0x129   :  { %1393 = vrot.lane.b32.xlu1 %v4974_v31, %s4121_s20  ;;  %v4005_v31 = vld [vmem:[%s7695_s0] sm:$0xff] }
 0x12a   :  { %1203 = vrot.lane.b32.xlu0 %v4365_v57, %s4120_s18  ;;  %v2142_v57 = vsel %vm2141_vm3, %v4005_v31, %v4830_v26 }
 0x12b   :  { %v5290_v60 = vpop.permute.xlu1 %993 }
 0x12c   :  { %v1566_v19 = vpop.permute.xlu0 %1565 }
 0x12d   :  { %1395 = vrot.lane.b32.xlu1 %v4967_v58, %s4121_s20 }
 0x12e   :  { %1967 = vrot.lane.b32.xlu0 %v4967_v58, %s4124_s1  ;;  %v2207_v58 = vsel %vm2206_vm4, %v2142_v57, %v5200_v7  ;;  %v5323_v57 = vld [vmem:[%s7695_s0 + $0xb0] sm:$0xff] }
 0x12f   :  { %v1758_v46 = vpop.permute.xlu1 %1757  ;;  %v2272_v12 = vsel %vm2271_vm5, %v2207_v58, %v990_v15 }
 0x130   :  { %v1568_v35 = vpop.permute.xlu0 %1567  ;;  %v2337_v31 = vsel %vm2336_vm6, %v2272_v12, %v1182_v48 }
 0x131   :  { %1013 = vrot.lane.b32.xlu1 %v5304_v0, %s4119_s19  ;;  %v2402_v17 = vsel %vm2401_vm7, %v2337_v31, %v1374_v28 }
 0x132   :  { %1585 = vrot.lane.b32.xlu0 %v5304_v0, %s4122_s29  ;;  %v2467_v7 = vsel %vm2466_vm8, %v2402_v17, %v1566_v19  ;;  %v4008_v17 = vld [vmem:[%s7695_s0 + $0x8] sm:$0xff] }
 0x133   :  { %v1186_v26 = vpop.permute.xlu1 %1185  ;;  %v2532_v12 = vsel %vm2531_vm9, %v2467_v7, %v1758_v46  ;;  %v2143_v19 = vsel %vm2141_vm3, %v4008_v17, %v4847_v42 }
 0x134   :  { %v5314_v1 = vpop.permute.xlu0 %995  ;;  %v2208_v46 = vsel %vm2206_vm4, %v2143_v19, %v5198_v51 }
 0x135   :  { %1777 = vrot.lane.b32.xlu1 %v4398_v9, %s4123_s30  ;;  %v2273_v31 = vsel %vm2271_vm5, %v2208_v46, %v992_v13 }
 0x136   :  { %1587 = vrot.lane.b32.xlu0 %v5323_v57, %s4122_s29 }
 0x137   :  { %v1950_v15 = vpop.permute.xlu1 %1949 }
 0x138   :  { %v1760_v48 = vpop.permute.xlu0 %1759  ;;  %v2597_v28 = vsel %vm2596_vm10, %v2532_v12, %v1950_v15 }
 0x139   :  { %1205 = vrot.lane.b32.xlu1 %v4398_v9, %s4120_s18  ;;  %3819 = vmatprep.mubr.msk.f32.mxu0 %vm2673_vm11, %v2597_v28  ;;  %v2338_v9 = vsel %vm2336_vm6, %v2273_v31, %v1184_v43 }
 0x13a   :  { %1015 = vrot.lane.b32.xlu0 %v5323_v57, %s4119_s19  ;;  %v2403_v12 = vsel %vm2401_vm7, %v2338_v9, %v1376_v11 }
 0x13b   :  { %v1378_v58 = vpop.permute.xlu1 %1377  ;;  %v2468_v42 = vsel %vm2466_vm8, %v2403_v12, %v1568_v35 }
 0x13c   :  { %v1188_v7 = vpop.permute.xlu0 %1187  ;;  %v2533_v28 = vsel %vm2531_vm9, %v2468_v42, %v1760_v48  ;;  %v4009_v48 = vld [vmem:[%s7695_s0 + $0x18] sm:$0xff] }
 0x13d   :  { %1969 = vrot.lane.b32.xlu1 %v4991_v39, %s4124_s1 }
 0x13e   :  { %1779 = vrot.lane.b32.xlu0 %v4393_v4, %s4123_s30 }
 0x13f   :  { %v1380_v15 = vpop.permute.xlu1 %1379 }
 0x140   :  { %v1952_v51 = vpop.permute.xlu0 %1951 }
 0x141   :  { %v2598_v17 = vsel %vm2596_vm10, %v2533_v28, %v1952_v51  ;;  %1397 = vrot.lane.b32.xlu1 %v4991_v39, %s4121_s20  ;;  %v2144_v39 = vsel %vm2141_vm3, %v4009_v48, %v4819_v53 }
 0x142   :  { %1207 = vrot.lane.b32.xlu0 %v4393_v4, %s4120_s18  ;;  %3820 = vmatmul.mubr.msk.f32.vlgmr.msra.gmra.mrb[0].mxu0 %vm2673_vm11, %v2598_v17  ;;  %v5368_v4 = vld [vmem:[%s7695_s0 + $0xc0] sm:$0xff] }
 0x143   :  { %v998_v43 = vpop.permute.xlu1 %997 }
 0x144   :  { %v1570_v11 = vpop.permute.xlu0 %1569 }
 0x145   :  { %1399 = vrot.lane.b32.xlu1 %v4984_v34, %s4121_s20 }
 0x146   :  { %1971 = vrot.lane.b32.xlu0 %v4984_v34, %s4124_s1  ;;  %v2209_v34 = vsel %vm2206_vm4, %v2144_v39, %v5208_v44  ;;  %v5388_v44 = vld [vmem:[%s7695_s0 + $0xc8] sm:$0xff] }
 0x147   :  { %v1762_v35 = vpop.permute.xlu1 %1761  ;;  %v2274_v19 = vsel %vm2271_vm5, %v2209_v34, %v5290_v60 }
 0x148   :  { %v1572_v13 = vpop.permute.xlu0 %1571  ;;  %v2339_v53 = vsel %vm2336_vm6, %v2274_v19, %v1186_v26 }
 0x149   :  { %1017 = vrot.lane.b32.xlu1 %v5368_v4, %s4119_s19  ;;  %v2404_v9 = vsel %vm2401_vm7, %v2339_v53, %v1378_v58  ;;  %v4012_v58 = vld [vmem:[%s7695_s0 + $0x20] sm:$0xff] }
 0x14a   :  { %1589 = vrot.lane.b32.xlu0 %v5368_v4, %s4122_s29  ;;  %v2469_v12 = vsel %vm2466_vm8, %v2404_v9, %v1570_v11  ;;  %v2145_v51 = vsel %vm2141_vm3, %v4012_v58, %v4842_v29  ;;  %v4013_v9 = vld [vmem:[%s7695_s0 + $0x30] sm:$0xff] }
 0x14b   :  { %v1190_v46 = vpop.permute.xlu1 %1189  ;;  %v2534_v60 = vsel %vm2531_vm9, %v2469_v12, %v1762_v35  ;;  %v2210_v17 = vsel %vm2206_vm4, %v2145_v51, %v5206_v30 }
 0x14c   :  { %v5379_v31 = vpop.permute.xlu0 %999  ;;  %v2275_v35 = vsel %vm2271_vm5, %v2210_v17, %v5314_v1  ;;  %v4016_v17 = vld [vmem:[%s7695_s0 + $0x38] sm:$0xff] }
 0x14d   :  { %1781 = vrot.lane.b32.xlu1 %v4426_v27, %s4123_s30  ;;  %v2340_v48 = vsel %vm2336_vm6, %v2275_v35, %v1188_v7 }
 0x14e   :  { %1591 = vrot.lane.b32.xlu0 %v5388_v44, %s4122_s29  ;;  %v2405_v39 = vsel %vm2401_vm7, %v2340_v48, %v1380_v15 }
 0x14f   :  { %v1954_v26 = vpop.permute.xlu1 %1953  ;;  %v2470_v29 = vsel %vm2466_vm8, %v2405_v39, %v1572_v13 }
 0x150   :  { %v2599_v42 = vsel %vm2596_vm10, %v2534_v60, %v1954_v26  ;;  %v1764_v28 = vpop.permute.xlu0 %1763 }
 0x151   :  { %1209 = vrot.lane.b32.xlu1 %v4426_v27, %s4120_s18  ;;  %3822 = vmatprep.mubr.msk.f32.mxu0 %vm2673_vm11, %v2599_v42  ;;  %v2535_v30 = vsel %vm2531_vm9, %v2470_v29, %v1764_v28 }
 0x152   :  { %1019 = vrot.lane.b32.xlu0 %v5388_v44, %s4119_s19 }
 0x153   :  { %v1382_v11 = vpop.permute.xlu1 %1381 }
 0x154   :  { %v1192_v27 = vpop.permute.xlu0 %1191 }
 0x155   :  { %1973 = vrot.lane.b32.xlu1 %v5008_v47, %s4124_s1 }
 0x156   :  { %1783 = vrot.lane.b32.xlu0 %v4421_v20, %s4123_s30 }
 0x157   :  { %v1384_v34 = vpop.permute.xlu1 %1383 }
 0x158   :  { %v1956_v19 = vpop.permute.xlu0 %1955 }
 0x159   :  { %v2600_v53 = vsel %vm2596_vm10, %v2535_v30, %v1956_v19  ;;  %1401 = vrot.lane.b32.xlu1 %v5008_v47, %s4121_s20  ;;  %v2146_v47 = vsel %vm2141_vm3, %v4013_v9, %v4864_v61  ;;  %v7879_v9 = vld [vmem:[#allocation49_spill] sm:$0xff] }
 0x15a   :  { %1211 = vrot.lane.b32.xlu0 %v4421_v20, %s4120_s18  ;;  %3823 = vmatmul.mubr.msk.f32.gmra.mrb[2].mxu0 %vm2673_vm11, %v2600_v53  ;;  %v5434_v20 = vld [vmem:[%s7695_s0 + $0xd8] sm:$0xff] }
 0x15b   :  { %v1002_v1 = vpop.permute.xlu1 %1001 }
 0x15c   :  { %v1574_v7 = vpop.permute.xlu0 %1573 }
 0x15d   :  { %1403 = vrot.lane.b32.xlu1 %v5001_v8, %s4121_s20 }
 0x15e   :  { %1975 = vrot.lane.b32.xlu0 %v5001_v8, %s4124_s1  ;;  %v2211_v8 = vsel %vm2206_vm4, %v2146_v47, %v5216_v32  ;;  %v5453_v32 = vld [vmem:[%s7695_s0 + $0xe0] sm:$0xff] }
 0x15f   :  { %v1766_v15 = vpop.permute.xlu1 %1765  ;;  %v2276_v12 = vsel %vm2271_vm5, %v2211_v8, %v998_v43  ;;  %v5501_v8 = vld [vmem:[%s7695_s0 + $0xf0] sm:$0xff] }
 0x160   :  { %v1576_v13 = vpop.permute.xlu0 %1575  ;;  %v2341_v26 = vsel %vm2336_vm6, %v2276_v12, %v1190_v46 }
 0x161   :  { %1021 = vrot.lane.b32.xlu1 %v5434_v20, %s4119_s19  ;;  %v2406_v42 = vsel %vm2401_vm7, %v2341_v26, %v1382_v11  ;;  %v2147_v11 = vsel %vm2141_vm3, %v4016_v17, %v4858_v6  ;;  %v7878_v6 = vld [vmem:[#allocation5_spill] sm:$0xff] }
 0x162   :  { %1593 = vrot.lane.b32.xlu0 %v5434_v20, %s4122_s29  ;;  %v2471_v28 = vsel %vm2466_vm8, %v2406_v42, %v1574_v7  ;;  %v2212_v35 = vsel %vm2206_vm4, %v2147_v11, %v5214_v33 }
 0x163   :  { %v1194_v60 = vpop.permute.xlu1 %1193  ;;  %v2536_v43 = vsel %vm2531_vm9, %v2471_v28, %v1766_v15  ;;  %v2277_v39 = vsel %vm2271_vm5, %v2212_v35, %v5379_v31 }
 0x164   :  { %v5444_v61 = vpop.permute.xlu0 %1003  ;;  %v2342_v29 = vsel %vm2336_vm6, %v2277_v39, %v1192_v27  ;;  %v7881_v39 = vld [vmem:[#allocation48_spill] sm:$0xff] }
 0x165   :  { %1785 = vrot.lane.b32.xlu1 %v4446_v50, %s4123_s30  ;;  %v2407_v30 = vsel %vm2401_vm7, %v2342_v29, %v1384_v34 }
 0x166   :  { %1595 = vrot.lane.b32.xlu0 %v5453_v32, %s4122_s29  ;;  %v2472_v19 = vsel %vm2466_vm8, %v2407_v30, %v1576_v13 }
 0x167   :  { %v1958_v46 = vpop.permute.xlu1 %1957 }
 0x168   :  { %v2601_v58 = vsel %vm2596_vm10, %v2536_v43, %v1958_v46  ;;  %v1768_v51 = vpop.permute.xlu0 %1767  ;;  %v7880_v46 = vld [vmem:[#allocation7_spill] sm:$0xff] }
 0x169   :  { %1213 = vrot.lane.b32.xlu1 %v4446_v50, %s4120_s18  ;;  %3825 = vmatprep.mubr.msk.f32.mxu0 %vm2673_vm11, %v2601_v58  ;;  %v2537_v33 = vsel %vm2531_vm9, %v2472_v19, %v1768_v51 }
 0x16a   :  { %1023 = vrot.lane.b32.xlu0 %v5453_v32, %s4119_s19 }
 0x16b   :  { %v1386_v48 = vpop.permute.xlu1 %1385 }
 0x16c   :  { %v1196_v50 = vpop.permute.xlu0 %1195 }
 0x16d   :  { %1977 = vrot.lane.b32.xlu1 %v5023_v18, %s4124_s1 }
 0x16e   :  { %1787 = vrot.lane.b32.xlu0 %v7878_v6, %s4123_s30 }
 0x16f   :  { %v1388_v53 = vpop.permute.xlu1 %1387 }
 0x170   :  { %v1960_v7 = vpop.permute.xlu0 %1959 }
 0x171   :  { %v2602_v15 = vsel %vm2596_vm10, %v2537_v33, %v1960_v7  ;;  %1405 = vrot.lane.b32.xlu1 %v5023_v18, %s4121_s20  ;;  %v4017_v18 = vld [vmem:[%s7695_s0 + $0x48] sm:$0xff] }
 0x172   :  { %1215 = vrot.lane.b32.xlu0 %v7878_v6, %s4120_s18  ;;  %3826 = vmatmul.mubr.msk.f32.gmra.mrb[4].mxu0 %vm2673_vm11, %v2602_v15  ;;  %v2148_v47 = vsel %vm2141_vm3, %v4017_v18, %v7879_v9 }
 0x173   :  { %v5487_v31 = vpop.permute.xlu1 %1005 }
 0x174   :  { %v1578_v27 = vpop.permute.xlu0 %1577 }
 0x175   :  { %1407 = vrot.lane.b32.xlu1 %v5018_v55, %s4121_s20 }
 0x176   :  { %1979 = vrot.lane.b32.xlu0 %v5018_v55, %s4124_s1  ;;  %v2213_v55 = vsel %vm2206_vm4, %v2148_v47, %v5224_v14  ;;  %v5520_v14 = vld [vmem:[%s7695_s0 + $0xf8] sm:$0xff] }
 0x177   :  { %v1770_v34 = vpop.permute.xlu1 %1769  ;;  %v2278_v12 = vsel %vm2271_vm5, %v2213_v55, %v1002_v1  ;;  %v443_v1 = vrot.slane %v5501_v8, 2 }
 0x178   :  { %v1580_v13 = vpop.permute.xlu0 %1579  ;;  %v2343_v42 = vsel %vm2336_vm6, %v2278_v12, %v1194_v60  ;;  %v444_v60 = vrot.slane %v5520_v14, 2 }
 0x179   :  { %1025 = vrot.lane.b32.xlu1 %v5501_v8, %s4119_s19  ;;  %v2408_v43 = vsel %vm2401_vm7, %v2343_v42, %v1386_v48  ;;  %v4020_v48 = vld [vmem:[%s7695_s0 + $0x50] sm:$0xff] }
 0x17a   :  { %1597 = vrot.lane.b32.xlu0 %v5501_v8, %s4122_s29  ;;  %v2473_v58 = vsel %vm2466_vm8, %v2408_v43, %v1578_v27  ;;  %v2149_v29 = vsel %vm2141_vm3, %v4020_v48, %v7881_v39  ;;  %v445_v30 = vsel %vm392_vm1, %v443_v1, %v444_v60 }
 0x17b   :  { %v1198_v26 = vpop.permute.xlu1 %1197  ;;  %v2538_v51 = vsel %vm2531_vm9, %v2473_v58, %v1770_v34  ;;  %v2214_v6 = vsel %vm2206_vm4, %v2149_v29, %v5222_v41  ;;  %v7882_v34 = vld [vmem:[#allocation6_spill] sm:$0xff]  ;;  %v4021_v41 = vld [vmem:[%s7695_s0 + $0x100] sm:$0x3]  ;;  %v7883_v58 = vld [vmem:[#allocation51_spill] sm:$0xff] }
 0x17c   :  { %v5511_v28 = vpop.permute.xlu0 %1007  ;;  %v2279_v33 = vsel %vm2271_vm5, %v2214_v6, %v5444_v61  ;;  %v446_v47 = vrot.slane %v4021_v41, 2 }
 0x17d   :  { %1789 = vrot.lane.b32.xlu1 %v7880_v46, %s4123_s30  ;;  %v2344_v15 = vsel %vm2336_vm6, %v2279_v33, %v1196_v50  ;;  %v7884_v33 = vld [vmem:[#allocation9_spill] sm:$0xff] }
 0x17e   :  { %1599 = vrot.lane.b32.xlu0 %v5520_v14, %s4122_s29  ;;  %v2409_v27 = vsel %vm2401_vm7, %v2344_v15, %v1388_v53 }
 0x17f   :  { %v1962_v17 = vpop.permute.xlu1 %1961  ;;  %v2474_v18 = vsel %vm2466_vm8, %v2409_v27, %v1580_v13  ;;  %v447_v13 = vsel %vm392_vm1, %v444_v60, %v446_v47  ;;  %v5601_v27 = vld [vmem:[%s7695_s0 + $0x110] sm:$0xff] }
 0x180   :  { %v2603_v11 = vsel %vm2596_vm10, %v2538_v51, %v1962_v17  ;;  %v1772_v35 = vpop.permute.xlu0 %1771  ;;  %v5571_v51 = vld [vmem:[%s7695_s0 + $0x108] sm:$0xff] }
 0x181   :  { %1217 = vrot.lane.b32.xlu1 %v7880_v46, %s4120_s18  ;;  %3828 = vmatprep.mubr.msk.f32.mxu0 %vm2673_vm11, %v2603_v11  ;;  %v2539_v61 = vsel %vm2531_vm9, %v2474_v18, %v1772_v35  ;;  %v4022_v46 = vld [vmem:[%s7695_s0 + $0x60] sm:$0xff]  ;;  %v449_v18 = vrot.slane %v5601_v27, 2 }
 0x182   :  { %1027 = vrot.lane.b32.xlu0 %v5520_v14, %s4119_s19  ;;  %v2150_v1 = vsel %vm2141_vm3, %v4022_v46, %v7883_v58 }
 0x183   :  { %v1390_v19 = vpop.permute.xlu1 %1389  ;;  %v2215_v60 = vsel %vm2206_vm4, %v2150_v1, %v5232_v24  ;;  %v4026_v1 = vld [vmem:[%s7695_s0 + $0x118] sm:$0x3] }
 0x184   :  { %v1200_v7 = vpop.permute.xlu0 %1199  ;;  %v2280_v17 = vsel %vm2271_vm5, %v2215_v60, %v5487_v31 }
 0x185   :  { %1981 = vrot.lane.b32.xlu1 %v445_v30, %s4124_s1  ;;  %v2345_v35 = vsel %vm2336_vm6, %v2280_v17, %v1198_v26  ;;  %v4024_v26 = vld [vmem:[%s7695_s0 + $0x68] sm:$0xff] }
 0x186   :  { %1791 = vrot.lane.b32.xlu0 %v7882_v34, %s4123_s30  ;;  %v2410_v39 = vsel %vm2401_vm7, %v2345_v35, %v1390_v19  ;;  %v7885_v19 = vld [vmem:[#allocation50_spill] sm:$0xff] }
 0x187   :  { %v1392_v9 = vpop.permute.xlu1 %1391  ;;  %v2151_v15 = vsel %vm2141_vm3, %v4024_v26, %v7885_v19 }
 0x188   :  { %v1964_v55 = vpop.permute.xlu0 %1963  ;;  %v2216_v41 = vsel %vm2206_vm4, %v2151_v15, %v5230_v21 }
 0x189   :  { %v2604_v50 = vsel %vm2596_vm10, %v2539_v61, %v1964_v55  ;;  %1409 = vrot.lane.b32.xlu1 %v445_v30, %s4121_s20  ;;  %v2281_v61 = vsel %vm2271_vm5, %v2216_v41, %v5511_v28 }
 0x18a   :  { %1219 = vrot.lane.b32.xlu0 %v7882_v34, %s4120_s18  ;;  %3829 = vmatmul.mubr.msk.f32.gmra.mrb[6].mxu0 %vm2673_vm11, %v2604_v50  ;;  %v448_v34 = vrot.slane %v5571_v51, 2  ;;  %v2346_v50 = vsel %vm2336_vm6, %v2281_v61, %v1200_v7  ;;  %v7886_v7 = vld [vmem:[#allocation8_spill] sm:$0xff] }
 0x18b   :  { %v5558_v53 = vpop.permute.xlu1 %1009  ;;  %v7888_v61 = vld [vmem:[#allocation52_spill] sm:$0xff] }
 0x18c   :  { %v1582_v12 = vpop.permute.xlu0 %1581 }
 0x18d   :  { %837 = vrot.lane.b32.xlu1 %v445_v30, %s4118_s17  ;;  %v2475_v29 = vsel %vm2466_vm8, %v2410_v39, %v1582_v12  ;;  %v450_v12 = vsel %vm392_vm1, %v448_v34, %v449_v18  ;;  %v5652_v34 = vld [vmem:[%s7695_s0 + $0x120] sm:$0xff] }
 0x18e   :  { %1983 = vrot.lane.b32.xlu0 %v447_v13, %s4124_s1 }
 0x18f   :  { %v1774_v42 = vpop.permute.xlu1 %1773 }
 0x190   :  { %v1584_v43 = vpop.permute.xlu0 %1583  ;;  %v2540_v24 = vsel %vm2531_vm9, %v2475_v29, %v1774_v42  ;;  %v4027_v29 = vld [vmem:[%s7695_s0 + $0x78] sm:$0xff] }
 0x191   :  { %1601 = vrot.lane.b32.xlu1 %v5571_v51, %s4122_s29 }
 0x192   :  { %1411 = vrot.lane.b32.xlu0 %v447_v13, %s4121_s20 }
 0x193   :  { %v1202_v11 = vpop.permute.xlu1 %1201 }
 0x194   :  { %v5581_v48 = vpop.permute.xlu0 %1011 }
 0x195   :  { %1029 = vrot.lane.b32.xlu1 %v5571_v51, %s4119_s19 }
 0x196   :  { %839 = vrot.lane.b32.xlu0 %v447_v13, %s4118_s17  ;;  %v2411_v13 = vsel %vm2401_vm7, %v2346_v50, %v1392_v9 }
 0x197   :  { %v1966_v30 = vpop.permute.xlu1 %1965  ;;  %v2476_v42 = vsel %vm2466_vm8, %v2411_v13, %v1584_v43  ;;  %v451_v43 = vrot.slane %v4026_v1, 2  ;;  %v5680_v1 = vld [vmem:[%s7695_s0 + $0x128] sm:$0xff] }
 0x198   :  { %v2605_v6 = vsel %vm2596_vm10, %v2540_v24, %v1966_v30  ;;  %v1776_v31 = vpop.permute.xlu0 %1775  ;;  %v7887_v24 = vld [vmem:[#allocation53_spill] sm:$0xff] }
 0x199   :  { %1793 = vrot.lane.b32.xlu1 %v7884_v33, %s4123_s30  ;;  %3831 = vmatprep.mubr.msk.f32.mxu0 %vm2673_vm11, %v2605_v6  ;;  %v2541_v46 = vsel %vm2531_vm9, %v2476_v42, %v1776_v31  ;;  %v452_v35 = vsel %vm392_vm1, %v449_v18, %v451_v43  ;;  %v2152_v30 = vsel %vm2141_vm3, %v4027_v29, %v7887_v24 }
 0x19a   :  { %1603 = vrot.lane.b32.xlu0 %v5601_v27, %s4122_s29  ;;  %v2217_v6 = vsel %vm2206_vm4, %v2152_v30, %v5240_v10 }
 0x19b   :  { %v1394_v47 = vpop.permute.xlu1 %1393  ;;  %v2282_v31 = vsel %vm2271_vm5, %v2217_v6, %v5558_v53  ;;  %v4031_v6 = vld [vmem:[%s7695_s0 + $0x130] sm:$0x3] }
 0x19c   :  { %v1204_v55 = vpop.permute.xlu0 %1203  ;;  %v2347_v26 = vsel %vm2336_vm6, %v2282_v31, %v1202_v11  ;;  %v456_v31 = vrot.slane %v4031_v6, 2 }
 0x19d   :  { %1221 = vrot.lane.b32.xlu1 %v7884_v33, %s4120_s18  ;;  %v2412_v15 = vsel %vm2401_vm7, %v2347_v26, %v1394_v47  ;;  %v4029_v47 = vld [vmem:[%s7695_s0 + $0x80] sm:$0xff] }
 0x19e   :  { %1031 = vrot.lane.b32.xlu0 %v5601_v27, %s4119_s19  ;;  %v2153_v50 = vsel %vm2141_vm3, %v4029_v47, %v7888_v61 }
 0x19f   :  { %v1396_v21 = vpop.permute.xlu1 %1395  ;;  %v2218_v13 = vsel %vm2206_vm4, %v2153_v50, %v5238_v40  ;;  %v453_v40 = vrot.slane %v5652_v34, 2 }
 0x1a0   :  { %v1968_v58 = vpop.permute.xlu0 %1967  ;;  %v2283_v42 = vsel %vm2271_vm5, %v2218_v13, %v5581_v48  ;;  %v454_v48 = vrot.slane %v5680_v1, 2 }
 0x1a1   :  { %v2606_v28 = vsel %vm2596_vm10, %v2541_v46, %v1968_v58  ;;  %1985 = vrot.lane.b32.xlu1 %v450_v12, %s4124_s1  ;;  %v2348_v58 = vsel %vm2336_vm6, %v2283_v42, %v1204_v55 }
 0x1a2   :  { %1795 = vrot.lane.b32.xlu0 %v7886_v7, %s4123_s30  ;;  %3832 = vmatmul.mubr.msk.f32.gmra.mrb[8].mxu0 %vm2673_vm11, %v2606_v28  ;;  %v7889_v28 = vld [vmem:[#allocation11_spill] sm:$0xff]  ;;  %v457_v47 = vsel %vm392_vm1, %v454_v48, %v456_v31 }
 0x1a3   :  { %v5625_v9 = vpop.permute.xlu1 %1013 }
 0x1a4   :  { %v1586_v60 = vpop.permute.xlu0 %1585 }
 0x1a5   :  { %1413 = vrot.lane.b32.xlu1 %v450_v12, %s4121_s20  ;;  %v2477_v10 = vsel %vm2466_vm8, %v2412_v15, %v1586_v60  ;;  %v4032_v15 = vld [vmem:[%s7695_s0 + $0x90] sm:$0xff] }
 0x1a6   :  { %1223 = vrot.lane.b32.xlu0 %v7886_v7, %s4120_s18  ;;  %v2413_v7 = vsel %vm2401_vm7, %v2348_v58, %v1396_v21 }
 0x1a7   :  { %v1778_v17 = vpop.permute.xlu1 %1777 }
 0x1a8   :  { %v1588_v39 = vpop.permute.xlu0 %1587  ;;  %v2542_v53 = vsel %vm2531_vm9, %v2477_v10, %v1778_v17  ;;  %v7891_v10 = vld [vmem:[#allocation55_spill] sm:$0xff] }
 0x1a9   :  { %841 = vrot.lane.b32.xlu1 %v450_v12, %s4118_s17  ;;  %v2478_v43 = vsel %vm2466_vm8, %v2413_v7, %v1588_v39  ;;  %v7890_v39 = vld [vmem:[#allocation10_spill] sm:$0xff] }
 0x1aa   :  { %1987 = vrot.lane.b32.xlu0 %v452_v35, %s4124_s1  ;;  %v7892_v7 = vld [vmem:[#allocation54_spill] sm:$0xff] }
 0x1ab   :  { %v1206_v33 = vpop.permute.xlu1 %1205 }
 0x1ac   :  { %v5646_v19 = vpop.permute.xlu0 %1015 }
 0x1ad   :  { %1605 = vrot.lane.b32.xlu1 %v5652_v34, %s4122_s29 }
 0x1ae   :  { %1415 = vrot.lane.b32.xlu0 %v452_v35, %s4121_s20 }
 0x1af   :  { %v1970_v18 = vpop.permute.xlu1 %1969 }
 0x1b0   :  { %v2607_v11 = vsel %vm2596_vm10, %v2542_v53, %v1970_v18  ;;  %v1780_v41 = vpop.permute.xlu0 %1779  ;;  %v2154_v53 = vsel %vm2141_vm3, %v4032_v15, %v7891_v10 }
 0x1b1   :  { %1033 = vrot.lane.b32.xlu1 %v5652_v34, %s4119_s19  ;;  %3834 = vmatprep.mubr.msk.f32.mxu0 %vm2673_vm11, %v2607_v11  ;;  %v2543_v60 = vsel %vm2531_vm9, %v2478_v43, %v1780_v41  ;;  %v2219_v18 = vsel %vm2206_vm4, %v2154_v53, %v5248_v36 }
 0x1b2   :  { %843 = vrot.lane.b32.xlu0 %v452_v35, %s4118_s17  ;;  %v455_v35 = vsel %vm392_vm1, %v453_v40, %v454_v48  ;;  %v2284_v11 = vsel %vm2271_vm5, %v2219_v18, %v5625_v9 }
 0x1b3   :  { %v1398_v12 = vpop.permute.xlu1 %1397  ;;  %v2349_v61 = vsel %vm2336_vm6, %v2284_v11, %v1206_v33  ;;  %v5728_v33 = vld [vmem:[%s7695_s0 + $0x138] sm:$0xff]  ;;  %v7894_v11 = vld [vmem:[#allocation57_spill] sm:$0xff] }
 0x1b4   :  { %v1208_v46 = vpop.permute.xlu0 %1207  ;;  %v2414_v13 = vsel %vm2401_vm7, %v2349_v61, %v1398_v12  ;;  %v4034_v12 = vld [vmem:[%s7695_s0 + $0x98] sm:$0xff] }
 0x1b5   :  { %1797 = vrot.lane.b32.xlu1 %v7889_v28, %s4123_s30  ;;  %v2155_v40 = vsel %vm2141_vm3, %v4034_v12, %v7892_v7 }
 0x1b6   :  { %1607 = vrot.lane.b32.xlu0 %v5680_v1, %s4122_s29  ;;  %v2220_v48 = vsel %vm2206_vm4, %v2155_v40, %v5246_v22 }
 0x1b7   :  { %v1400_v55 = vpop.permute.xlu1 %1399 }
 0x1b8   :  { %v1972_v17 = vpop.permute.xlu0 %1971 }
 0x1b9   :  { %v2608_v21 = vsel %vm2596_vm10, %v2543_v60, %v1972_v17  ;;  %1225 = vrot.lane.b32.xlu1 %v7889_v28, %s4120_s18  ;;  %v2285_v60 = vsel %vm2271_vm5, %v2220_v48, %v5646_v19  ;;  %v7893_v19 = vld [vmem:[#allocation13_spill] sm:$0xff] }
 0x1ba   :  { %1035 = vrot.lane.b32.xlu0 %v5680_v1, %s4119_s19  ;;  %3835 = vmatmul.mubr.msk.f32.gmra.mrb[10].mxu0 %vm2673_vm11, %v2608_v21  ;;  %v2350_v21 = vsel %vm2336_vm6, %v2285_v60, %v1208_v46  ;;  %v5756_v46 = vld [vmem:[%s7695_s0 + $0x140] sm:$0xff] }
 0x1bb   :  { %v5695_v29 = vpop.permute.xlu1 %1017  ;;  %v459_v31 = vrot.slane %v5756_v46, 2 }
 0x1bc   :  { %v1590_v24 = vpop.permute.xlu0 %1589 }
 0x1bd   :  { %1989 = vrot.lane.b32.xlu1 %v455_v35, %s4124_s1  ;;  %v2479_v42 = vsel %vm2466_vm8, %v2414_v13, %v1590_v24  ;;  %v7895_v13 = vld [vmem:[#allocation12_spill] sm:$0xff] }
 0x1be   :  { %1799 = vrot.lane.b32.xlu0 %v7890_v39, %s4123_s30 }
 0x1bf   :  { %v1782_v30 = vpop.permute.xlu1 %1781 }
 0x1c0   :  { %v1592_v26 = vpop.permute.xlu0 %1591  ;;  %v2544_v36 = vsel %vm2531_vm9, %v2479_v42, %v1782_v30 }
 0x1c1   :  { %1417 = vrot.lane.b32.xlu1 %v455_v35, %s4121_s20 }
 0x1c2   :  { %1227 = vrot.lane.b32.xlu0 %v7890_v39, %s4120_s18 }
 0x1c3   :  { %v1210_v41 = vpop.permute.xlu1 %1209 }
 0x1c4   :  { %v5717_v50 = vpop.permute.xlu0 %1019 }
 0x1c5   :  { %845 = vrot.lane.b32.xlu1 %v455_v35, %s4118_s17  ;;  %v2415_v35 = vsel %vm2401_vm7, %v2350_v21, %v1400_v55  ;;  %v458_v55 = vrot.slane %v5728_v33, 2 }
 0x1c6   :  { %1991 = vrot.lane.b32.xlu0 %v457_v47, %s4124_s1  ;;  %v2480_v24 = vsel %vm2466_vm8, %v2415_v35, %v1592_v26 }
 0x1c7   :  { %v1974_v58 = vpop.permute.xlu1 %1973  ;;  %v460_v10 = vsel %vm392_vm1, %v458_v55, %v459_v31 }
 0x1c8   :  { %v2609_v9 = vsel %vm2596_vm10, %v2544_v36, %v1974_v58  ;;  %v1784_v28 = vpop.permute.xlu0 %1783  ;;  %v4036_v58 = vld [vmem:[%s7695_s0 + $0x148] sm:$0x3] }
 0x1c9   :  { %1609 = vrot.lane.b32.xlu1 %v5728_v33, %s4122_s29  ;;  %3837 = vmatprep.mubr.msk.f32.mxu0 %vm2673_vm11, %v2609_v9  ;;  %v2545_v30 = vsel %vm2531_vm9, %v2480_v24, %v1784_v28  ;;  %v461_v9 = vrot.slane %v4036_v58, 2 }
 0x1ca   :  { %1419 = vrot.lane.b32.xlu0 %v457_v47, %s4121_s20 }
 0x1cb   :  { %v1402_v43 = vpop.permute.xlu1 %1401  ;;  %v462_v40 = vsel %vm392_vm1, %v459_v31, %v461_v9 }
 0x1cc   :  { %v1212_v17 = vpop.permute.xlu0 %1211 }
 0x1cd   :  { %1037 = vrot.lane.b32.xlu1 %v5728_v33, %s4119_s19 }
 0x1ce   :  { %847 = vrot.lane.b32.xlu0 %v457_v47, %s4118_s17  ;;  %v2156_v47 = vsel %vm2141_vm3, %v5304_v0, %v7894_v11 }
 0x1cf   :  { %v1404_v39 = vpop.permute.xlu1 %1403  ;;  %v2221_v61 = vsel %vm2206_vm4, %v2156_v47, %v5256_v52 }
 0x1d0   :  { %v1976_v22 = vpop.permute.xlu0 %1975  ;;  %v2286_v42 = vsel %vm2271_vm5, %v2221_v61, %v5695_v29  ;;  %v7898_v61 = vld [vmem:[#allocation59_spill] sm:$0xff] }
 0x1d1   :  { %v2610_v6 = vsel %vm2596_vm10, %v2545_v30, %v1976_v22  ;;  %1801 = vrot.lane.b32.xlu1 %v7893_v19, %s4123_s30  ;;  %v2351_v28 = vsel %vm2336_vm6, %v2286_v42, %v1210_v41  ;;  %v7896_v41 = vld [vmem:[#allocation56_spill] sm:$0xff] }
 0x1d2   :  { %1611 = vrot.lane.b32.xlu0 %v5756_v46, %s4122_s29  ;;  %3838 = vmatmul.mubr.msk.f32.gmra.mrb[12].mxu0 %vm2673_vm11, %v2610_v6  ;;  %v2416_v12 = vsel %vm2401_vm7, %v2351_v28, %v1402_v43  ;;  %v2157_v43 = vsel %vm2141_vm3, %v5323_v57, %v7896_v41  ;;  %v5806_v6 = vld [vmem:[%s7695_s0 + $0x150] sm:$0xff] }
 0x1d3   :  { %v1022_v26 = vpop.permute.xlu1 %1021  ;;  %v2222_v21 = vsel %vm2206_vm4, %v2157_v43, %v5254_v38  ;;  %v7900_v41 = vld [vmem:[#allocation58_spill] sm:$0xff] }
 0x1d4   :  { %v1594_v15 = vpop.permute.xlu0 %1593  ;;  %v2287_v24 = vsel %vm2271_vm5, %v2222_v21, %v5717_v50  ;;  %v2159_v43 = vsel %vm2141_vm3, %v5388_v44, %v7900_v41 }
 0x1d5   :  { %1229 = vrot.lane.b32.xlu1 %v7893_v19, %s4120_s18  ;;  %v2481_v52 = vsel %vm2466_vm8, %v2416_v12, %v1594_v15  ;;  %v2352_v22 = vsel %vm2336_vm6, %v2287_v24, %v1212_v17  ;;  %v7897_v15 = vld [vmem:[#allocation15_spill] sm:$0xff]  ;;  %v2224_v21 = vsel %vm2206_vm4, %v2159_v43, %v5262_v5  ;;  %v7903_v43 = vld [vmem:[#allocation60_spill] sm:$0xff] }
 0x1d6   :  { %1039 = vrot.lane.b32.xlu0 %v5756_v46, %s4119_s19  ;;  %v2417_v57 = vsel %vm2401_vm7, %v2352_v22, %v1404_v39 }
 0x1d7   :  { %v1786_v53 = vpop.permute.xlu1 %1785 }
 0x1d8   :  { %v1596_v18 = vpop.permute.xlu0 %1595  ;;  %v2546_v29 = vsel %vm2531_vm9, %v2481_v52, %v1786_v53  ;;  %v463_v53 = vrot.slane %v5806_v6, 2 }
 0x1d9   :  { %1993 = vrot.lane.b32.xlu1 %v460_v10, %s4124_s1  ;;  %v2482_v38 = vsel %vm2466_vm8, %v2417_v57, %v1596_v18 }
 0x1da   :  { %1803 = vrot.lane.b32.xlu0 %v7895_v13, %s4123_s30 }
 0x1db   :  { %v1214_v36 = vpop.permute.xlu1 %1213 }
 0x1dc   :  { %v5782_v0 = vpop.permute.xlu0 %1023 }
 0x1dd   :  { %1421 = vrot.lane.b32.xlu1 %v460_v10, %s4121_s20  ;;  %v2289_v22 = vsel %vm2271_vm5, %v2224_v21, %v5782_v0  ;;  %v5880_v0 = vld [vmem:[%s7695_s0 + $0x168] sm:$0xff]  ;;  %v2161_v21 = vsel %vm2141_vm3, %v5453_v32, %v7903_v43  ;;  %v2162_v43 = vsel %vm2141_vm3, %v5501_v8, %v4994_v37 }
 0x1de   :  { %1231 = vrot.lane.b32.xlu0 %v7895_v13, %s4120_s18  ;;  %v2158_v13 = vsel %vm2141_vm3, %v5368_v4, %v7898_v61 }
 0x1df   :  { %v1978_v7 = vpop.permute.xlu1 %1977  ;;  %v2223_v42 = vsel %vm2206_vm4, %v2158_v13, %v5264_v25  ;;  %v7899_v25 = vld [vmem:[#allocation14_spill] sm:$0xff] }
 0x1e0   :  { %v2611_v48 = vsel %vm2596_vm10, %v2546_v29, %v1978_v7  ;;  %v1788_v60 = vpop.permute.xlu0 %1787  ;;  %v2288_v9 = vsel %vm2271_vm5, %v2223_v42, %v1022_v26  ;;  %v4039_v26 = vld [vmem:[%s7695_s0 + $0x160] sm:$0x3] }
 0x1e1   :  { %849 = vrot.lane.b32.xlu1 %v460_v10, %s4118_s17  ;;  %3840 = vmatprep.mubr.msk.f32.mxu0 %vm2673_vm11, %v2611_v48  ;;  %v2547_v50 = vsel %vm2531_vm9, %v2482_v38, %v1788_v60  ;;  %v5826_v10 = vld [vmem:[%s7695_s0 + $0x158] sm:$0xff]  ;;  %v2353_v12 = vsel %vm2336_vm6, %v2288_v9, %v1214_v36  ;;  %v466_v48 = vrot.slane %v4039_v26, 2 }
 0x1e2   :  { %1995 = vrot.lane.b32.xlu0 %v462_v40, %s4124_s1  ;;  %v464_v18 = vrot.slane %v5826_v10, 2 }
 0x1e3   :  { %v1406_v35 = vpop.permute.xlu1 %1405 }
 0x1e4   :  { %v1216_v30 = vpop.permute.xlu0 %1215  ;;  %v465_v58 = vsel %vm392_vm1, %v463_v53, %v464_v18  ;;  %v2418_v4 = vsel %vm2401_vm7, %v2353_v12, %v1406_v35  ;;  %v467_v24 = vsel %vm392_vm1, %v464_v18, %v466_v48  ;;  %v7901_v18 = vld [vmem:[#allocation17_spill] sm:$0xff] }
 0x1e5   :  { %1613 = vrot.lane.b32.xlu1 %v5806_v6, %s4122_s29  ;;  %v2354_v38 = vsel %vm2336_vm6, %v2289_v22, %v1216_v30  ;;  %v2226_v22 = vsel %vm2206_vm4, %v2161_v21, %v5270_v49 }
 0x1e6   :  { %1423 = vrot.lane.b32.xlu0 %v462_v40, %s4121_s20 }
 0x1e7   :  { %v1408_v19 = vpop.permute.xlu1 %1407 }
 0x1e8   :  { %v1980_v55 = vpop.permute.xlu0 %1979 }
 0x1e9   :  { %v2612_v17 = vsel %vm2596_vm10, %v2547_v50, %v1980_v55  ;;  %1041 = vrot.lane.b32.xlu1 %v5806_v6, %s4119_s19  ;;  %v2419_v50 = vsel %vm2401_vm7, %v2354_v38, %v1408_v19 }
 0x1ea   :  { %851 = vrot.lane.b32.xlu0 %v462_v40, %s4118_s17  ;;  %3841 = vmatmul.mubr.msk.f32.gmra.mrb[14].mxu0 %vm2673_vm11, %v2612_v17 }
 0x1eb   :  { %v5819_v31 = vpop.permute.xlu1 %1025 }
 0x1ec   :  { %v1598_v39 = vpop.permute.xlu0 %1597 }
 0x1ed   :  { %1805 = vrot.lane.b32.xlu1 %v7897_v15, %s4123_s30  ;;  %v2483_v29 = vsel %vm2466_vm8, %v2418_v4, %v1598_v39 }
 0x1ee   :  { %1615 = vrot.lane.b32.xlu0 %v5826_v10, %s4122_s29 }
 0x1ef   :  { %v1790_v11 = vpop.permute.xlu1 %1789 }
 0x1f0   :  { %v1600_v47 = vpop.permute.xlu0 %1599  ;;  %v2548_v7 = vsel %vm2531_vm9, %v2483_v29, %v1790_v11  ;;  %v5898_v11 = vld [vmem:[%s7695_s0 + $0x170] sm:$0xff] }
 0x1f1   :  { %1233 = vrot.lane.b32.xlu1 %v7897_v15, %s4120_s18  ;;  %v2484_v44 = vsel %vm2466_vm8, %v2419_v50, %v1600_v47  ;;  %v468_v47 = vrot.slane %v5880_v0, 2  ;;  %v469_v61 = vrot.slane %v5898_v11, 2 }
 0x1f2   :  { %1043 = vrot.lane.b32.xlu0 %v5826_v10, %s4119_s19 }
 0x1f3   :  { %v1218_v28 = vpop.permute.xlu1 %1217  ;;  %v470_v12 = vsel %vm392_vm1, %v468_v47, %v469_v61  ;;  %v75_v47 = vld [vmem:[%s7695_s0 + $0x180] sm:$0xff] }
 0x1f4   :  { %v5844_v52 = vpop.permute.xlu0 %1027 }
 0x1f5   :  { %1997 = vrot.lane.b32.xlu1 %v465_v58, %s4124_s1 }
 0x1f6   :  { %1807 = vrot.lane.b32.xlu0 %v7899_v25, %s4123_s30 }
 0x1f7   :  { %v1982_v40 = vpop.permute.xlu1 %1981 }
 0x1f8   :  { %v2613_v36 = vsel %vm2596_vm10, %v2548_v7, %v1982_v40  ;;  %v1792_v60 = vpop.permute.xlu0 %1791 }
 0x1f9   :  { %1425 = vrot.lane.b32.xlu1 %v465_v58, %s4121_s20  ;;  %3843 = vmatprep.mubr.msk.f32.mxu0 %vm2673_vm11, %v2613_v36  ;;  %v2549_v5 = vsel %vm2531_vm9, %v2484_v44, %v1792_v60 }
 0x1fa   :  { %1235 = vrot.lane.b32.xlu0 %v7899_v25, %s4120_s18 }
 0x1fb   :  { %v1410_v35 = vpop.permute.xlu1 %1409 }
 0x1fc   :  { %v1220_v57 = vpop.permute.xlu0 %1219 }
 0x1fd   :  { %853 = vrot.lane.b32.xlu1 %v465_v58, %s4118_s17  ;;  %v2160_v58 = vsel %vm2141_vm3, %v5434_v20, %v4977_v59  ;;  %v7902_v20 = vld [vmem:[#allocation16_spill] sm:$0xff] }
 0x1fe   :  { %1999 = vrot.lane.b32.xlu0 %v467_v24, %s4124_s1  ;;  %v2225_v9 = vsel %vm2206_vm4, %v2160_v58, %v5272_v23 }
 0x1ff   :  { %v5873_v55 = vpop.permute.xlu1 %837  ;;  %v2290_v4 = vsel %vm2271_vm5, %v2225_v9, %v5819_v31  ;;  %v5930_v31 = vld [vmem:[%s7697_s2] ss:$0 sm:$0xff] }
 0x200   :  { %v1984_v17 = vpop.permute.xlu0 %1983  ;;  %v2355_v25 = vsel %vm2336_vm6, %v2290_v4, %v1218_v28  ;;  %v4042_v28 = vld [vmem:[%s7695_s0 + $0x178] sm:$0x3]  ;;  %v559_v4 = vrot.slane %v75_v47, 1  ;;  %v2227_v21 = vsel %vm2206_vm4, %v2162_v43, %v5873_v55 }
 0x201   :  { %v2614_v39 = vsel %vm2596_vm10, %v2549_v5, %v1984_v17  ;;  %1617 = vrot.lane.b32.xlu1 %v5880_v0, %s4122_s29  ;;  %v2420_v59 = vsel %vm2401_vm7, %v2355_v25, %v1410_v35  ;;  %v471_v48 = vrot.slane %v4042_v28, 2  ;;  %v2291_v5 = vsel %vm2271_vm5, %v2226_v22, %v5844_v52 }
 0x202   :  { %1427 = vrot.lane.b32.xlu0 %v467_v24, %s4121_s20  ;;  %3844 = vmatmul.mubr.msk.f32.gmra.mrb[16].mxu0 %vm2673_vm11, %v2614_v39  ;;  %v2356_v32 = vsel %vm2336_vm6, %v2291_v5, %v1220_v57  ;;  %v5967_v57 = vld [vmem:[%s7695_s0 + $0x188] sm:$0xff]  ;;  %v569_v28 = vrot.slane %v75_v47, 2 }
 0x203   :  { %v1602_v30 = vpop.permute.xlu1 %1601  ;;  %v472_v44 = vsel %vm392_vm1, %v469_v61, %v471_v48  ;;  %v570_v48 = vrot.slane %v5967_v57, 2 }
 0x204   :  { %v1412_v19 = vpop.permute.xlu0 %1411  ;;  %v2485_v23 = vsel %vm2466_vm8, %v2420_v59, %v1602_v30 }
 0x205   :  { %1045 = vrot.lane.b32.xlu1 %v5880_v0, %s4119_s19 }
 0x206   :  { %855 = vrot.lane.b32.xlu0 %v467_v24, %s4118_s17 }
 0x207   :  { %v5889_v15 = vpop.permute.xlu1 %1029 }
 0x208   :  { %v5891_v53 = vpop.permute.xlu0 %839 }
 0x209   :  { %1809 = vrot.lane.b32.xlu1 %v7901_v18, %s4123_s30 }
 0x20a   :  { %1619 = vrot.lane.b32.xlu0 %v5898_v11, %s4122_s29 }
 0x20b   :  { %v1794_v13 = vpop.permute.xlu1 %1793 }
 0x20c   :  { %v1604_v42 = vpop.permute.xlu0 %1603  ;;  %v2550_v40 = vsel %vm2531_vm9, %v2485_v23, %v1794_v13 }
 0x20d   :  { %1237 = vrot.lane.b32.xlu1 %v7901_v18, %s4120_s18  ;;  %v2421_v18 = vsel %vm2401_vm7, %v2356_v32, %v1412_v19 }
 0x20e   :  { %1047 = vrot.lane.b32.xlu0 %v5898_v11, %s4119_s19  ;;  %v2486_v52 = vsel %vm2466_vm8, %v2421_v18, %v1604_v42  ;;  %v560_v42 = vrot.slane %v5967_v57, 1 }
 0x20f   :  { %v5916_v29 = vpop.permute.xlu1 %1221 }
 0x210   :  { %v5919_v7 = vpop.permute.xlu0 %1031  ;;  %v561_v23 = vsel %vm231_vm0, %v559_v4, %v560_v42 }
 0x211   :  { %2001 = vrot.lane.b32.xlu1 %v470_v12, %s4124_s1 }
 0x212   :  { %1811 = vrot.lane.b32.xlu0 %v7902_v20, %s4123_s30 }
 0x213   :  { %v1986_v26 = vpop.permute.xlu1 %1985 }
 0x214   :  { %v2615_v36 = vsel %vm2596_vm10, %v2550_v40, %v1986_v26  ;;  %v1796_v60 = vpop.permute.xlu0 %1795  ;;  %v77_v26 = vld [vmem:[%s7695_s0 + $0x190] sm:$0x3] }
 0x215   :  { %v3821_v41 = vpop.f32.mrb[0].mxu0  ;;  %1429 = vrot.lane.b32.xlu1 %v470_v12, %s4121_s20  ;;  %3846 = vmatprep.mubr.msk.f32.mxu0 %vm2673_vm11, %v2615_v36  ;;  %v2551_v19 = vsel %vm2531_vm9, %v2486_v52, %v1796_v60  ;;  %v562_v60 = vrot.slane %v77_v26, 1  ;;  %v572_v52 = vrot.slane %v77_v26, 2 }
 0x216   :  { %v2942_v35 = vadd.f32 %v3821_v41, %v5930_v31  ;;  %v2936_v24 = vpop.f32.mrb[1].mxu0  ;;  %1239 = vrot.lane.b32.xlu0 %v7902_v20, %s4120_s18 }
 0x217   :  { %v2937_v38 = vadd.f32 %v5930_v31, %v2936_v24  ;;  %v1414_v50 = vpop.permute.xlu1 %1413  ;;  %v2292_v24 = vsel %vm2271_vm5, %v2227_v21, %v5889_v15  ;;  %v6017_v15 = vld [vmem:[%s7695_s0 + $0x1b0] sm:$0xff] }
 0x218   :  { %v3256_v17 = vmax.f32 %v2942_v35, 0.0  ;;  %v5950_v39 = vpop.permute.xlu0 %1223  ;;  %v571_v35 = vsel %vm392_vm1, %v569_v28, %v570_v48  ;;  %v2357_v37 = vsel %vm2336_vm6, %v2292_v24, %v5916_v29  ;;  %v473_v29 = vrot.slane %v6017_v15, 2 }
 0x219   :  { %v3255_v30 = vmax.f32 %v2937_v38, 0.0  ;;  %857 = vrot.lane.b32.xlu1 %v470_v12, %s4118_s17  ;;  %v563_v38 = vsel %vm231_vm0, %v560_v42, %v562_v60  ;;  %v573_v28 = vsel %vm392_vm1, %v570_v48, %v572_v52  ;;  %v78_v48 = vld [vmem:[%s7695_s0 + $0x198] sm:$0xff] }
 0x21a   :  { %v3320_v49 = vsel %vm2206_vm4, %v3256_v17, 0.0  ;;  %2003 = vrot.lane.b32.xlu0 %v472_v44, %s4124_s1  ;;  %v595_v52 = vrot.slane %v78_v48, 2 }
 0x21b   :  { %v3319_v61 = vsel %vm2206_vm4, %v3255_v30, 0.0  ;;  %v5962_v13 = vpop.permute.xlu1 %841 }
 0x21c   :  { %v5970_v58 = vadd.f32 %v3320_v49, %v3319_v61  ;;  %v1988_v9 = vpop.permute.xlu0 %1987 }
 0x21d   :  { %v2616_v12 = vsel %vm2596_vm10, %v2551_v19, %v1988_v9  ;;  %1621 = vrot.lane.b32.xlu1 %v75_v47, %s4122_s29 }
 0x21e   :  { %1431 = vrot.lane.b32.xlu0 %v472_v44, %s4121_s20  ;;  %3847 = vmatmul.mubr.msk.f32.gmra.mrb[18].mxu0 %vm2673_vm11, %v2616_v12  ;;  %v7904_v12 = vld [vmem:[#allocation61_spill] sm:$0xff] }
 0x21f   :  { %v1606_v25 = vpop.permute.xlu1 %1605  ;;  %v2163_v4 = vsel %vm2141_vm3, %v5520_v14, %v7904_v12  ;;  %v2164_v12 = vsel %vm2141_vm3, %v5571_v51, %v5011_v2 }
 0x220   :  { %v1416_v59 = vpop.permute.xlu0 %1415 }
 0x221   :  { %1049 = vrot.lane.b32.xlu1 %v75_v47, %s4119_s19 }
 0x222   :  { %859 = vrot.lane.b32.xlu0 %v472_v44, %s4118_s17  ;;  %v2422_v44 = vsel %vm2401_vm7, %v2357_v37, %v1414_v50  ;;  %v6023_v50 = vld [vmem:[%s7695_s0 + $0x1b8] sm:$0xff] }
 0x223   :  { %v5980_v20 = vpop.permute.xlu1 %1033  ;;  %v2487_v5 = vsel %vm2466_vm8, %v2422_v44, %v1606_v25  ;;  %v474_v30 = vrot.slane %v6023_v50, 2  ;;  %v2228_v25 = vsel %vm2206_vm4, %v2163_v4, %v5891_v53 }
 0x224   :  { %v5982_v40 = vpop.permute.xlu0 %843 }
 0x225   :  { %1813 = vrot.lane.b32.xlu1 %v561_v23, %s4123_s30  ;;  %v475_v42 = vsel %vm392_vm1, %v473_v29, %v474_v30  ;;  %v6075_v29 = vld [vmem:[%s7695_s0 + $0x1c8] sm:$0xff] }
 0x226   :  { %1623 = vrot.lane.b32.xlu0 %v5967_v57, %s4122_s29  ;;  %v478_v2 = vrot.slane %v6075_v29, 2 }
 0x227   :  { %v1798_v36 = vpop.permute.xlu1 %1797 }
 0x228   :  { %v1608_v41 = vpop.permute.xlu0 %1607  ;;  %v2552_v18 = vsel %vm2531_vm9, %v2487_v5, %v1798_v36  ;;  %v2293_v36 = vsel %vm2271_vm5, %v2228_v25, %v5919_v7 }
 0x229   :  { %1241 = vrot.lane.b32.xlu1 %v561_v23, %s4120_s18  ;;  %v2358_v14 = vsel %vm2336_vm6, %v2293_v36, %v5950_v39  ;;  %v4045_v39 = vld [vmem:[%s7695_s0 + $0x1c0] sm:$0x3] }
 0x22a   :  { %1051 = vrot.lane.b32.xlu0 %v5967_v57, %s4119_s19  ;;  %v2423_v53 = vsel %vm2401_vm7, %v2358_v14, %v1416_v59  ;;  %v476_v24 = vrot.slane %v4045_v39, 2  ;;  %v6063_v59 = vld [vmem:[%s7695_s0 + $0x1a0] sm:$0xff] }
 0x22b   :  { %v6002_v22 = vpop.permute.xlu1 %1225 }
 0x22c   :  { %v6007_v8 = vpop.permute.xlu0 %1035 }
 0x22d   :  { %v3824_v55 = vpop.f32.mrb[2].mxu0  ;;  %2005 = vrot.lane.b32.xlu1 %v571_v35, %s4124_s1 }
 0x22e   :  { %v2952_v17 = vadd.f32 %v3824_v55, %v5930_v31  ;;  %v2946_v32 = vpop.f32.mrb[3].mxu0  ;;  %1815 = vrot.lane.b32.xlu0 %v563_v38, %s4123_s30  ;;  %v586_v55 = vrot.slane %v6063_v59, 1 }
 0x22f   :  { %v2947_v49 = vadd.f32 %v5930_v31, %v2946_v32  ;;  %v1990_v47 = vpop.permute.xlu1 %1989 }
 0x230   :  { %v2617_v61 = vsel %vm2596_vm10, %v2552_v18, %v1990_v47  ;;  %v1800_v57 = vpop.permute.xlu0 %1799  ;;  %v3258_v19 = vmax.f32 %v2952_v17, 0.0  ;;  %v477_v17 = vsel %vm392_vm1, %v474_v30, %v476_v24  ;;  %v80_v30 = vld [vmem:[%s7695_s0 + $0x1a8] sm:$0x3] }
 0x231   :  { %v3257_v9 = vmax.f32 %v2947_v49, 0.0  ;;  %1433 = vrot.lane.b32.xlu1 %v571_v35, %s4121_s20  ;;  %3849 = vmatprep.mubr.msk.f32.mxu0 %vm2673_vm11, %v2617_v61  ;;  %v596_v61 = vrot.slane %v6063_v59, 2 }
 0x232   :  { %1243 = vrot.lane.b32.xlu0 %v563_v38, %s4120_s18  ;;  %v3324_v21 = vsel %vm2206_vm4, %v3258_v19, 0.0  ;;  %v588_v19 = vrot.slane %v80_v30, 1 }
 0x233   :  { %v3322_v23 = vsel %vm2206_vm4, %v3257_v9, 0.0  ;;  %v1418_v26 = vpop.permute.xlu1 %1417  ;;  %v597_v25 = vsel %vm392_vm1, %v595_v52, %v596_v61  ;;  %v7906_v52 = vld [vmem:[#allocation18_spill] sm:$0xff] }
 0x234   :  { %v3323_v60 = vadd.f32 %v3322_v23, %v5970_v58  ;;  %v6043_v43 = vpop.permute.xlu0 %1227  ;;  %v2488_v58 = vsel %vm2466_vm8, %v2423_v53, %v1608_v41  ;;  %v585_v41 = vrot.slane %v78_v48, 1  ;;  %v2229_v23 = vsel %vm2206_vm4, %v2164_v12, %v5962_v13  ;;  %v4048_v12 = vld [vmem:[%s7695_s0 + $0x1d8] sm:$0x3] }
 0x235   :  { %861 = vrot.lane.b32.xlu1 %v475_v42, %s4118_s17  ;;  %v2553_v38 = vsel %vm2531_vm9, %v2488_v58, %v1800_v57  ;;  %v7905_v42 = vld [vmem:[#allocation19_spill] sm:$0xff]  ;;  %v2294_v14 = vsel %vm2271_vm5, %v2229_v23, %v5980_v20  ;;  %v589_v53 = vsel %vm231_vm0, %v586_v55, %v588_v19 }
 0x236   :  { %2007 = vrot.lane.b32.xlu0 %v573_v28, %s4124_s1  ;;  %v3325_v7 = vadd.f32 %v3324_v21, %v3323_v60  ;;  %v587_v18 = vsel %vm231_vm0, %v585_v41, %v586_v55  ;;  %v6104_v60 = vld [vmem:[%s7695_s0 + $0x1d0] sm:$0xff] }
 0x237   :  { %v6055_v35 = vpop.permute.xlu1 %845  ;;  %v479_v51 = vrot.slane %v6104_v60, 2 }
 0x238   :  { %v1992_v37 = vpop.permute.xlu0 %1991 }
 0x239   :  { %v2618_v44 = vsel %vm2596_vm10, %v2553_v38, %v1992_v37  ;;  %1625 = vrot.lane.b32.xlu1 %v78_v48, %s4122_s29  ;;  %v2359_v48 = vsel %vm2336_vm6, %v2294_v14, %v6002_v22  ;;  %v480_v20 = vsel %vm392_vm1, %v478_v2, %v479_v51  ;;  %v598_v22 = vrot.slane %v80_v30, 2 }
 0x23a   :  { %1435 = vrot.lane.b32.xlu0 %v573_v28, %s4121_s20  ;;  %3850 = vmatmul.mubr.msk.f32.gmra.mrb[20].mxu0 %vm2673_vm11, %v2618_v44  ;;  %v2424_v39 = vsel %vm2401_vm7, %v2359_v48, %v1418_v26 }
 0x23b   :  { %v1610_v5 = vpop.permute.xlu1 %1609  ;;  %v599_v19 = vsel %vm392_vm1, %v596_v61, %v598_v22 }
 0x23c   :  { %v1420_v32 = vpop.permute.xlu0 %1419  ;;  %v2489_v38 = vsel %vm2466_vm8, %v2424_v39, %v1610_v5  ;;  %v2165_v5 = vsel %vm2141_vm3, %v5601_v27, %v5005_v45  ;;  %v6179_v39 = vld [vmem:[%s7695_s0 + $0x1e8] sm:$0xff] }
 0x23d   :  { %1053 = vrot.lane.b32.xlu1 %v6075_v29, %s4119_s19 }
 0x23e   :  { %863 = vrot.lane.b32.xlu0 %v477_v17, %s4118_s17 }
 0x23f   :  { %v6081_v49 = vpop.permute.xlu1 %1037 }
 0x240   :  { %v6083_v47 = vpop.permute.xlu0 %847 }
 0x241   :  { %1817 = vrot.lane.b32.xlu1 %v587_v18, %s4123_s30 }
 0x242   :  { %1627 = vrot.lane.b32.xlu0 %v6063_v59, %s4122_s29 }
 0x243   :  { %v1802_v57 = vpop.permute.xlu1 %1801 }
 0x244   :  { %v1612_v9 = vpop.permute.xlu0 %1611  ;;  %v2554_v37 = vsel %vm2531_vm9, %v2489_v38, %v1802_v57 }
 0x245   :  { %v3827_v4 = vpop.f32.mrb[4].mxu0  ;;  %1245 = vrot.lane.b32.xlu1 %v7905_v42, %s4120_s18 }
 0x246   :  { %v2962_v28 = vadd.f32 %v3827_v4, %v5930_v31  ;;  %v2956_v36 = vpop.f32.mrb[5].mxu0  ;;  %1055 = vrot.lane.b32.xlu0 %v6104_v60, %s4119_s19  ;;  %v481_v4 = vrot.slane %v4048_v12, 2 }
 0x247   :  { %v2957_v13 = vadd.f32 %v5930_v31, %v2956_v36  ;;  %v6113_v21 = vpop.permute.xlu1 %1229 }
 0x248   :  { %v6118_v58 = vpop.permute.xlu0 %1039  ;;  %v3260_v24 = vmax.f32 %v2962_v28, 0.0  ;;  %v482_v23 = vsel %vm392_vm1, %v479_v51, %v481_v4 }
 0x249   :  { %v3259_v59 = vmax.f32 %v2957_v13, 0.0  ;;  %2009 = vrot.lane.b32.xlu1 %v597_v25, %s4124_s1  ;;  %v7907_v13 = vld [vmem:[#allocation21_spill] sm:$0xff] }
 0x24a   :  { %1819 = vrot.lane.b32.xlu0 %v589_v53, %s4123_s30  ;;  %v3328_v18 = vsel %vm2206_vm4, %v3260_v24, 0.0 }
 0x24b   :  { %v3326_v44 = vsel %vm2206_vm4, %v3259_v59, 0.0  ;;  %v1994_v41 = vpop.permute.xlu1 %1993  ;;  %v484_v59 = vrot.slane %v6179_v39, 2 }
 0x24c   :  { %v3327_v55 = vadd.f32 %v3326_v44, %v3325_v7  ;;  %v2619_v17 = vsel %vm2596_vm10, %v2554_v37, %v1994_v41  ;;  %v1804_v26 = vpop.permute.xlu0 %1803  ;;  %v2230_v7 = vsel %vm2206_vm4, %v2165_v5, %v5982_v40  ;;  %v2166_v44 = vsel %vm2141_vm3, %v5652_v34, %v5025_v54 }
 0x24d   :  { %1437 = vrot.lane.b32.xlu1 %v480_v20, %s4121_s20  ;;  %3852 = vmatprep.mubr.msk.f32.mxu0 %vm2673_vm11, %v2619_v17  ;;  %v2295_v42 = vsel %vm2271_vm5, %v2230_v7, %v6007_v8 }
 0x24e   :  { %1247 = vrot.lane.b32.xlu0 %v7906_v52, %s4120_s18  ;;  %v3329_v57 = vadd.f32 %v3328_v18, %v3327_v55  ;;  %v2360_v45 = vsel %vm2336_vm6, %v2295_v42, %v6043_v43  ;;  %v6160_v43 = vld [vmem:[%s7695_s0 + $0x1e0] sm:$0xff]  ;;  %v2231_v55 = vsel %vm2206_vm4, %v2166_v44, %v6055_v35 }
 0x24f   :  { %v1422_v30 = vpop.permute.xlu1 %1421  ;;  %v2425_v27 = vsel %vm2401_vm7, %v2360_v45, %v1420_v32  ;;  %v483_v24 = vrot.slane %v6160_v43, 2 }
 0x250   :  { %v6144_v25 = vpop.permute.xlu0 %1231  ;;  %v2490_v40 = vsel %vm2466_vm8, %v2425_v27, %v1612_v9  ;;  %v2167_v27 = vsel %vm2141_vm3, %v5680_v1, %v5020_v16 }
 0x251   :  { %865 = vrot.lane.b32.xlu1 %v480_v20, %s4118_s17  ;;  %v2555_v28 = vsel %vm2531_vm9, %v2490_v40, %v1804_v26  ;;  %v485_v17 = vsel %vm392_vm1, %v483_v24, %v484_v59  ;;  %v2296_v26 = vsel %vm2271_vm5, %v2231_v55, %v6081_v49  ;;  %v7908_v49 = vld [vmem:[#allocation20_spill] sm:$0xff]  ;;  %v2232_v40 = vsel %vm2206_vm4, %v2167_v27, %v6083_v47 }
 0x252   :  { %2011 = vrot.lane.b32.xlu0 %v599_v19, %s4124_s1  ;;  %v2361_v54 = vsel %vm2336_vm6, %v2296_v26, %v6113_v21  ;;  %v4051_v21 = vld [vmem:[%s7695_s0 + $0x1f0] sm:$0x3]  ;;  %v6263_v55 = vld [vmem:[%s7695_s0 + $0x200] sm:$0xff] }
 0x253   :  { %v6152_v61 = vpop.permute.xlu1 %849  ;;  %v2426_v35 = vsel %vm2401_vm7, %v2361_v54, %v1422_v30  ;;  %v489_v26 = vrot.slane %v6263_v55, 2 }
 0x254   :  { %v1996_v8 = vpop.permute.xlu0 %1995 }
 0x255   :  { %v2620_v36 = vsel %vm2596_vm10, %v2555_v28, %v1996_v8  ;;  %1629 = vrot.lane.b32.xlu1 %v6160_v43, %s4122_s29  ;;  %v2297_v8 = vsel %vm2271_vm5, %v2232_v40, %v6118_v58 }
 0x256   :  { %1439 = vrot.lane.b32.xlu0 %v482_v23, %s4121_s20  ;;  %3853 = vmatmul.mubr.msk.f32.gmra.mrb[22].mxu0 %vm2673_vm11, %v2620_v36 }
 0x257   :  { %v1614_v32 = vpop.permute.xlu1 %1613 }
 0x258   :  { %v1424_v9 = vpop.permute.xlu0 %1423  ;;  %v2491_v19 = vsel %vm2466_vm8, %v2426_v35, %v1614_v32  ;;  %v2362_v32 = vsel %vm2336_vm6, %v2297_v8, %v6144_v25 }
 0x259   :  { %1057 = vrot.lane.b32.xlu1 %v6160_v43, %s4119_s19  ;;  %v2427_v16 = vsel %vm2401_vm7, %v2362_v32, %v1424_v9 }
 0x25a   :  { %867 = vrot.lane.b32.xlu0 %v482_v23, %s4118_s17 }
 0x25b   :  { %v6169_v2 = vpop.permute.xlu1 %1041 }
 0x25c   :  { %v6171_v51 = vpop.permute.xlu0 %851 }
 0x25d   :  { %v3830_v14 = vpop.f32.mrb[6].mxu0  ;;  %1821 = vrot.lane.b32.xlu1 %v7907_v13, %s4123_s30 }
 0x25e   :  { %v2972_v53 = vadd.f32 %v3830_v14, %v5930_v31  ;;  %v2966_v48 = vpop.f32.mrb[7].mxu0  ;;  %1631 = vrot.lane.b32.xlu0 %v6179_v39, %s4122_s29 }
 0x25f   :  { %v2967_v38 = vadd.f32 %v5930_v31, %v2966_v48  ;;  %v1806_v20 = vpop.permute.xlu1 %1805 }
 0x260   :  { %v1616_v37 = vpop.permute.xlu0 %1615  ;;  %v3262_v41 = vmax.f32 %v2972_v53, 0.0  ;;  %v2556_v4 = vsel %vm2531_vm9, %v2491_v19, %v1806_v20  ;;  %v6243_v53 = vld [vmem:[%s7695_s0 + $0x1f8] sm:$0xff] }
 0x261   :  { %v3261_v22 = vmax.f32 %v2967_v38, 0.0  ;;  %1249 = vrot.lane.b32.xlu1 %v7907_v13, %s4120_s18  ;;  %v2492_v1 = vsel %vm2466_vm8, %v2427_v16, %v1616_v37 }
 0x262   :  { %1059 = vrot.lane.b32.xlu0 %v6179_v39, %s4119_s19  ;;  %v3332_v7 = vsel %vm2206_vm4, %v3262_v41, 0.0 }
 0x263   :  { %v3330_v18 = vsel %vm2206_vm4, %v3261_v22, 0.0  ;;  %v6199_v5 = vpop.permute.xlu1 %1233  ;;  %v7909_v22 = vld [vmem:[#allocation23_spill] sm:$0xff] }
 0x264   :  { %v3331_v34 = vadd.f32 %v3330_v18, %v3329_v57  ;;  %v6203_v52 = vpop.permute.xlu0 %1043  ;;  %v486_v57 = vrot.slane %v4051_v21, 2 }
 0x265   :  { %2013 = vrot.lane.b32.xlu1 %v485_v17, %s4124_s1 }
 0x266   :  { %1823 = vrot.lane.b32.xlu0 %v7908_v49, %s4123_s30  ;;  %v3333_v12 = vadd.f32 %v3332_v7, %v3331_v34  ;;  %v487_v28 = vsel %vm392_vm1, %v484_v59, %v486_v57  ;;  %v2168_v7 = vsel %vm2141_vm3, %v5728_v33, %v5033_v56 }
 0x267   :  { %v1998_v42 = vpop.permute.xlu1 %1997 }
 0x268   :  { %v2621_v30 = vsel %vm2596_vm10, %v2556_v4, %v1998_v42  ;;  %v1808_v45 = vpop.permute.xlu0 %1807 }
 0x269   :  { %1441 = vrot.lane.b32.xlu1 %v485_v17, %s4121_s20  ;;  %3855 = vmatprep.mubr.msk.f32.mxu0 %vm2673_vm11, %v2621_v30  ;;  %v2557_v14 = vsel %vm2531_vm9, %v2492_v1, %v1808_v45  ;;  %v7910_v30 = vld [vmem:[#allocation22_spill] sm:$0xff] }
 0x26a   :  { %1251 = vrot.lane.b32.xlu0 %v7908_v49, %s4120_s18  ;;  %v2233_v49 = vsel %vm2206_vm4, %v2168_v7, %v6152_v61 }
 0x26b   :  { %v1426_v23 = vpop.permute.xlu1 %1425 }
 0x26c   :  { %v6228_v36 = vpop.permute.xlu0 %1235 }
 0x26d   :  { %869 = vrot.lane.b32.xlu1 %v485_v17, %s4118_s17  ;;  %v488_v17 = vrot.slane %v6243_v53, 2 }
 0x26e   :  { %2015 = vrot.lane.b32.xlu0 %v487_v28, %s4124_s1 }
 0x26f   :  { %v6236_v47 = vpop.permute.xlu1 %853  ;;  %v490_v4 = vsel %vm392_vm1, %v488_v17, %v489_v26 }
 0x270   :  { %v2000_v13 = vpop.permute.xlu0 %1999 }
 0x271   :  { %v2622_v58 = vsel %vm2596_vm10, %v2557_v14, %v2000_v13  ;;  %1633 = vrot.lane.b32.xlu1 %v6243_v53, %s4122_s29 }
 0x272   :  { %1443 = vrot.lane.b32.xlu0 %v487_v28, %s4121_s20  ;;  %3856 = vmatmul.mubr.msk.f32.gmra.mrb[24].mxu0 %vm2673_vm11, %v2622_v58 }
 0x273   :  { %v1618_v25 = vpop.permute.xlu1 %1617 }
 0x274   :  { %v1428_v9 = vpop.permute.xlu0 %1427 }
 0x275   :  { %v3833_v48 = vpop.f32.mrb[8].mxu0  ;;  %1061 = vrot.lane.b32.xlu1 %v6243_v53, %s4119_s19 }
 0x276   :  { %v2982_v24 = vadd.f32 %v3833_v48, %v5930_v31  ;;  %v2976_v59 = vpop.f32.mrb[9].mxu0  ;;  %871 = vrot.lane.b32.xlu0 %v487_v28, %s4118_s17 }
 0x277   :  { %v2977_v38 = vadd.f32 %v5930_v31, %v2976_v59  ;;  %v6254_v20 = vpop.permute.xlu1 %1045 }
 0x278   :  { %v6256_v37 = vpop.permute.xlu0 %855  ;;  %v3264_v44 = vmax.f32 %v2982_v24, 0.0 }
 0x279   :  { %v3263_v41 = vmax.f32 %v2977_v38, 0.0  ;;  %1825 = vrot.lane.b32.xlu1 %v7909_v22, %s4123_s30 }
 0x27a   :  { %1635 = vrot.lane.b32.xlu0 %v6263_v55, %s4122_s29  ;;  %v3336_v19 = vsel %vm2206_vm4, %v3264_v44, 0.0 }
 0x27b   :  { %v3334_v18 = vsel %vm2206_vm4, %v3263_v41, 0.0  ;;  %v1810_v54 = vpop.permute.xlu1 %1809 }
 0x27c   :  { %v3335_v34 = vadd.f32 %v3334_v18, %v3333_v12  ;;  %v1620_v35 = vpop.permute.xlu0 %1619  ;;  %v2298_v12 = vsel %vm2271_vm5, %v2233_v49, %v6169_v2  ;;  %v4054_v2 = vld [vmem:[%s7695_s0 + $0x208] sm:$0x3]  ;;  %v6348_v49 = vld [vmem:[%s7695_s0 + $0x218] sm:$0xff] }
 0x27d   :  { %1253 = vrot.lane.b32.xlu1 %v7909_v22, %s4120_s18  ;;  %v2363_v56 = vsel %vm2336_vm6, %v2298_v12, %v6199_v5  ;;  %v491_v40 = vrot.slane %v4054_v2, 2  ;;  %v494_v12 = vrot.slane %v6348_v49, 2 }
 0x27e   :  { %1063 = vrot.lane.b32.xlu0 %v6263_v55, %s4119_s19  ;;  %v3337_v42 = vadd.f32 %v3336_v19, %v3335_v34  ;;  %v2428_v57 = vsel %vm2401_vm7, %v2363_v56, %v1426_v23  ;;  %v7911_v23 = vld [vmem:[#allocation62_spill] sm:$0xff]  ;;  %v7912_v19 = vld [vmem:[#allocation25_spill] sm:$0xff] }
 0x27f   :  { %v6283_v21 = vpop.permute.xlu1 %1237  ;;  %v2493_v61 = vsel %vm2466_vm8, %v2428_v57, %v1618_v25  ;;  %v2169_v8 = vsel %vm2141_vm3, %v5756_v46, %v7911_v23  ;;  %v492_v1 = vsel %vm392_vm1, %v489_v26, %v491_v40 }
 0x280   :  { %v6287_v33 = vpop.permute.xlu0 %1047  ;;  %v2558_v45 = vsel %vm2531_vm9, %v2493_v61, %v1810_v54  ;;  %v2234_v32 = vsel %vm2206_vm4, %v2169_v8, %v6171_v51  ;;  %v2170_v61 = vsel %vm2141_vm3, %v5806_v6, %v5041_v63 }
 0x281   :  { %2017 = vrot.lane.b32.xlu1 %v490_v4, %s4124_s1  ;;  %v2299_v14 = vsel %vm2271_vm5, %v2234_v32, %v6203_v52 }
 0x282   :  { %1827 = vrot.lane.b32.xlu0 %v7910_v30, %s4123_s30  ;;  %v2364_v58 = vsel %vm2336_vm6, %v2299_v14, %v6228_v36  ;;  %v6326_v36 = vld [vmem:[%s7695_s0 + $0x210] sm:$0xff] }
 0x283   :  { %v2002_v27 = vpop.permute.xlu1 %2001  ;;  %v2429_v46 = vsel %vm2401_vm7, %v2364_v58, %v1428_v9 }
 0x284   :  { %v2623_v5 = vsel %vm2596_vm10, %v2558_v45, %v2002_v27  ;;  %v1812_v28 = vpop.permute.xlu0 %1811  ;;  %v2494_v25 = vsel %vm2466_vm8, %v2429_v46, %v1620_v35 }
 0x285   :  { %1445 = vrot.lane.b32.xlu1 %v490_v4, %s4121_s20  ;;  %3858 = vmatprep.mubr.msk.f32.mxu0 %vm2673_vm11, %v2623_v5  ;;  %v2559_v48 = vsel %vm2531_vm9, %v2494_v25, %v1812_v28  ;;  %v7913_v5 = vld [vmem:[#allocation24_spill] sm:$0xff] }
 0x286   :  { %1255 = vrot.lane.b32.xlu0 %v7910_v30, %s4120_s18  ;;  %v2235_v30 = vsel %vm2206_vm4, %v2170_v61, %v6236_v47 }
 0x287   :  { %v1430_v16 = vpop.permute.xlu1 %1429  ;;  %v2300_v27 = vsel %vm2271_vm5, %v2235_v30, %v6254_v20  ;;  %v4057_v20 = vld [vmem:[%s7695_s0 + $0x220] sm:$0x3] }
 0x288   :  { %v6311_v13 = vpop.permute.xlu0 %1239  ;;  %v2365_v40 = vsel %vm2336_vm6, %v2300_v27, %v6283_v21  ;;  %v496_v8 = vrot.slane %v4057_v20, 2  ;;  %v7915_v27 = vld [vmem:[#allocation64_spill] sm:$0xff] }
 0x289   :  { %873 = vrot.lane.b32.xlu1 %v490_v4, %s4118_s17  ;;  %v493_v4 = vrot.slane %v6326_v36, 2  ;;  %v2430_v6 = vsel %vm2401_vm7, %v2365_v40, %v1430_v16  ;;  %v2171_v16 = vsel %vm2141_vm3, %v5826_v10, %v5039_v62  ;;  %v2172_v40 = vsel %vm2141_vm3, %v5880_v0, %v7915_v27  ;;  %v6514_v27 = vld [vmem:[%s7695_s0 + $0x248] sm:$0xff] }
 0x28a   :  { %2019 = vrot.lane.b32.xlu0 %v492_v1, %s4124_s1  ;;  %v497_v58 = vsel %vm392_vm1, %v494_v12, %v496_v8  ;;  %v7916_v8 = vld [vmem:[#allocation26_spill] sm:$0xff] }
 0x28b   :  { %v6319_v51 = vpop.permute.xlu1 %857  ;;  %v495_v45 = vsel %vm392_vm1, %v493_v4, %v494_v12 }
 0x28c   :  { %v2004_v24 = vpop.permute.xlu0 %2003 }
 0x28d   :  { %v2624_v52 = vsel %vm2596_vm10, %v2559_v48, %v2004_v24  ;;  %v3836_v59 = vpop.f32.mrb[10].mxu0  ;;  %1637 = vrot.lane.b32.xlu1 %v6326_v36, %s4122_s29 }
 0x28e   :  { %v2992_v9 = vadd.f32 %v3836_v59, %v5930_v31  ;;  %v2986_v38 = vpop.f32.mrb[11].mxu0  ;;  %1447 = vrot.lane.b32.xlu0 %v492_v1, %s4121_s20  ;;  %3859 = vmatmul.mubr.msk.f32.gmra.mrb[26].mxu0 %vm2673_vm11, %v2624_v52 }
 0x28f   :  { %v2987_v44 = vadd.f32 %v5930_v31, %v2986_v38  ;;  %v1622_v41 = vpop.permute.xlu1 %1621 }
 0x290   :  { %v1432_v22 = vpop.permute.xlu0 %1431  ;;  %v3266_v17 = vmax.f32 %v2992_v9, 0.0  ;;  %v2495_v47 = vsel %vm2466_vm8, %v2430_v6, %v1622_v41  ;;  %v2237_v6 = vsel %vm2206_vm4, %v2172_v40, %v6319_v51 }
 0x291   :  { %v3265_v26 = vmax.f32 %v2987_v44, 0.0  ;;  %1065 = vrot.lane.b32.xlu1 %v6326_v36, %s4119_s19 }
 0x292   :  { %875 = vrot.lane.b32.xlu0 %v492_v1, %s4118_s17  ;;  %v3340_v7 = vsel %vm2206_vm4, %v3266_v17, 0.0  ;;  %v2236_v1 = vsel %vm2206_vm4, %v2171_v16, %v6256_v37 }
 0x293   :  { %v3338_v18 = vsel %vm2206_vm4, %v3265_v26, 0.0  ;;  %v6338_v54 = vpop.permute.xlu1 %1049  ;;  %v2301_v46 = vsel %vm2271_vm5, %v2236_v1, %v6287_v33 }
 0x294   :  { %v3339_v34 = vadd.f32 %v3338_v18, %v3337_v42  ;;  %v6340_v35 = vpop.permute.xlu0 %859  ;;  %v2366_v48 = vsel %vm2336_vm6, %v2301_v46, %v6311_v13 }
 0x295   :  { %1829 = vrot.lane.b32.xlu1 %v7912_v19, %s4123_s30  ;;  %v2431_v62 = vsel %vm2401_vm7, %v2366_v48, %v1432_v22  ;;  %v6411_v22 = vld [vmem:[%s7695_s0 + $0x228] sm:$0xff] }
 0x296   :  { %1639 = vrot.lane.b32.xlu0 %v6348_v49, %s4122_s29  ;;  %v3341_v42 = vadd.f32 %v3340_v7, %v3339_v34 }
 0x297   :  { %v1814_v56 = vpop.permute.xlu1 %1813 }
 0x298   :  { %v1624_v57 = vpop.permute.xlu0 %1623  ;;  %v2560_v28 = vsel %vm2531_vm9, %v2495_v47, %v1814_v56  ;;  %v7914_v56 = vld [vmem:[#allocation27_spill] sm:$0xff] }
 0x299   :  { %1257 = vrot.lane.b32.xlu1 %v7912_v19, %s4120_s18  ;;  %v2496_v37 = vsel %vm2466_vm8, %v2431_v62, %v1624_v57  ;;  %v498_v57 = vrot.slane %v6411_v22, 2 }
 0x29a   :  { %1067 = vrot.lane.b32.xlu0 %v6348_v49, %s4119_s19 }
 0x29b   :  { %v6366_v2 = vpop.permute.xlu1 %1241 }
 0x29c   :  { %v6370_v63 = vpop.permute.xlu0 %1051 }
 0x29d   :  { %2021 = vrot.lane.b32.xlu1 %v495_v45, %s4124_s1 }
 0x29e   :  { %1831 = vrot.lane.b32.xlu0 %v7913_v5, %s4123_s30 }
 0x29f   :  { %v2006_v23 = vpop.permute.xlu1 %2005 }
 0x2a0   :  { %v2625_v21 = vsel %vm2596_vm10, %v2560_v28, %v2006_v23  ;;  %v1816_v32 = vpop.permute.xlu0 %1815 }
 0x2a1   :  { %1449 = vrot.lane.b32.xlu1 %v495_v45, %s4121_s20  ;;  %3861 = vmatprep.mubr.msk.f32.mxu0 %vm2673_vm11, %v2625_v21  ;;  %v2561_v9 = vsel %vm2531_vm9, %v2496_v37, %v1816_v32 }
 0x2a2   :  { %1259 = vrot.lane.b32.xlu0 %v7913_v5, %s4120_s18  ;;  %v2302_v5 = vsel %vm2271_vm5, %v2237_v6, %v6338_v54  ;;  %v4060_v54 = vld [vmem:[%s7695_s0 + $0x238] sm:$0x3]  ;;  %v504_v6 = vrot.slane %v6514_v27, 2 }
 0x2a3   :  { %v1434_v14 = vpop.permute.xlu1 %1433  ;;  %v2367_v23 = vsel %vm2336_vm6, %v2302_v5, %v6366_v2  ;;  %v501_v16 = vrot.slane %v4060_v54, 2 }
 0x2a4   :  { %v6394_v25 = vpop.permute.xlu0 %1243  ;;  %v2432_v20 = vsel %vm2401_vm7, %v2367_v23, %v1434_v14  ;;  %v7917_v14 = vld [vmem:[#allocation63_spill] sm:$0xff]  ;;  %v2174_v23 = vsel %vm2141_vm3, %v6017_v15, %v5063_v3 }
 0x2a5   :  { %v3839_v24 = vpop.f32.mrb[12].mxu0  ;;  %877 = vrot.lane.b32.xlu1 %v495_v45, %s4118_s17  ;;  %v2173_v46 = vsel %vm2141_vm3, %v5898_v11, %v7917_v14  ;;  %v4063_v14 = vld [vmem:[%s7695_s0 + $0x250] sm:$0x3] }
 0x2a6   :  { %v3002_v10 = vadd.f32 %v3839_v24, %v5930_v31  ;;  %v2996_v52 = vpop.f32.mrb[13].mxu0  ;;  %2023 = vrot.lane.b32.xlu0 %v497_v58, %s4124_s1  ;;  %v2238_v62 = vsel %vm2206_vm4, %v2173_v46, %v6340_v35  ;;  %v506_v46 = vrot.slane %v4063_v14, 2 }
 0x2a7   :  { %v2997_v59 = vadd.f32 %v5930_v31, %v2996_v52  ;;  %v6404_v33 = vpop.permute.xlu1 %861 }
 0x2a8   :  { %v2008_v38 = vpop.permute.xlu0 %2007  ;;  %v3268_v13 = vmax.f32 %v3002_v10, 0.0 }
 0x2a9   :  { %v3267_v44 = vmax.f32 %v2997_v59, 0.0  ;;  %v2626_v41 = vsel %vm2596_vm10, %v2561_v9, %v2008_v38  ;;  %1641 = vrot.lane.b32.xlu1 %v6411_v22, %s4122_s29  ;;  %v2303_v59 = vsel %vm2271_vm5, %v2238_v62, %v6370_v63 }
 0x2aa   :  { %1451 = vrot.lane.b32.xlu0 %v497_v58, %s4121_s20  ;;  %3862 = vmatmul.mubr.msk.f32.gmra.mrb[28].mxu0 %vm2673_vm11, %v2626_v41  ;;  %v3344_v7 = vsel %vm2206_vm4, %v3268_v13, 0.0  ;;  %v2368_v11 = vsel %vm2336_vm6, %v2303_v59, %v6394_v25 }
 0x2ab   :  { %v3342_v17 = vsel %vm2206_vm4, %v3267_v44, 0.0  ;;  %v1626_v26 = vpop.permute.xlu1 %1625 }
 0x2ac   :  { %v3343_v18 = vadd.f32 %v3342_v17, %v3341_v42  ;;  %v1436_v34 = vpop.permute.xlu0 %1435  ;;  %v6431_v42 = vld [vmem:[%s7695_s0 + $0x230] sm:$0xff]  ;;  %v2497_v51 = vsel %vm2466_vm8, %v2432_v20, %v1626_v26  ;;  %v2239_v20 = vsel %vm2206_vm4, %v2174_v23, %v6404_v33 }
 0x2ad   :  { %1069 = vrot.lane.b32.xlu1 %v6411_v22, %s4119_s19  ;;  %v499_v61 = vrot.slane %v6431_v42, 2  ;;  %v2433_v44 = vsel %vm2401_vm7, %v2368_v11, %v1436_v34  ;;  %v6496_v34 = vld [vmem:[%s7695_s0 + $0x240] sm:$0xff] }
 0x2ae   :  { %879 = vrot.lane.b32.xlu0 %v497_v58, %s4118_s17  ;;  %v3345_v19 = vadd.f32 %v3344_v7, %v3343_v18  ;;  %v503_v40 = vrot.slane %v6496_v34, 2 }
 0x2af   :  { %v6422_v4 = vpop.permute.xlu1 %1053  ;;  %v500_v47 = vsel %vm392_vm1, %v498_v57, %v499_v61  ;;  %v502_v37 = vsel %vm392_vm1, %v499_v61, %v501_v16 }
 0x2b0   :  { %v6424_v12 = vpop.permute.xlu0 %863 }
 0x2b1   :  { %1833 = vrot.lane.b32.xlu1 %v7914_v56, %s4123_s30 }
 0x2b2   :  { %1643 = vrot.lane.b32.xlu0 %v6431_v42, %s4122_s29 }
 0x2b3   :  { %v1818_v30 = vpop.permute.xlu1 %1817 }
 0x2b4   :  { %v1628_v45 = vpop.permute.xlu0 %1627  ;;  %v2562_v21 = vsel %vm2531_vm9, %v2497_v51, %v1818_v30  ;;  %v505_v51 = vsel %vm392_vm1, %v503_v40, %v504_v6  ;;  %v7921_v40 = vld [vmem:[#allocation31_spill] sm:$0xff] }
 0x2b5   :  { %1261 = vrot.lane.b32.xlu1 %v7914_v56, %s4120_s18  ;;  %v2498_v35 = vsel %vm2466_vm8, %v2433_v44, %v1628_v45  ;;  %v7918_v45 = vld [vmem:[#allocation29_spill] sm:$0xff] }
 0x2b6   :  { %1071 = vrot.lane.b32.xlu0 %v6431_v42, %s4119_s19 }
 0x2b7   :  { %v6449_v28 = vpop.permute.xlu1 %1245 }
 0x2b8   :  { %v6453_v0 = vpop.permute.xlu0 %1055 }
 0x2b9   :  { %2025 = vrot.lane.b32.xlu1 %v500_v47, %s4124_s1 }
 0x2ba   :  { %1835 = vrot.lane.b32.xlu0 %v7916_v8, %s4123_s30 }
 0x2bb   :  { %v2010_v32 = vpop.permute.xlu1 %2009 }
 0x2bc   :  { %v2627_v2 = vsel %vm2596_vm10, %v2562_v21, %v2010_v32  ;;  %v1820_v1 = vpop.permute.xlu0 %1819 }
 0x2bd   :  { %v3842_v58 = vpop.f32.mrb[14].mxu0  ;;  %1453 = vrot.lane.b32.xlu1 %v500_v47, %s4121_s20  ;;  %3864 = vmatprep.mubr.msk.f32.mxu0 %vm2673_vm11, %v2627_v2  ;;  %v2563_v63 = vsel %vm2531_vm9, %v2498_v35, %v1820_v1  ;;  %v7919_v1 = vld [vmem:[#allocation28_spill] sm:$0xff] }
 0x2be   :  { %v3012_v48 = vadd.f32 %v3842_v58, %v5930_v31  ;;  %v3006_v24 = vpop.f32.mrb[15].mxu0  ;;  %1263 = vrot.lane.b32.xlu0 %v7916_v8, %s4120_s18  ;;  %v2304_v8 = vsel %vm2271_vm5, %v2239_v20, %v6422_v4 }
 0x2bf   :  { %v3007_v10 = vadd.f32 %v5930_v31, %v3006_v24  ;;  %v1438_v52 = vpop.permute.xlu1 %1437  ;;  %v2369_v32 = vsel %vm2336_vm6, %v2304_v8, %v6449_v28 }
 0x2c0   :  { %v6479_v9 = vpop.permute.xlu0 %1247  ;;  %v3270_v38 = vmax.f32 %v3012_v48, 0.0  ;;  %v2434_v15 = vsel %vm2401_vm7, %v2369_v32, %v1438_v52  ;;  %v7920_v52 = vld [vmem:[#allocation65_spill] sm:$0xff] }
 0x2c1   :  { %v3269_v13 = vmax.f32 %v3007_v10, 0.0  ;;  %881 = vrot.lane.b32.xlu1 %v500_v47, %s4118_s17 }
 0x2c2   :  { %2027 = vrot.lane.b32.xlu0 %v502_v37, %s4124_s1  ;;  %v3348_v25 = vsel %vm2206_vm4, %v3270_v38, 0.0  ;;  %v507_v38 = vsel %vm392_vm1, %v504_v6, %v506_v46  ;;  %v6597_v6 = vld [vmem:[%s7695_s0 + $0x260] sm:$0xff] }
 0x2c3   :  { %v3346_v41 = vsel %vm2206_vm4, %v3269_v13, 0.0  ;;  %v6488_v17 = vpop.permute.xlu1 %865 }
 0x2c4   :  { %v3347_v26 = vadd.f32 %v3346_v41, %v3345_v19  ;;  %v2012_v18 = vpop.permute.xlu0 %2011 }
 0x2c5   :  { %v2628_v7 = vsel %vm2596_vm10, %v2563_v63, %v2012_v18  ;;  %1645 = vrot.lane.b32.xlu1 %v6496_v34, %s4122_s29 }
 0x2c6   :  { %1455 = vrot.lane.b32.xlu0 %v502_v37, %s4121_s20  ;;  %3865 = vmatmul.mubr.msk.f32.gmra.mrb[30].mxu0 %vm2673_vm11, %v2628_v7  ;;  %v3349_v56 = vadd.f32 %v3348_v25, %v3347_v26 }
 0x2c7   :  { %v1630_v57 = vpop.permute.xlu1 %1629 }
 0x2c8   :  { %v1440_v19 = vpop.permute.xlu0 %1439  ;;  %v2499_v33 = vsel %vm2466_vm8, %v2434_v15, %v1630_v57 }
 0x2c9   :  { %1073 = vrot.lane.b32.xlu1 %v6496_v34, %s4119_s19 }
 0x2ca   :  { %883 = vrot.lane.b32.xlu0 %v502_v37, %s4118_s17  ;;  %v2175_v37 = vsel %vm2141_vm3, %v6023_v50, %v7920_v52 }
 0x2cb   :  { %v6505_v61 = vpop.permute.xlu1 %1057 }
 0x2cc   :  { %v6507_v30 = vpop.permute.xlu0 %867 }
 0x2cd   :  { %1837 = vrot.lane.b32.xlu1 %v7918_v45, %s4123_s30 }
 0x2ce   :  { %1647 = vrot.lane.b32.xlu0 %v6514_v27, %s4122_s29 }
 0x2cf   :  { %v1822_v47 = vpop.permute.xlu1 %1821 }
 0x2d0   :  { %v1632_v5 = vpop.permute.xlu0 %1631  ;;  %v2564_v4 = vsel %vm2531_vm9, %v2499_v33, %v1822_v47 }
 0x2d1   :  { %1265 = vrot.lane.b32.xlu1 %v7918_v45, %s4120_s18 }
 0x2d2   :  { %1075 = vrot.lane.b32.xlu0 %v6514_v27, %s4119_s19 }
 0x2d3   :  { %v6532_v21 = vpop.permute.xlu1 %1249 }
 0x2d4   :  { %v6536_v3 = vpop.permute.xlu0 %1059 }
 0x2d5   :  { %v3845_v54 = vpop.f32.mrb[16].mxu0  ;;  %2029 = vrot.lane.b32.xlu1 %v505_v51, %s4124_s1 }
 0x2d6   :  { %v3022_v16 = vadd.f32 %v3845_v54, %v5930_v31  ;;  %v3016_v2 = vpop.f32.mrb[17].mxu0  ;;  %1839 = vrot.lane.b32.xlu0 %v7919_v1, %s4123_s30 }
 0x2d7   :  { %v3017_v58 = vadd.f32 %v5930_v31, %v3016_v2  ;;  %v2014_v28 = vpop.permute.xlu1 %2013  ;;  %v2240_v31 = vsel %vm2206_vm4, %v2175_v37, %v6424_v12 }
 0x2d8   :  { %v2629_v48 = vsel %vm2596_vm10, %v2564_v4, %v2014_v28  ;;  %v1824_v24 = vpop.permute.xlu0 %1823  ;;  %v3272_v62 = vmax.f32 %v3022_v16, 0.0  ;;  %v2305_v13 = vsel %vm2271_vm5, %v2240_v31, %v6453_v0  ;;  %v6627_v4 = vld [vmem:[%s7697_s2] ss:$0 sm:$0xff]  ;;  %v7923_v28 = vld [vmem:[#allocation30_spill] sm:$0xff] }
 0x2d9   :  { %v3271_v10 = vmax.f32 %v3017_v58, 0.0  ;;  %1457 = vrot.lane.b32.xlu1 %v505_v51, %s4121_s20  ;;  %3867 = vmatprep.mubr.msk.f32.mxu0 %vm2673_vm11, %v2629_v48  ;;  %v2370_v50 = vsel %vm2336_vm6, %v2305_v13, %v6479_v9  ;;  %v6579_v9 = vld [vmem:[%s7695_s0 + $0x258] sm:$0xff]  ;;  %v4067_v48 = vld [vmem:[%s7695_s0 + $0x268] sm:$0x3]  ;;  %v7924_v31 = vld [vmem:[#allocation66_spill] sm:$0xff] }
 0x2da   :  { %1267 = vrot.lane.b32.xlu0 %v7919_v1, %s4120_s18  ;;  %v3352_v41 = vsel %vm2206_vm4, %v3272_v62, 0.0  ;;  %v2435_v12 = vsel %vm2401_vm7, %v2370_v50, %v1440_v19  ;;  %v508_v47 = vrot.slane %v6579_v9, 2 }
 0x2db   :  { %v3350_v59 = vsel %vm2206_vm4, %v3271_v10, 0.0  ;;  %v1442_v11 = vpop.permute.xlu1 %1441  ;;  %v2500_v26 = vsel %vm2466_vm8, %v2435_v12, %v1632_v5  ;;  %v509_v5 = vrot.slane %v6597_v6, 2 }
 0x2dc   :  { %v3351_v44 = vadd.f32 %v3350_v59, %v3349_v56  ;;  %v6563_v35 = vpop.permute.xlu0 %1251  ;;  %v2565_v0 = vsel %vm2531_vm9, %v2500_v26, %v1824_v24  ;;  %v511_v24 = vrot.slane %v4067_v48, 2  ;;  %v2177_v59 = vsel %vm2141_vm3, %v6104_v60, %v7924_v31  ;;  %v7927_v48 = vld [vmem:[#allocation32_spill] sm:$0xff] }
 0x2dd   :  { %885 = vrot.lane.b32.xlu1 %v505_v51, %s4118_s17  ;;  %v7922_v51 = vld [vmem:[#allocation67_spill] sm:$0xff]  ;;  %v510_v15 = vsel %vm392_vm1, %v508_v47, %v509_v5 }
 0x2de   :  { %2031 = vrot.lane.b32.xlu0 %v507_v38, %s4124_s1  ;;  %v3353_v63 = vadd.f32 %v3352_v41, %v3351_v44  ;;  %v2176_v8 = vsel %vm2141_vm3, %v6075_v29, %v7922_v51  ;;  %v512_v44 = vsel %vm392_vm1, %v509_v5, %v511_v24 }
 0x2df   :  { %v6572_v18 = vpop.permute.xlu1 %869  ;;  %v2241_v32 = vsel %vm2206_vm4, %v2176_v8, %v6488_v17 }
 0x2e0   :  { %v2016_v25 = vpop.permute.xlu0 %2015  ;;  %v2306_v54 = vsel %vm2271_vm5, %v2241_v32, %v6505_v61 }
 0x2e1   :  { %v2630_v7 = vsel %vm2596_vm10, %v2565_v0, %v2016_v25  ;;  %1649 = vrot.lane.b32.xlu1 %v6579_v9, %s4122_s29  ;;  %v2371_v16 = vsel %vm2336_vm6, %v2306_v54, %v6532_v21  ;;  %v7926_v54 = vld [vmem:[#allocation69_spill] sm:$0xff] }
 0x2e2   :  { %1459 = vrot.lane.b32.xlu0 %v507_v38, %s4121_s20  ;;  %3868 = vmatmul.mubr.msk.f32.gmra.mrb[32].mxu0 %vm2673_vm11, %v2630_v7  ;;  %v2436_v2 = vsel %vm2401_vm7, %v2371_v16, %v1442_v11  ;;  %v2242_v11 = vsel %vm2206_vm4, %v2177_v59, %v6507_v30  ;;  %v2178_v16 = vsel %vm2141_vm3, %v6160_v43, %v7926_v54 }
 0x2e3   :  { %v1634_v56 = vpop.permute.xlu1 %1633  ;;  %v2307_v50 = vsel %vm2271_vm5, %v2242_v11, %v6536_v3  ;;  %v7928_v11 = vld [vmem:[#allocation68_spill] sm:$0xff] }
 0x2e4   :  { %v1444_v57 = vpop.permute.xlu0 %1443  ;;  %v2501_v17 = vsel %vm2466_vm8, %v2436_v2, %v1634_v56  ;;  %v2372_v60 = vsel %vm2336_vm6, %v2307_v50, %v6563_v35  ;;  %v6667_v35 = vld [vmem:[%s7695_s0 + $0x270] sm:$0xff]  ;;  %v2243_v2 = vsel %vm2206_vm4, %v2178_v16, %v6572_v18 }
 0x2e5   :  { %1077 = vrot.lane.b32.xlu1 %v6579_v9, %s4119_s19  ;;  %v2437_v30 = vsel %vm2401_vm7, %v2372_v60, %v1444_v57  ;;  %v513_v51 = vrot.slane %v6667_v35, 2 }
 0x2e6   :  { %887 = vrot.lane.b32.xlu0 %v507_v38, %s4118_s17 }
 0x2e7   :  { %v6588_v19 = vpop.permute.xlu1 %1061 }
 0x2e8   :  { %v6590_v45 = vpop.permute.xlu0 %871 }
 0x2e9   :  { %1841 = vrot.lane.b32.xlu1 %v7921_v40, %s4123_s30 }
 0x2ea   :  { %1651 = vrot.lane.b32.xlu0 %v6597_v6, %s4122_s29 }
 0x2eb   :  { %v1826_v23 = vpop.permute.xlu1 %1825 }
 0x2ec   :  { %v1636_v20 = vpop.permute.xlu0 %1635  ;;  %v2566_v21 = vsel %vm2531_vm9, %v2501_v17, %v1826_v23  ;;  %v7925_v23 = vld [vmem:[#allocation33_spill] sm:$0xff]  ;;  %v2308_v17 = vsel %vm2271_vm5, %v2243_v2, %v6588_v19 }
 0x2ed   :  { %1269 = vrot.lane.b32.xlu1 %v7921_v40, %s4120_s18  ;;  %v2502_v25 = vsel %vm2466_vm8, %v2437_v30, %v1636_v20  ;;  %v6685_v20 = vld [vmem:[%s7695_s0 + $0x278] sm:$0xff] }
 0x2ee   :  { %1079 = vrot.lane.b32.xlu0 %v6597_v6, %s4119_s19  ;;  %v514_v8 = vrot.slane %v6685_v20, 2 }
 0x2ef   :  { %v6615_v33 = vpop.permute.xlu1 %1253 }
 0x2f0   :  { %v6619_v29 = vpop.permute.xlu0 %1063 }
 0x2f1   :  { %v3848_v1 = vpop.f32.mrb[18].mxu0  ;;  %2033 = vrot.lane.b32.xlu1 %v510_v15, %s4124_s1 }
 0x2f2   :  { %v3032_v61 = vadd.f32 %v6627_v4, %v3848_v1  ;;  %v3026_v58 = vpop.f32.mrb[19].mxu0  ;;  %1843 = vrot.lane.b32.xlu0 %v7923_v28, %s4123_s30  ;;  %v515_v1 = vsel %vm392_vm1, %v513_v51, %v514_v8 }
 0x2f3   :  { %v3027_v14 = vadd.f32 %v6627_v4, %v3026_v58  ;;  %v2018_v46 = vpop.permute.xlu1 %2017  ;;  %v2373_v58 = vsel %vm2336_vm6, %v2308_v17, %v6615_v33  ;;  %v7930_v17 = vld [vmem:[#allocation71_spill] sm:$0xff] }
 0x2f4   :  { %v2631_v62 = vsel %vm2596_vm10, %v2566_v21, %v2018_v46  ;;  %v1828_v10 = vpop.permute.xlu0 %1827  ;;  %v3274_v52 = vmax.f32 %v3032_v61, 0.0 }
 0x2f5   :  { %v3273_v37 = vmax.f32 %v3027_v14, 0.0  ;;  %1461 = vrot.lane.b32.xlu1 %v510_v15, %s4121_s20  ;;  %3870 = vmatprep.mubr.msk.f32.mxu0 %vm2673_vm11, %v2631_v62  ;;  %v2567_v3 = vsel %vm2531_vm9, %v2502_v25, %v1828_v10  ;;  %v4070_v62 = vld [vmem:[%s7695_s0 + $0x280] sm:$0x3] }
 0x2f6   :  { %1271 = vrot.lane.b32.xlu0 %v7923_v28, %s4120_s18  ;;  %v3356_v26 = vsel %vm2206_vm4, %v3274_v52, 0.0  ;;  %v516_v10 = vrot.slane %v4070_v62, 2  ;;  %v7931_v62 = vld [vmem:[#allocation34_spill] sm:$0xff] }
 0x2f7   :  { %v3354_v38 = vsel %vm2206_vm4, %v3273_v37, 0.0  ;;  %v1446_v13 = vpop.permute.xlu1 %1445 }
 0x2f8   :  { %v3355_v41 = vadd.f32 %v3354_v38, %v3353_v63  ;;  %v6651_v12 = vpop.permute.xlu0 %1255  ;;  %v2438_v28 = vsel %vm2401_vm7, %v2373_v58, %v1446_v13  ;;  %v2179_v38 = vsel %vm2141_vm3, %v6179_v39, %v7928_v11  ;;  %v2180_v58 = vsel %vm2141_vm3, %v6243_v53, %v7930_v17 }
 0x2f9   :  { %889 = vrot.lane.b32.xlu1 %v510_v15, %s4118_s17  ;;  %v2244_v13 = vsel %vm2206_vm4, %v2179_v38, %v6590_v45 }
 0x2fa   :  { %2035 = vrot.lane.b32.xlu0 %v512_v44, %s4124_s1  ;;  %v3357_v0 = vadd.f32 %v3356_v26, %v3355_v41  ;;  %v517_v41 = vsel %vm392_vm1, %v514_v8, %v516_v10  ;;  %v2309_v60 = vsel %vm2271_vm5, %v2244_v13, %v6619_v29  ;;  %v7932_v13 = vld [vmem:[#allocation70_spill] sm:$0xff] }
 0x2fb   :  { %v6660_v7 = vpop.permute.xlu1 %873  ;;  %v2374_v39 = vsel %vm2336_vm6, %v2309_v60, %v6651_v12  ;;  %v6750_v12 = vld [vmem:[%s7695_s0 + $0x288] sm:$0xff] }
 0x2fc   :  { %v2020_v63 = vpop.permute.xlu0 %2019  ;;  %v518_v54 = vrot.slane %v6750_v12, 2 }
 0x2fd   :  { %v2632_v56 = vsel %vm2596_vm10, %v2567_v3, %v2020_v63  ;;  %1653 = vrot.lane.b32.xlu1 %v6667_v35, %s4122_s29 }
 0x2fe   :  { %1463 = vrot.lane.b32.xlu0 %v512_v44, %s4121_s20  ;;  %3871 = vmatmul.mubr.msk.f32.gmra.mrb[34].mxu0 %vm2673_vm11, %v2632_v56 }
 0x2ff   :  { %v1638_v57 = vpop.permute.xlu1 %1637 }
 0x300   :  { %v1448_v40 = vpop.permute.xlu0 %1447  ;;  %v2503_v18 = vsel %vm2466_vm8, %v2438_v28, %v1638_v57  ;;  %v2245_v28 = vsel %vm2206_vm4, %v2180_v58, %v6660_v7 }
 0x301   :  { %1081 = vrot.lane.b32.xlu1 %v6667_v35, %s4119_s19  ;;  %v2439_v45 = vsel %vm2401_vm7, %v2374_v39, %v1448_v40 }
 0x302   :  { %891 = vrot.lane.b32.xlu0 %v512_v44, %s4118_s17 }
 0x303   :  { %v6676_v47 = vpop.permute.xlu1 %1065 }
 0x304   :  { %v6678_v5 = vpop.permute.xlu0 %875 }
 0x305   :  { %1845 = vrot.lane.b32.xlu1 %v7925_v23, %s4123_s30 }
 0x306   :  { %1655 = vrot.lane.b32.xlu0 %v6685_v20, %s4122_s29 }
 0x307   :  { %v1830_v32 = vpop.permute.xlu1 %1829 }
 0x308   :  { %v1640_v15 = vpop.permute.xlu0 %1639  ;;  %v2568_v19 = vsel %vm2531_vm9, %v2503_v18, %v1830_v32  ;;  %v7929_v32 = vld [vmem:[#allocation35_spill] sm:$0xff]  ;;  %v2310_v18 = vsel %vm2271_vm5, %v2245_v28, %v6676_v47 }
 0x309   :  { %1273 = vrot.lane.b32.xlu1 %v7925_v23, %s4120_s18  ;;  %v2504_v63 = vsel %vm2466_vm8, %v2439_v45, %v1640_v15  ;;  %v6768_v15 = vld [vmem:[%s7695_s0 + $0x290] sm:$0xff] }
 0x30a   :  { %1083 = vrot.lane.b32.xlu0 %v6685_v20, %s4119_s19  ;;  %v519_v16 = vrot.slane %v6768_v15, 2 }
 0x30b   :  { %v6703_v61 = vpop.permute.xlu1 %1257 }
 0x30c   :  { %v6707_v43 = vpop.permute.xlu0 %1067 }
 0x30d   :  { %v3851_v21 = vpop.f32.mrb[20].mxu0  ;;  %2037 = vrot.lane.b32.xlu1 %v515_v1, %s4124_s1 }
 0x30e   :  { %v3042_v14 = vadd.f32 %v6627_v4, %v3851_v21  ;;  %v3036_v46 = vpop.f32.mrb[21].mxu0  ;;  %1847 = vrot.lane.b32.xlu0 %v7927_v48, %s4123_s30  ;;  %v520_v21 = vsel %vm392_vm1, %v518_v54, %v519_v16 }
 0x30f   :  { %v3037_v24 = vadd.f32 %v6627_v4, %v3036_v46  ;;  %v2022_v33 = vpop.permute.xlu1 %2021  ;;  %v2375_v46 = vsel %vm2336_vm6, %v2310_v18, %v6703_v61  ;;  %v7934_v18 = vld [vmem:[#allocation73_spill] sm:$0xff] }
 0x310   :  { %v2633_v52 = vsel %vm2596_vm10, %v2568_v19, %v2022_v33  ;;  %v1832_v37 = vpop.permute.xlu0 %1831  ;;  %v3276_v31 = vmax.f32 %v3042_v14, 0.0 }
 0x311   :  { %v3275_v59 = vmax.f32 %v3037_v24, 0.0  ;;  %1465 = vrot.lane.b32.xlu1 %v515_v1, %s4121_s20  ;;  %3873 = vmatprep.mubr.msk.f32.mxu0 %vm2673_vm11, %v2633_v52  ;;  %v2569_v29 = vsel %vm2531_vm9, %v2504_v63, %v1832_v37  ;;  %v4073_v52 = vld [vmem:[%s7695_s0 + $0x298] sm:$0x3] }
 0x312   :  { %1275 = vrot.lane.b32.xlu0 %v7927_v48, %s4120_s18  ;;  %v3360_v25 = vsel %vm2206_vm4, %v3276_v31, 0.0  ;;  %v521_v37 = vrot.slane %v4073_v52, 2  ;;  %v7935_v52 = vld [vmem:[#allocation36_spill] sm:$0xff] }
 0x313   :  { %v3358_v44 = vsel %vm2206_vm4, %v3275_v59, 0.0  ;;  %v1450_v50 = vpop.permute.xlu1 %1449 }
 0x314   :  { %v3359_v26 = vadd.f32 %v3358_v44, %v3357_v0  ;;  %v6734_v30 = vpop.permute.xlu0 %1259  ;;  %v2440_v48 = vsel %vm2401_vm7, %v2375_v46, %v1450_v50  ;;  %v2181_v44 = vsel %vm2141_vm3, %v6263_v55, %v7932_v13  ;;  %v2182_v46 = vsel %vm2141_vm3, %v6326_v36, %v7934_v18 }
 0x315   :  { %893 = vrot.lane.b32.xlu1 %v515_v1, %s4118_s17  ;;  %v2246_v50 = vsel %vm2206_vm4, %v2181_v44, %v6678_v5 }
 0x316   :  { %2039 = vrot.lane.b32.xlu0 %v517_v41, %s4124_s1  ;;  %v3361_v3 = vadd.f32 %v3360_v25, %v3359_v26  ;;  %v522_v26 = vsel %vm392_vm1, %v519_v16, %v521_v37  ;;  %v2311_v39 = vsel %vm2271_vm5, %v2246_v50, %v6707_v43  ;;  %v7936_v50 = vld [vmem:[#allocation72_spill] sm:$0xff] }
 0x317   :  { %v6743_v56 = vpop.permute.xlu1 %877  ;;  %v2376_v55 = vsel %vm2336_vm6, %v2311_v39, %v6734_v30  ;;  %v6833_v30 = vld [vmem:[%s7695_s0 + $0x2a0] sm:$0xff] }
 0x318   :  { %v2024_v0 = vpop.permute.xlu0 %2023  ;;  %v523_v17 = vrot.slane %v6833_v30, 2 }
 0x319   :  { %v2634_v57 = vsel %vm2596_vm10, %v2569_v29, %v2024_v0  ;;  %1657 = vrot.lane.b32.xlu1 %v6750_v12, %s4122_s29 }
 0x31a   :  { %1467 = vrot.lane.b32.xlu0 %v517_v41, %s4121_s20  ;;  %3874 = vmatmul.mubr.msk.f32.gmra.mrb[36].mxu0 %vm2673_vm11, %v2634_v57 }
 0x31b   :  { %v1642_v40 = vpop.permute.xlu1 %1641 }
 0x31c   :  { %v1452_v23 = vpop.permute.xlu0 %1451  ;;  %v2505_v7 = vsel %vm2466_vm8, %v2440_v48, %v1642_v40  ;;  %v2247_v48 = vsel %vm2206_vm4, %v2182_v46, %v6743_v56 }
 0x31d   :  { %1085 = vrot.lane.b32.xlu1 %v6750_v12, %s4119_s19  ;;  %v2441_v5 = vsel %vm2401_vm7, %v2376_v55, %v1452_v23 }
 0x31e   :  { %895 = vrot.lane.b32.xlu0 %v517_v41, %s4118_s17 }
 0x31f   :  { %v6759_v51 = vpop.permute.xlu1 %1069 }
 0x320   :  { %v6761_v8 = vpop.permute.xlu0 %879 }
 0x321   :  { %1849 = vrot.lane.b32.xlu1 %v7929_v32, %s4123_s30 }
 0x322   :  { %1659 = vrot.lane.b32.xlu0 %v6768_v15, %s4122_s29 }
 0x323   :  { %v1834_v2 = vpop.permute.xlu1 %1833 }
 0x324   :  { %v1644_v1 = vpop.permute.xlu0 %1643  ;;  %v2570_v47 = vsel %vm2531_vm9, %v2505_v7, %v1834_v2  ;;  %v7933_v2 = vld [vmem:[#allocation37_spill] sm:$0xff]  ;;  %v2312_v7 = vsel %vm2271_vm5, %v2247_v48, %v6759_v51 }
 0x325   :  { %1277 = vrot.lane.b32.xlu1 %v7929_v32, %s4120_s18  ;;  %v2506_v0 = vsel %vm2466_vm8, %v2441_v5, %v1644_v1  ;;  %v6851_v1 = vld [vmem:[%s7695_s0 + $0x2a8] sm:$0xff] }
 0x326   :  { %1087 = vrot.lane.b32.xlu0 %v6768_v15, %s4119_s19  ;;  %v524_v58 = vrot.slane %v6851_v1, 2 }
 0x327   :  { %v6786_v14 = vpop.permute.xlu1 %1261 }
 0x328   :  { %v6790_v53 = vpop.permute.xlu0 %1071 }
 0x329   :  { %v3854_v19 = vpop.f32.mrb[22].mxu0  ;;  %2041 = vrot.lane.b32.xlu1 %v520_v21, %s4124_s1 }
 0x32a   :  { %v3052_v24 = vadd.f32 %v6627_v4, %v3854_v19  ;;  %v3046_v33 = vpop.f32.mrb[23].mxu0  ;;  %1851 = vrot.lane.b32.xlu0 %v7931_v62, %s4123_s30  ;;  %v525_v19 = vsel %vm392_vm1, %v523_v17, %v524_v58 }
 0x32b   :  { %v3047_v10 = vadd.f32 %v6627_v4, %v3046_v33  ;;  %v2026_v61 = vpop.permute.xlu1 %2025  ;;  %v2377_v33 = vsel %vm2336_vm6, %v2312_v7, %v6786_v14  ;;  %v7938_v7 = vld [vmem:[#allocation75_spill] sm:$0xff] }
 0x32c   :  { %v2635_v31 = vsel %vm2596_vm10, %v2570_v47, %v2026_v61  ;;  %v1836_v59 = vpop.permute.xlu0 %1835  ;;  %v3278_v11 = vmax.f32 %v3052_v24, 0.0 }
 0x32d   :  { %v3277_v38 = vmax.f32 %v3047_v10, 0.0  ;;  %1469 = vrot.lane.b32.xlu1 %v520_v21, %s4121_s20  ;;  %3876 = vmatprep.mubr.msk.f32.mxu0 %vm2673_vm11, %v2635_v31  ;;  %v2571_v43 = vsel %vm2531_vm9, %v2506_v0, %v1836_v59  ;;  %v4076_v31 = vld [vmem:[%s7695_s0 + $0x2b0] sm:$0x3] }
 0x32e   :  { %1279 = vrot.lane.b32.xlu0 %v7931_v62, %s4120_s18  ;;  %v3364_v63 = vsel %vm2206_vm4, %v3278_v11, 0.0  ;;  %v526_v59 = vrot.slane %v4076_v31, 2  ;;  %v7939_v31 = vld [vmem:[#allocation38_spill] sm:$0xff] }
 0x32f   :  { %v3362_v41 = vsel %vm2206_vm4, %v3277_v38, 0.0  ;;  %v1454_v60 = vpop.permute.xlu1 %1453 }
 0x330   :  { %v3363_v25 = vadd.f32 %v3362_v41, %v3361_v3  ;;  %v6817_v45 = vpop.permute.xlu0 %1263  ;;  %v2442_v62 = vsel %vm2401_vm7, %v2377_v33, %v1454_v60  ;;  %v2183_v41 = vsel %vm2141_vm3, %v6348_v49, %v7936_v50  ;;  %v2184_v33 = vsel %vm2141_vm3, %v6411_v22, %v7938_v7 }
 0x331   :  { %897 = vrot.lane.b32.xlu1 %v520_v21, %s4118_s17  ;;  %v2248_v60 = vsel %vm2206_vm4, %v2183_v41, %v6761_v8 }
 0x332   :  { %2043 = vrot.lane.b32.xlu0 %v522_v26, %s4124_s1  ;;  %v3365_v29 = vadd.f32 %v3364_v63, %v3363_v25  ;;  %v527_v25 = vsel %vm392_vm1, %v524_v58, %v526_v59  ;;  %v2313_v55 = vsel %vm2271_vm5, %v2248_v60, %v6790_v53  ;;  %v7940_v60 = vld [vmem:[#allocation74_spill] sm:$0xff] }
 0x333   :  { %v6826_v57 = vpop.permute.xlu1 %881  ;;  %v2378_v49 = vsel %vm2336_vm6, %v2313_v55, %v6817_v45  ;;  %v6916_v45 = vld [vmem:[%s7695_s0 + $0x2b8] sm:$0xff] }
 0x334   :  { %v2028_v3 = vpop.permute.xlu0 %2027  ;;  %v528_v18 = vrot.slane %v6916_v45, 2 }
 0x335   :  { %v2636_v40 = vsel %vm2596_vm10, %v2571_v43, %v2028_v3  ;;  %1661 = vrot.lane.b32.xlu1 %v6833_v30, %s4122_s29 }
 0x336   :  { %1471 = vrot.lane.b32.xlu0 %v522_v26, %s4121_s20  ;;  %3877 = vmatmul.mubr.msk.f32.gmra.mrb[38].mxu0 %vm2673_vm11, %v2636_v40 }
 0x337   :  { %v1646_v23 = vpop.permute.xlu1 %1645 }
 0x338   :  { %v1456_v32 = vpop.permute.xlu0 %1455  ;;  %v2507_v56 = vsel %vm2466_vm8, %v2442_v62, %v1646_v23  ;;  %v2249_v62 = vsel %vm2206_vm4, %v2184_v33, %v6826_v57 }
 0x339   :  { %1089 = vrot.lane.b32.xlu1 %v6833_v30, %s4119_s19  ;;  %v2443_v8 = vsel %vm2401_vm7, %v2378_v49, %v1456_v32 }
 0x33a   :  { %899 = vrot.lane.b32.xlu0 %v522_v26, %s4118_s17 }
 0x33b   :  { %v6842_v54 = vpop.permute.xlu1 %1073 }
 0x33c   :  { %v6844_v16 = vpop.permute.xlu0 %883 }
 0x33d   :  { %1853 = vrot.lane.b32.xlu1 %v7933_v2, %s4123_s30 }
 0x33e   :  { %1663 = vrot.lane.b32.xlu0 %v6851_v1, %s4122_s29 }
 0x33f   :  { %v1838_v28 = vpop.permute.xlu1 %1837 }
 0x340   :  { %v1648_v21 = vpop.permute.xlu0 %1647  ;;  %v2572_v51 = vsel %vm2531_vm9, %v2507_v56, %v1838_v28  ;;  %v7937_v28 = vld [vmem:[#allocation39_spill] sm:$0xff]  ;;  %v2314_v56 = vsel %vm2271_vm5, %v2249_v62, %v6842_v54 }
 0x341   :  { %1281 = vrot.lane.b32.xlu1 %v7933_v2, %s4120_s18  ;;  %v2508_v3 = vsel %vm2466_vm8, %v2443_v8, %v1648_v21  ;;  %v6934_v21 = vld [vmem:[%s7695_s0 + $0x2c0] sm:$0xff] }
 0x342   :  { %1091 = vrot.lane.b32.xlu0 %v6851_v1, %s4119_s19  ;;  %v529_v46 = vrot.slane %v6934_v21, 2 }
 0x343   :  { %v6869_v24 = vpop.permute.xlu1 %1265 }
 0x344   :  { %v6873_v36 = vpop.permute.xlu0 %1075 }
 0x345   :  { %v3857_v47 = vpop.f32.mrb[24].mxu0  ;;  %2045 = vrot.lane.b32.xlu1 %v525_v19, %s4124_s1 }
 0x346   :  { %v3062_v10 = vadd.f32 %v6627_v4, %v3857_v47  ;;  %v3056_v61 = vpop.f32.mrb[25].mxu0  ;;  %1855 = vrot.lane.b32.xlu0 %v7935_v52, %s4123_s30  ;;  %v530_v47 = vsel %vm392_vm1, %v528_v18, %v529_v46 }
 0x347   :  { %v3057_v37 = vadd.f32 %v6627_v4, %v3056_v61  ;;  %v2030_v14 = vpop.permute.xlu1 %2029  ;;  %v2379_v61 = vsel %vm2336_vm6, %v2314_v56, %v6869_v24  ;;  %v7942_v56 = vld [vmem:[#allocation77_spill] sm:$0xff] }
 0x348   :  { %v2637_v11 = vsel %vm2596_vm10, %v2572_v51, %v2030_v14  ;;  %v1840_v38 = vpop.permute.xlu0 %1839  ;;  %v3280_v13 = vmax.f32 %v3062_v10, 0.0 }
 0x349   :  { %v3279_v44 = vmax.f32 %v3057_v37, 0.0  ;;  %1473 = vrot.lane.b32.xlu1 %v525_v19, %s4121_s20  ;;  %3879 = vmatprep.mubr.msk.f32.mxu0 %vm2673_vm11, %v2637_v11  ;;  %v2573_v53 = vsel %vm2531_vm9, %v2508_v3, %v1840_v38  ;;  %v4079_v11 = vld [vmem:[%s7695_s0 + $0x2c8] sm:$0x3] }
 0x34a   :  { %1283 = vrot.lane.b32.xlu0 %v7935_v52, %s4120_s18  ;;  %v3368_v0 = vsel %vm2206_vm4, %v3280_v13, 0.0  ;;  %v531_v38 = vrot.slane %v4079_v11, 2  ;;  %v7943_v11 = vld [vmem:[#allocation40_spill] sm:$0xff] }
 0x34b   :  { %v3366_v26 = vsel %vm2206_vm4, %v3279_v44, 0.0  ;;  %v1458_v39 = vpop.permute.xlu1 %1457 }
 0x34c   :  { %v3367_v63 = vadd.f32 %v3366_v26, %v3365_v29  ;;  %v6900_v5 = vpop.permute.xlu0 %1267  ;;  %v2444_v52 = vsel %vm2401_vm7, %v2379_v61, %v1458_v39  ;;  %v2185_v26 = vsel %vm2141_vm3, %v6431_v42, %v7940_v60  ;;  %v2186_v61 = vsel %vm2141_vm3, %v6496_v34, %v7942_v56 }
 0x34d   :  { %901 = vrot.lane.b32.xlu1 %v525_v19, %s4118_s17  ;;  %v2250_v39 = vsel %vm2206_vm4, %v2185_v26, %v6844_v16 }
 0x34e   :  { %2047 = vrot.lane.b32.xlu0 %v527_v25, %s4124_s1  ;;  %v3369_v43 = vadd.f32 %v3368_v0, %v3367_v63  ;;  %v532_v63 = vsel %vm392_vm1, %v529_v46, %v531_v38  ;;  %v2315_v49 = vsel %vm2271_vm5, %v2250_v39, %v6873_v36  ;;  %v7944_v39 = vld [vmem:[#allocation76_spill] sm:$0xff] }
 0x34f   :  { %v6909_v40 = vpop.permute.xlu1 %885  ;;  %v2380_v42 = vsel %vm2336_vm6, %v2315_v49, %v6900_v5  ;;  %v6999_v5 = vld [vmem:[%s7695_s0 + $0x2d0] sm:$0xff] }
 0x350   :  { %v2032_v29 = vpop.permute.xlu0 %2031  ;;  %v533_v7 = vrot.slane %v6999_v5, 2 }
 0x351   :  { %v2638_v23 = vsel %vm2596_vm10, %v2573_v53, %v2032_v29  ;;  %1665 = vrot.lane.b32.xlu1 %v6916_v45, %s4122_s29 }
 0x352   :  { %1475 = vrot.lane.b32.xlu0 %v527_v25, %s4121_s20  ;;  %3880 = vmatmul.mubr.msk.f32.gmra.mrb[40].mxu0 %vm2673_vm11, %v2638_v23 }
 0x353   :  { %v1650_v32 = vpop.permute.xlu1 %1649 }
 0x354   :  { %v1460_v2 = vpop.permute.xlu0 %1459  ;;  %v2509_v57 = vsel %vm2466_vm8, %v2444_v52, %v1650_v32  ;;  %v2251_v52 = vsel %vm2206_vm4, %v2186_v61, %v6909_v40 }
 0x355   :  { %1093 = vrot.lane.b32.xlu1 %v6916_v45, %s4119_s19  ;;  %v2445_v16 = vsel %vm2401_vm7, %v2380_v42, %v1460_v2 }
 0x356   :  { %903 = vrot.lane.b32.xlu0 %v527_v25, %s4118_s17 }
 0x357   :  { %v6925_v17 = vpop.permute.xlu1 %1077 }
 0x358   :  { %v6927_v58 = vpop.permute.xlu0 %887 }
 0x359   :  { %1857 = vrot.lane.b32.xlu1 %v7937_v28, %s4123_s30 }
 0x35a   :  { %1667 = vrot.lane.b32.xlu0 %v6934_v21, %s4122_s29 }
 0x35b   :  { %v1842_v48 = vpop.permute.xlu1 %1841 }
 0x35c   :  { %v1652_v19 = vpop.permute.xlu0 %1651  ;;  %v2574_v54 = vsel %vm2531_vm9, %v2509_v57, %v1842_v48  ;;  %v7941_v48 = vld [vmem:[#allocation41_spill] sm:$0xff]  ;;  %v2316_v57 = vsel %vm2271_vm5, %v2251_v52, %v6925_v17 }
 0x35d   :  { %1285 = vrot.lane.b32.xlu1 %v7937_v28, %s4120_s18  ;;  %v2510_v29 = vsel %vm2466_vm8, %v2445_v16, %v1652_v19  ;;  %v7017_v19 = vld [vmem:[%s7695_s0 + $0x2d8] sm:$0xff] }
 0x35e   :  { %1095 = vrot.lane.b32.xlu0 %v6934_v21, %s4119_s19  ;;  %v534_v33 = vrot.slane %v7017_v19, 2 }
 0x35f   :  { %v6952_v10 = vpop.permute.xlu1 %1269 }
 0x360   :  { %v6956_v22 = vpop.permute.xlu0 %1079 }
 0x361   :  { %v3860_v51 = vpop.f32.mrb[26].mxu0  ;;  %2049 = vrot.lane.b32.xlu1 %v530_v47, %s4124_s1 }
 0x362   :  { %v3072_v37 = vadd.f32 %v6627_v4, %v3860_v51  ;;  %v3066_v14 = vpop.f32.mrb[27].mxu0  ;;  %1859 = vrot.lane.b32.xlu0 %v7939_v31, %s4123_s30  ;;  %v535_v51 = vsel %vm392_vm1, %v533_v7, %v534_v33 }
 0x363   :  { %v3067_v59 = vadd.f32 %v6627_v4, %v3066_v14  ;;  %v2034_v24 = vpop.permute.xlu1 %2033  ;;  %v2381_v14 = vsel %vm2336_vm6, %v2316_v57, %v6952_v10  ;;  %v7946_v57 = vld [vmem:[#allocation79_spill] sm:$0xff] }
 0x364   :  { %v1844_v13 = vpop.permute.xlu0 %1843  ;;  %v2639_v44 = vsel %vm2596_vm10, %v2574_v54, %v2034_v24  ;;  %v3282_v50 = vmax.f32 %v3072_v37, 0.0 }
 0x365   :  { %v3281_v41 = vmax.f32 %v3067_v59, 0.0  ;;  %1477 = vrot.lane.b32.xlu1 %v530_v47, %s4121_s20  ;;  %3882 = vmatprep.mubr.msk.f32.mxu1 %vm2673_vm11, %v2639_v44  ;;  %v2575_v36 = vsel %vm2531_vm9, %v2510_v29, %v1844_v13  ;;  %v4082_v13 = vld [vmem:[%s7695_s0 + $0x2e0] sm:$0x3] }
 0x366   :  { %1287 = vrot.lane.b32.xlu0 %v7939_v31, %s4120_s18  ;;  %v3372_v3 = vsel %vm2206_vm4, %v3282_v50, 0.0  ;;  %v536_v44 = vrot.slane %v4082_v13, 2  ;;  %v7947_v13 = vld [vmem:[#allocation42_spill] sm:$0xff] }
 0x367   :  { %v3370_v25 = vsel %vm2206_vm4, %v3281_v41, 0.0  ;;  %v1462_v55 = vpop.permute.xlu1 %1461 }
 0x368   :  { %v3371_v0 = vadd.f32 %v3370_v25, %v3369_v43  ;;  %v6983_v8 = vpop.permute.xlu0 %1271  ;;  %v2446_v31 = vsel %vm2401_vm7, %v2381_v14, %v1462_v55  ;;  %v2187_v25 = vsel %vm2141_vm3, %v6514_v27, %v7944_v39  ;;  %v2188_v14 = vsel %vm2141_vm3, %v6579_v9, %v7946_v57 }
 0x369   :  { %905 = vrot.lane.b32.xlu1 %v530_v47, %s4118_s17  ;;  %v2252_v55 = vsel %vm2206_vm4, %v2187_v25, %v6927_v58 }
 0x36a   :  { %2051 = vrot.lane.b32.xlu0 %v532_v63, %s4124_s1  ;;  %v3373_v53 = vadd.f32 %v3372_v3, %v3371_v0  ;;  %v537_v0 = vsel %vm392_vm1, %v534_v33, %v536_v44  ;;  %v2317_v42 = vsel %vm2271_vm5, %v2252_v55, %v6956_v22  ;;  %v7948_v55 = vld [vmem:[#allocation78_spill] sm:$0xff] }
 0x36b   :  { %v6992_v23 = vpop.permute.xlu1 %889  ;;  %v2382_v27 = vsel %vm2336_vm6, %v2317_v42, %v6983_v8  ;;  %v7082_v8 = vld [vmem:[%s7695_s0 + $0x2e8] sm:$0xff] }
 0x36c   :  { %v2036_v43 = vpop.permute.xlu0 %2035  ;;  %v538_v56 = vrot.slane %v7082_v8, 2 }
 0x36d   :  { %v2640_v32 = vsel %vm2596_vm10, %v2575_v36, %v2036_v43  ;;  %1669 = vrot.lane.b32.xlu1 %v6999_v5, %s4122_s29 }
 0x36e   :  { %1479 = vrot.lane.b32.xlu0 %v532_v63, %s4121_s20  ;;  %3883 = vmatmul.mubr.msk.f32.vlgmr.msra.gmra.mrb[0].mxu1 %vm2673_vm11, %v2640_v32 }
 0x36f   :  { %v1654_v2 = vpop.permute.xlu1 %1653 }
 0x370   :  { %v1464_v28 = vpop.permute.xlu0 %1463  ;;  %v2511_v40 = vsel %vm2466_vm8, %v2446_v31, %v1654_v2  ;;  %v2253_v31 = vsel %vm2206_vm4, %v2188_v14, %v6992_v23 }
 0x371   :  { %1097 = vrot.lane.b32.xlu1 %v6999_v5, %s4119_s19  ;;  %v2447_v58 = vsel %vm2401_vm7, %v2382_v27, %v1464_v28 }
 0x372   :  { %907 = vrot.lane.b32.xlu0 %v532_v63, %s4118_s17 }
 0x373   :  { %v7008_v18 = vpop.permute.xlu1 %1081 }
 0x374   :  { %v7010_v46 = vpop.permute.xlu0 %891 }
 0x375   :  { %1861 = vrot.lane.b32.xlu1 %v7941_v48, %s4123_s30 }
 0x376   :  { %1671 = vrot.lane.b32.xlu0 %v7017_v19, %s4122_s29 }
 0x377   :  { %v1846_v62 = vpop.permute.xlu1 %1845 }
 0x378   :  { %v1656_v47 = vpop.permute.xlu0 %1655  ;;  %v2576_v17 = vsel %vm2531_vm9, %v2511_v40, %v1846_v62  ;;  %v7945_v62 = vld [vmem:[#allocation43_spill] sm:$0xff]  ;;  %v2318_v40 = vsel %vm2271_vm5, %v2253_v31, %v7008_v18 }
 0x379   :  { %1289 = vrot.lane.b32.xlu1 %v7941_v48, %s4120_s18  ;;  %v2512_v43 = vsel %vm2466_vm8, %v2447_v58, %v1656_v47  ;;  %v7100_v47 = vld [vmem:[%s7695_s0 + $0x2f0] sm:$0xff] }
 0x37a   :  { %1099 = vrot.lane.b32.xlu0 %v7017_v19, %s4119_s19  ;;  %v539_v61 = vrot.slane %v7100_v47, 2 }
 0x37b   :  { %v7035_v37 = vpop.permute.xlu1 %1273 }
 0x37c   :  { %v7039_v34 = vpop.permute.xlu0 %1083 }
 0x37d   :  { %v3863_v54 = vpop.f32.mrb[28].mxu0  ;;  %2053 = vrot.lane.b32.xlu1 %v535_v51, %s4124_s1 }
 0x37e   :  { %v3082_v59 = vadd.f32 %v6627_v4, %v3863_v54  ;;  %v3076_v24 = vpop.f32.mrb[29].mxu0  ;;  %1863 = vrot.lane.b32.xlu0 %v7943_v11, %s4123_s30  ;;  %v540_v54 = vsel %vm392_vm1, %v538_v56, %v539_v61 }
 0x37f   :  { %v3077_v38 = vadd.f32 %v6627_v4, %v3076_v24  ;;  %v2038_v10 = vpop.permute.xlu1 %2037  ;;  %v2383_v24 = vsel %vm2336_vm6, %v2318_v40, %v7035_v37  ;;  %v7950_v40 = vld [vmem:[#allocation81_spill] sm:$0xff] }
 0x380   :  { %v2641_v50 = vsel %vm2596_vm10, %v2576_v17, %v2038_v10  ;;  %v1848_v41 = vpop.permute.xlu0 %1847  ;;  %v3284_v60 = vmax.f32 %v3082_v59, 0.0 }
 0x381   :  { %v3283_v26 = vmax.f32 %v3077_v38, 0.0  ;;  %1481 = vrot.lane.b32.xlu1 %v535_v51, %s4121_s20  ;;  %3885 = vmatprep.mubr.msk.f32.mxu1 %vm2673_vm11, %v2641_v50  ;;  %v2577_v22 = vsel %vm2531_vm9, %v2512_v43, %v1848_v41  ;;  %v4085_v50 = vld [vmem:[%s7695_s0 + $0x2f8] sm:$0x3] }
 0x382   :  { %1291 = vrot.lane.b32.xlu0 %v7943_v11, %s4120_s18  ;;  %v3376_v29 = vsel %vm2206_vm4, %v3284_v60, 0.0  ;;  %v541_v41 = vrot.slane %v4085_v50, 2  ;;  %v7951_v50 = vld [vmem:[#allocation44_spill] sm:$0xff] }
 0x383   :  { %v3374_v63 = vsel %vm2206_vm4, %v3283_v26, 0.0  ;;  %v1466_v49 = vpop.permute.xlu1 %1465 }
 0x384   :  { %v3375_v3 = vadd.f32 %v3374_v63, %v3373_v53  ;;  %v7066_v16 = vpop.permute.xlu0 %1275  ;;  %v2448_v11 = vsel %vm2401_vm7, %v2383_v24, %v1466_v49  ;;  %v2189_v63 = vsel %vm2141_vm3, %v6597_v6, %v7948_v55  ;;  %v2190_v24 = vsel %vm2141_vm3, %v6667_v35, %v7950_v40 }
 0x385   :  { %909 = vrot.lane.b32.xlu1 %v535_v51, %s4118_s17  ;;  %v2254_v49 = vsel %vm2206_vm4, %v2189_v63, %v7010_v46 }
 0x386   :  { %2055 = vrot.lane.b32.xlu0 %v537_v0, %s4124_s1  ;;  %v3377_v36 = vadd.f32 %v3376_v29, %v3375_v3  ;;  %v542_v3 = vsel %vm392_vm1, %v539_v61, %v541_v41  ;;  %v2319_v27 = vsel %vm2271_vm5, %v2254_v49, %v7039_v34  ;;  %v7952_v49 = vld [vmem:[#allocation80_spill] sm:$0xff] }
 0x387   :  { %v7075_v32 = vpop.permute.xlu1 %893  ;;  %v2384_v6 = vsel %vm2336_vm6, %v2319_v27, %v7066_v16  ;;  %v7167_v16 = vld [vmem:[%s7695_s0 + $0x300] sm:$0xff] }
 0x388   :  { %v2040_v53 = vpop.permute.xlu0 %2039  ;;  %v543_v57 = vrot.slane %v7167_v16, 2 }
 0x389   :  { %v2642_v2 = vsel %vm2596_vm10, %v2577_v22, %v2040_v53  ;;  %1673 = vrot.lane.b32.xlu1 %v7082_v8, %s4122_s29 }
 0x38a   :  { %1483 = vrot.lane.b32.xlu0 %v537_v0, %s4121_s20  ;;  %3886 = vmatmul.mubr.msk.f32.gmra.mrb[2].mxu1 %vm2673_vm11, %v2642_v2 }
 0x38b   :  { %v1658_v28 = vpop.permute.xlu1 %1657 }
 0x38c   :  { %v1468_v48 = vpop.permute.xlu0 %1467  ;;  %v2513_v23 = vsel %vm2466_vm8, %v2448_v11, %v1658_v28  ;;  %v2255_v11 = vsel %vm2206_vm4, %v2190_v24, %v7075_v32 }
 0x38d   :  { %1101 = vrot.lane.b32.xlu1 %v7082_v8, %s4119_s19  ;;  %v2449_v46 = vsel %vm2401_vm7, %v2384_v6, %v1468_v48 }
 0x38e   :  { %911 = vrot.lane.b32.xlu0 %v537_v0, %s4118_s17 }
 0x38f   :  { %v7091_v7 = vpop.permute.xlu1 %1085 }
 0x390   :  { %v7093_v33 = vpop.permute.xlu0 %895 }
 0x391   :  { %1865 = vrot.lane.b32.xlu1 %v7945_v62, %s4123_s30 }
 0x392   :  { %1675 = vrot.lane.b32.xlu0 %v7100_v47, %s4122_s29 }
 0x393   :  { %v1850_v52 = vpop.permute.xlu1 %1849 }
 0x394   :  { %v1660_v51 = vpop.permute.xlu0 %1659  ;;  %v2578_v18 = vsel %vm2531_vm9, %v2513_v23, %v1850_v52  ;;  %v7949_v52 = vld [vmem:[#allocation45_spill] sm:$0xff]  ;;  %v2320_v23 = vsel %vm2271_vm5, %v2255_v11, %v7091_v7 }
 0x395   :  { %1293 = vrot.lane.b32.xlu1 %v7945_v62, %s4120_s18  ;;  %v2514_v53 = vsel %vm2466_vm8, %v2449_v46, %v1660_v51  ;;  %v7185_v51 = vld [vmem:[%s7695_s0 + $0x308] sm:$0xff] }
 0x396   :  { %1103 = vrot.lane.b32.xlu0 %v7100_v47, %s4119_s19  ;;  %v544_v14 = vrot.slane %v7185_v51, 2 }
 0x397   :  { %v7118_v59 = vpop.permute.xlu1 %1277 }
 0x398   :  { %v7122_v9 = vpop.permute.xlu0 %1087 }
 0x399   :  { %v3866_v17 = vpop.f32.mrb[30].mxu0  ;;  %2057 = vrot.lane.b32.xlu1 %v540_v54, %s4124_s1 }
 0x39a   :  { %v3092_v38 = vadd.f32 %v6627_v4, %v3866_v17  ;;  %v3086_v10 = vpop.f32.mrb[31].mxu0  ;;  %1867 = vrot.lane.b32.xlu0 %v7947_v13, %s4123_s30  ;;  %v545_v17 = vsel %vm392_vm1, %v543_v57, %v544_v14 }
 0x39b   :  { %v3087_v44 = vadd.f32 %v6627_v4, %v3086_v10  ;;  %v2042_v37 = vpop.permute.xlu1 %2041  ;;  %v2385_v10 = vsel %vm2336_vm6, %v2320_v23, %v7118_v59  ;;  %v7954_v23 = vld [vmem:[#allocation83_spill] sm:$0xff] }
 0x39c   :  { %v2643_v60 = vsel %vm2596_vm10, %v2578_v18, %v2042_v37  ;;  %v1852_v26 = vpop.permute.xlu0 %1851  ;;  %v3286_v39 = vmax.f32 %v3092_v38, 0.0 }
 0x39d   :  { %v3285_v25 = vmax.f32 %v3087_v44, 0.0  ;;  %1485 = vrot.lane.b32.xlu1 %v540_v54, %s4121_s20  ;;  %3888 = vmatprep.mubr.msk.f32.mxu1 %vm2673_vm11, %v2643_v60  ;;  %v2579_v34 = vsel %vm2531_vm9, %v2514_v53, %v1852_v26  ;;  %v4088_v60 = vld [vmem:[%s7695_s0 + $0x310] sm:$0x3] }
 0x39e   :  { %1295 = vrot.lane.b32.xlu0 %v7947_v13, %s4120_s18  ;;  %v3380_v43 = vsel %vm2206_vm4, %v3286_v39, 0.0  ;;  %v546_v26 = vrot.slane %v4088_v60, 2  ;;  %v7955_v60 = vld [vmem:[#allocation46_spill] sm:$0xff] }
 0x39f   :  { %v3378_v0 = vsel %vm2206_vm4, %v3285_v25, 0.0  ;;  %v1470_v42 = vpop.permute.xlu1 %1469 }
 0x3a0   :  { %v3379_v29 = vadd.f32 %v3378_v0, %v3377_v36  ;;  %v7149_v58 = vpop.permute.xlu0 %1279  ;;  %v2450_v13 = vsel %vm2401_vm7, %v2385_v10, %v1470_v42  ;;  %v2191_v0 = vsel %vm2141_vm3, %v6685_v20, %v7952_v49  ;;  %v547_v6 = vsel %vm392_vm1, %v544_v14, %v546_v26 }
 0x3a1   :  { %913 = vrot.lane.b32.xlu1 %v540_v54, %s4118_s17  ;;  %v2192_v10 = vsel %vm2141_vm3, %v6750_v12, %v7954_v23 }
 0x3a2   :  { %v7156_v22 = vadd.f32 %v3380_v43, %v3379_v29  ;;  %2059 = vrot.lane.b32.xlu0 %v542_v3, %s4124_s1 }
 0x3a3   :  { %v7160_v2 = vpop.permute.xlu1 %897 }
 0x3a4   :  { %v2044_v36 = vpop.permute.xlu0 %2043 }
 0x3a5   :  { %v2644_v28 = vsel %vm2596_vm10, %v2579_v34, %v2044_v36  ;;  %1677 = vrot.lane.b32.xlu1 %v7167_v16, %s4122_s29 }
 0x3a6   :  { %1487 = vrot.lane.b32.xlu0 %v542_v3, %s4121_s20  ;;  %3889 = vmatmul.mubr.msk.f32.gmra.mrb[4].mxu1 %vm2673_vm11, %v2644_v28 }
 0x3a7   :  { %v1662_v48 = vpop.permute.xlu1 %1661 }
 0x3a8   :  { %v1472_v62 = vpop.permute.xlu0 %1471  ;;  %v2515_v32 = vsel %vm2466_vm8, %v2450_v13, %v1662_v48  ;;  %v2257_v13 = vsel %vm2206_vm4, %v2192_v10, %v7160_v2 }
 0x3a9   :  { %1105 = vrot.lane.b32.xlu1 %v7167_v16, %s4119_s19 }
 0x3aa   :  { %915 = vrot.lane.b32.xlu0 %v542_v3, %s4118_s17  ;;  %v2256_v3 = vsel %vm2206_vm4, %v2191_v0, %v7093_v33 }
 0x3ab   :  { %v7176_v56 = vpop.permute.xlu1 %1089  ;;  %v2321_v43 = vsel %vm2271_vm5, %v2256_v3, %v7122_v9 }
 0x3ac   :  { %v7178_v61 = vpop.permute.xlu0 %899  ;;  %v2386_v20 = vsel %vm2336_vm6, %v2321_v43, %v7149_v58 }
 0x3ad   :  { %1869 = vrot.lane.b32.xlu1 %v7949_v52, %s4123_s30  ;;  %v2451_v34 = vsel %vm2401_vm7, %v2386_v20, %v1472_v62 }
 0x3ae   :  { %1679 = vrot.lane.b32.xlu0 %v7185_v51, %s4122_s29 }
 0x3af   :  { %v1854_v31 = vpop.permute.xlu1 %1853 }
 0x3b0   :  { %v1664_v54 = vpop.permute.xlu0 %1663  ;;  %v2580_v7 = vsel %vm2531_vm9, %v2515_v32, %v1854_v31  ;;  %v7953_v31 = vld [vmem:[#allocation47_spill] sm:$0xff]  ;;  %v2322_v32 = vsel %vm2271_vm5, %v2257_v13, %v7176_v56  ;;  %v131_v13 = vld [vmem:[%s7695_s0 + $0x340] sm:$0x3] }
 0x3b1   :  { %1297 = vrot.lane.b32.xlu1 %v7949_v52, %s4120_s18  ;;  %v2516_v33 = vsel %vm2466_vm8, %v2451_v34, %v1664_v54  ;;  %v7252_v52 = vld [vmem:[%s7695_s0 + $0x318] sm:$0xff]  ;;  %v7270_v54 = vld [vmem:[%s7695_s0 + $0x320] sm:$0xff] }
 0x3b2   :  { %1107 = vrot.lane.b32.xlu0 %v7185_v51, %s4119_s19  ;;  %v548_v40 = vrot.slane %v7252_v52, 2  ;;  %v549_v24 = vrot.slane %v7270_v54, 2 }
 0x3b3   :  { %v7203_v38 = vpop.permute.xlu1 %1281 }
 0x3b4   :  { %v7207_v35 = vpop.permute.xlu0 %1091 }
 0x3b5   :  { %v3869_v18 = vpop.f32.mrb[32].mxu0  ;;  %2061 = vrot.lane.b32.xlu1 %v545_v17, %s4124_s1 }
 0x3b6   :  { %v3102_v44 = vadd.f32 %v6627_v4, %v3869_v18  ;;  %v3096_v37 = vpop.f32.mrb[33].mxu0  ;;  %1871 = vrot.lane.b32.xlu0 %v7951_v50, %s4123_s30  ;;  %v550_v18 = vsel %vm392_vm1, %v548_v40, %v549_v24 }
 0x3b7   :  { %v3097_v41 = vadd.f32 %v6627_v4, %v3096_v37  ;;  %v2046_v59 = vpop.permute.xlu1 %2045  ;;  %v2387_v37 = vsel %vm2336_vm6, %v2322_v32, %v7203_v38 }
 0x3b8   :  { %v3288_v39 = vmax.f32 %v3102_v44, 0.0  ;;  %v2645_v25 = vsel %vm2596_vm10, %v2580_v7, %v2046_v59  ;;  %v1856_v55 = vpop.permute.xlu0 %1855 }
 0x3b9   :  { %v3287_v63 = vmax.f32 %v3097_v41, 0.0  ;;  %1489 = vrot.lane.b32.xlu1 %v545_v17, %s4121_s20  ;;  %3891 = vmatprep.mubr.msk.f32.mxu1 %vm2673_vm11, %v2645_v25  ;;  %v2581_v28 = vsel %vm2531_vm9, %v2516_v33, %v1856_v55 }
 0x3ba   :  { %v3389_v42 = vsel %vm2206_vm4, %v3288_v39, 0.0  ;;  %1299 = vrot.lane.b32.xlu0 %v7951_v50, %s4120_s18  ;;  %v4091_v39 = vld [vmem:[%s7695_s0 + $0x328] sm:$0x3] }
 0x3bb   :  { %v3388_v27 = vsel %vm2206_vm4, %v3287_v63, 0.0  ;;  %v1474_v29 = vpop.permute.xlu1 %1473  ;;  %v551_v25 = vrot.slane %v4091_v39, 2 }
 0x3bc   :  { %v7235_v46 = vadd.f32 %v3389_v42, %v3388_v27  ;;  %v7237_v53 = vpop.permute.xlu0 %1283  ;;  %v2452_v50 = vsel %vm2401_vm7, %v2387_v37, %v1474_v29  ;;  %v7956_v42 = vld [vmem:[#allocation82_spill] sm:$0xff] }
 0x3bd   :  { %917 = vrot.lane.b32.xlu1 %v545_v17, %s4118_s17  ;;  %v2193_v3 = vsel %vm2141_vm3, %v6768_v15, %v7956_v42 }
 0x3be   :  { %2063 = vrot.lane.b32.xlu0 %v547_v6, %s4124_s1 }
 0x3bf   :  { %v7245_v36 = vpop.permute.xlu1 %901 }
 0x3c0   :  { %v2048_v9 = vpop.permute.xlu0 %2047 }
 0x3c1   :  { %v2646_v48 = vsel %vm2596_vm10, %v2581_v28, %v2048_v9  ;;  %1681 = vrot.lane.b32.xlu1 %v7252_v52, %s4122_s29  ;;  %v129_v28 = vld [vmem:[%s7695_s0 + $0x330] sm:$0xff] }
 0x3c2   :  { %1491 = vrot.lane.b32.xlu0 %v547_v6, %s4121_s20  ;;  %3892 = vmatmul.mubr.msk.f32.gmra.mrb[6].mxu1 %vm2673_vm11, %v2646_v48 }
 0x3c3   :  { %v1666_v58 = vpop.permute.xlu1 %1665 }
 0x3c4   :  { %v1476_v62 = vpop.permute.xlu0 %1475  ;;  %v2517_v2 = vsel %vm2466_vm8, %v2452_v50, %v1666_v58  ;;  %v567_v50 = vrot.slane %v131_v13, 1 }
 0x3c5   :  { %1109 = vrot.lane.b32.xlu1 %v7252_v52, %s4119_s19 }
 0x3c6   :  { %919 = vrot.lane.b32.xlu0 %v547_v6, %s4118_s17  ;;  %v552_v6 = vsel %vm392_vm1, %v549_v24, %v551_v25 }
 0x3c7   :  { %v7261_v57 = vpop.permute.xlu1 %1093 }
 0x3c8   :  { %v7263_v14 = vpop.permute.xlu0 %903 }
 0x3c9   :  { %1873 = vrot.lane.b32.xlu1 %v7953_v31, %s4123_s30 }
 0x3ca   :  { %1683 = vrot.lane.b32.xlu0 %v7270_v54, %s4122_s29 }
 0x3cb   :  { %v1858_v11 = vpop.permute.xlu1 %1857 }
 0x3cc   :  { %v1668_v17 = vpop.permute.xlu0 %1667  ;;  %v2582_v56 = vsel %vm2531_vm9, %v2517_v2, %v1858_v11  ;;  %v7957_v2 = vld [vmem:[#allocation85_spill] sm:$0xff] }
 0x3cd   :  { %1301 = vrot.lane.b32.xlu1 %v7953_v31, %s4120_s18  ;;  %v564_v31 = vrot.slane %v129_v28, 1 }
 0x3ce   :  { %1111 = vrot.lane.b32.xlu0 %v7270_v54, %s4119_s19 }
 0x3cf   :  { %v7288_v44 = vpop.permute.xlu1 %1285 }
 0x3d0   :  { %v7292_v12 = vpop.permute.xlu0 %1095 }
 0x3d1   :  { %v3872_v7 = vpop.f32.mrb[34].mxu0  ;;  %2065 = vrot.lane.b32.xlu1 %v550_v18, %s4124_s1 }
 0x3d2   :  { %v3112_v41 = vadd.f32 %v6627_v4, %v3872_v7  ;;  %v3106_v59 = vpop.f32.mrb[35].mxu0  ;;  %1875 = vrot.lane.b32.xlu0 %v7955_v60, %s4123_s30 }
 0x3d3   :  { %v3107_v26 = vadd.f32 %v6627_v4, %v3106_v59  ;;  %v2050_v38 = vpop.permute.xlu1 %2049  ;;  %v2258_v4 = vsel %vm2206_vm4, %v2193_v3, %v7178_v61 }
 0x3d4   :  { %v2647_v55 = vsel %vm2596_vm10, %v2582_v56, %v2050_v38  ;;  %v1860_v63 = vpop.permute.xlu0 %1859  ;;  %v3290_v49 = vmax.f32 %v3112_v41, 0.0  ;;  %v2323_v43 = vsel %vm2271_vm5, %v2258_v4, %v7207_v35  ;;  %v2194_v41 = vsel %vm2141_vm3, %v6833_v30, %v7957_v2 }
 0x3d5   :  { %v3289_v0 = vmax.f32 %v3107_v26, 0.0  ;;  %1493 = vrot.lane.b32.xlu1 %v550_v18, %s4121_s20  ;;  %3894 = vmatprep.mubr.msk.f32.mxu1 %vm2673_vm11, %v2647_v55  ;;  %v2388_v15 = vsel %vm2336_vm6, %v2323_v43, %v7237_v53  ;;  %v130_v53 = vld [vmem:[%s7695_s0 + $0x338] sm:$0xff]  ;;  %v2259_v59 = vsel %vm2206_vm4, %v2194_v41, %v7245_v36 }
 0x3d6   :  { %1303 = vrot.lane.b32.xlu0 %v7955_v60, %s4120_s18  ;;  %v3393_v33 = vsel %vm2206_vm4, %v3290_v49, 0.0  ;;  %v2453_v61 = vsel %vm2401_vm7, %v2388_v15, %v1476_v62  ;;  %v565_v40 = vrot.slane %v130_v53, 1  ;;  %v575_v32 = vrot.slane %v130_v53, 2  ;;  %v7958_v43 = vld [vmem:[#allocation84_spill] sm:$0xff] }
 0x3d7   :  { %v3391_v27 = vsel %vm2206_vm4, %v3289_v0, 0.0  ;;  %v1478_v29 = vpop.permute.xlu1 %1477  ;;  %v2324_v56 = vsel %vm2271_vm5, %v2259_v59, %v7261_v57  ;;  %v7379_v57 = vld [vmem:[%s7697_s2] ss:$0 sm:$0xff] }
 0x3d8   :  { %v3392_v20 = vadd.f32 %v3391_v27, %v7235_v46  ;;  %v7320_v34 = vpop.permute.xlu0 %1287  ;;  %v2518_v46 = vsel %vm2466_vm8, %v2453_v61, %v1668_v17  ;;  %v566_v17 = vsel %vm231_vm0, %v564_v31, %v565_v40  ;;  %v568_v38 = vsel %vm231_vm0, %v565_v40, %v567_v50 }
 0x3d9   :  { %921 = vrot.lane.b32.xlu1 %v550_v18, %s4118_s17  ;;  %v2583_v48 = vsel %vm2531_vm9, %v2518_v46, %v1860_v63  ;;  %v574_v18 = vrot.slane %v129_v28, 2  ;;  %v2389_v39 = vsel %vm2336_vm6, %v2324_v56, %v7288_v44  ;;  %v577_v44 = vrot.slane %v131_v13, 2  ;;  %v133_v46 = vld [vmem:[%s7695_s0 + $0x350] sm:$0xff] }
 0x3da   :  { %2067 = vrot.lane.b32.xlu0 %v552_v6, %s4124_s1  ;;  %v7331_v35 = vadd.f32 %v3393_v33, %v3392_v20  ;;  %v2454_v25 = vsel %vm2401_vm7, %v2389_v39, %v1478_v29  ;;  %v2195_v20 = vsel %vm2141_vm3, %v6851_v1, %v7958_v43  ;;  %v601_v50 = vrot.slane %v133_v46, 2 }
 0x3db   :  { %v7334_v9 = vpop.permute.xlu1 %905  ;;  %v576_v60 = vsel %vm392_vm1, %v574_v18, %v575_v32  ;;  %v578_v15 = vsel %vm392_vm1, %v575_v32, %v577_v44  ;;  %v2260_v33 = vsel %vm2206_vm4, %v2195_v20, %v7263_v14  ;;  %v132_v14 = vld [vmem:[%s7695_s0 + $0x348] sm:$0xff] }
 0x3dc   :  { %v2052_v58 = vpop.permute.xlu0 %2051  ;;  %v2325_v1 = vsel %vm2271_vm5, %v2260_v33, %v7292_v12  ;;  %v591_v12 = vrot.slane %v133_v46, 1  ;;  %v590_v18 = vrot.slane %v132_v14, 1  ;;  %v600_v41 = vrot.slane %v132_v14, 2 }
 0x3dd   :  { %v2648_v62 = vsel %vm2596_vm10, %v2583_v48, %v2052_v58  ;;  %1685 = vrot.lane.b32.xlu1 %v129_v28, %s4122_s29 }
 0x3de   :  { %1495 = vrot.lane.b32.xlu0 %v552_v6, %s4121_s20  ;;  %3895 = vmatmul.mubr.msk.f32.gmra.mrb[8].mxu1 %vm2673_vm11, %v2648_v62  ;;  %v2390_v62 = vsel %vm2336_vm6, %v2325_v1, %v7320_v34  ;;  %v592_v59 = vsel %vm231_vm0, %v590_v18, %v591_v12  ;;  %v602_v39 = vsel %vm392_vm1, %v600_v41, %v601_v50 }
 0x3df   :  { %v1670_v24 = vpop.permute.xlu1 %1669 }
 0x3e0   :  { %v1480_v11 = vpop.permute.xlu0 %1479  ;;  %v2519_v36 = vsel %vm2466_vm8, %v2454_v25, %v1670_v24 }
 0x3e1   :  { %1113 = vrot.lane.b32.xlu1 %v129_v28, %s4119_s19  ;;  %v2455_v40 = vsel %vm2401_vm7, %v2390_v62, %v1480_v11 }
 0x3e2   :  { %923 = vrot.lane.b32.xlu0 %v552_v6, %s4118_s17 }
 0x3e3   :  { %v7347_v23 = vpop.permute.xlu1 %1097 }
 0x3e4   :  { %v7349_v10 = vpop.permute.xlu0 %907 }
 0x3e5   :  { %1877 = vrot.lane.b32.xlu1 %v566_v17, %s4123_s30 }
 0x3e6   :  { %1687 = vrot.lane.b32.xlu0 %v130_v53, %s4122_s29 }
 0x3e7   :  { %v1862_v37 = vpop.permute.xlu1 %1861 }
 0x3e8   :  { %v1672_v7 = vpop.permute.xlu0 %1671  ;;  %v2584_v0 = vsel %vm2531_vm9, %v2519_v36, %v1862_v37 }
 0x3e9   :  { %1305 = vrot.lane.b32.xlu1 %v566_v17, %s4120_s18  ;;  %v2520_v17 = vsel %vm2466_vm8, %v2455_v40, %v1672_v7 }
 0x3ea   :  { %1115 = vrot.lane.b32.xlu0 %v130_v53, %s4119_s19  ;;  %v134_v53 = vld [vmem:[%s7695_s0 + $0x358] sm:$0x3] }
 0x3eb   :  { %v7366_v26 = vpop.permute.xlu1 %1289  ;;  %v593_v24 = vrot.slane %v134_v53, 1  ;;  %v603_v2 = vrot.slane %v134_v53, 2 }
 0x3ec   :  { %v7371_v30 = vpop.permute.xlu0 %1099 }
 0x3ed   :  { %v3875_v55 = vpop.f32.mrb[36].mxu0  ;;  %2069 = vrot.lane.b32.xlu1 %v576_v60, %s4124_s1  ;;  %v594_v11 = vsel %vm231_vm0, %v591_v12, %v593_v24  ;;  %v604_v56 = vsel %vm392_vm1, %v601_v50, %v603_v2  ;;  %v7961_v2 = vld [vmem:[#allocation89_spill] sm:$0xff] }
 0x3ee   :  { %v3122_v63 = vadd.f32 %v7379_v57, %v3875_v55  ;;  %v3116_v49 = vpop.f32.mrb[37].mxu0  ;;  %1879 = vrot.lane.b32.xlu0 %v568_v38, %s4123_s30  ;;  %v2198_v41 = vsel %vm2141_vm3, %v6999_v5, %v7961_v2 }
 0x3ef   :  { %v3117_v42 = vadd.f32 %v7379_v57, %v3116_v49  ;;  %v2054_v3 = vpop.permute.xlu1 %2053 }
 0x3f0   :  { %v2649_v4 = vsel %vm2596_vm10, %v2584_v0, %v2054_v3  ;;  %v1864_v27 = vpop.permute.xlu0 %1863  ;;  %v3292_v29 = vmax.f32 %v3122_v63, 0.0  ;;  %v7959_v63 = vld [vmem:[#allocation87_spill] sm:$0xff] }
 0x3f1   :  { %v3291_v6 = vmax.f32 %v3117_v42, 0.0  ;;  %1497 = vrot.lane.b32.xlu1 %v576_v60, %s4121_s20  ;;  %3897 = vmatprep.mubr.msk.f32.mxu1 %vm2673_vm11, %v2649_v4  ;;  %v2585_v32 = vsel %vm2531_vm9, %v2520_v17, %v1864_v27  ;;  %v2196_v49 = vsel %vm2141_vm3, %v6916_v45, %v7959_v63 }
 0x3f2   :  { %1307 = vrot.lane.b32.xlu0 %v568_v38, %s4120_s18  ;;  %v3397_v31 = vsel %vm2206_vm4, %v3292_v29, 0.0  ;;  %v2261_v44 = vsel %vm2206_vm4, %v2196_v49, %v7334_v9 }
 0x3f3   :  { %v3395_v61 = vsel %vm2206_vm4, %v3291_v6, 0.0  ;;  %v1482_v28 = vpop.permute.xlu1 %1481  ;;  %v2326_v0 = vsel %vm2271_vm5, %v2261_v44, %v7347_v23 }
 0x3f4   :  { %v3396_v48 = vadd.f32 %v3395_v61, %v7331_v35  ;;  %v7405_v58 = vpop.permute.xlu0 %1291  ;;  %v2391_v3 = vsel %vm2336_vm6, %v2326_v0, %v7366_v26  ;;  %v7960_v26 = vld [vmem:[#allocation86_spill] sm:$0xff] }
 0x3f5   :  { %1499 = vrot.lane.b32.xlu1 %v578_v15, %s4121_s20  ;;  %v2456_v27 = vsel %vm2401_vm7, %v2391_v3, %v1482_v28  ;;  %v2197_v28 = vsel %vm2141_vm3, %v6934_v21, %v7960_v26 }
 0x3f6   :  { %2071 = vrot.lane.b32.xlu0 %v578_v15, %s4124_s1  ;;  %v3398_v35 = vadd.f32 %v3397_v31, %v3396_v48  ;;  %v2262_v53 = vsel %vm2206_vm4, %v2197_v28, %v7349_v10 }
 0x3f7   :  { %v7417_v13 = vpop.permute.xlu1 %909 }
 0x3f8   :  { %v2056_v37 = vpop.permute.xlu0 %2055 }
 0x3f9   :  { %v2650_v34 = vsel %vm2596_vm10, %v2585_v32, %v2056_v37  ;;  %1691 = vrot.lane.b32.xlu1 %v133_v46, %s4122_s29 }
 0x3fa   :  { %1689 = vrot.lane.b32.xlu0 %v132_v14, %s4122_s29  ;;  %3898 = vmatmul.mubr.msk.f32.gmra.mrb[10].mxu1 %vm2673_vm11, %v2650_v34  ;;  %v2327_v14 = vsel %vm2271_vm5, %v2262_v53, %v7371_v30 }
 0x3fb   :  { %v1674_v7 = vpop.permute.xlu1 %1673  ;;  %v2392_v40 = vsel %vm2336_vm6, %v2327_v14, %v7405_v58 }
 0x3fc   :  { %v1484_v60 = vpop.permute.xlu0 %1483  ;;  %v2521_v6 = vsel %vm2466_vm8, %v2456_v27, %v1674_v7  ;;  %v2263_v7 = vsel %vm2206_vm4, %v2198_v41, %v7417_v13 }
 0x3fd   :  { %1883 = vrot.lane.b32.xlu1 %v594_v11, %s4123_s30  ;;  %v2457_v24 = vsel %vm2401_vm7, %v2392_v40, %v1484_v60 }
 0x3fe   :  { %1881 = vrot.lane.b32.xlu0 %v592_v59, %s4123_s30 }
 0x3ff   :  { %v1102_v38 = vpop.permute.xlu1 %1101 }
 0x400   :  { %v7430_v25 = vpop.permute.xlu0 %911  ;;  %v2328_v59 = vsel %vm2271_vm5, %v2263_v7, %v1102_v38 }
 0x401   :  { %2075 = vrot.lane.b32.xlu1 %v604_v56, %s4124_s1 }
 0x402   :  { %2073 = vrot.lane.b32.xlu0 %v602_v39, %s4124_s1 }
 0x403   :  { %v1866_v55 = vpop.permute.xlu1 %1865 }
 0x404   :  { %v1676_v36 = vpop.permute.xlu0 %1675  ;;  %v2586_v45 = vsel %vm2531_vm9, %v2521_v6, %v1866_v55 }
 0x405   :  { %v2522_v21 = vsel %vm2466_vm8, %v2457_v24, %v1676_v36 }
 0x407   :  { %v1294_v42 = vpop.permute.xlu1 %1293 }
 0x408   :  { %v1104_v4 = vpop.permute.xlu0 %1103  ;;  %v2393_v56 = vsel %vm2336_vm6, %v2328_v59, %v1294_v42  ;;  %v7962_v42 = vld [vmem:[#allocation88_spill] sm:$0xff] }
 0x409   :  { %v3878_v29 = vpop.f32.mrb[38].mxu0  ;;  %v2199_v6 = vsel %vm2141_vm3, %v7017_v19, %v7962_v42 }
 0x40a   :  { %v3132_v43 = vadd.f32 %v7379_v57, %v3878_v29  ;;  %v3126_v20 = vpop.f32.mrb[39].mxu0 }
 0x40b   :  { %v3127_v9 = vadd.f32 %v7379_v57, %v3126_v20  ;;  %v2058_v15 = vpop.permute.xlu1 %2057 }
 0x40c   :  { %v2651_v23 = vsel %vm2596_vm10, %v2586_v45, %v2058_v15  ;;  %v1868_v33 = vpop.permute.xlu0 %1867  ;;  %v3294_v61 = vmax.f32 %v3132_v43, 0.0  ;;  %v2264_v43 = vsel %vm2206_vm4, %v2199_v6, %v7430_v25 }
 0x40d   :  { %v3293_v46 = vmax.f32 %v3127_v9, 0.0  ;;  %3900 = vmatprep.mubr.msk.f32.mxu1 %vm2673_vm11, %v2651_v23  ;;  %v2587_v10 = vsel %vm2531_vm9, %v2522_v21, %v1868_v33  ;;  %v2329_v9 = vsel %vm2271_vm5, %v2264_v43, %v1104_v4 }
 0x40e   :  { %v3401_v12 = vsel %vm2206_vm4, %v3294_v61, 0.0 }
 0x40f   :  { %v3399_v1 = vsel %vm2206_vm4, %v3293_v46, 0.0  ;;  %v1486_v48 = vpop.permute.xlu1 %1485 }
 0x410   :  { %v3400_v62 = vadd.f32 %v3399_v1, %v3398_v35  ;;  %v1296_v31 = vpop.permute.xlu0 %1295  ;;  %v2458_v55 = vsel %vm2401_vm7, %v2393_v56, %v1486_v48 }
 0x411   :  { %v2394_v33 = vsel %vm2336_vm6, %v2329_v9, %v1296_v31 }
 0x412   :  { %v3402_v17 = vadd.f32 %v3401_v12, %v3400_v62  ;;  %v7963_v12 = vld [vmem:[#allocation91_spill] sm:$0xff] }
 0x413   :  { %v914_v18 = vpop.permute.xlu1 %913  ;;  %v2200_v24 = vsel %vm2141_vm3, %v7082_v8, %v7963_v12 }
 0x414   :  { %v2060_v32 = vpop.permute.xlu0 %2059 }
 0x415   :  { %v2652_v37 = vsel %vm2596_vm10, %v2587_v10, %v2060_v32 }
 0x416   :  { %3901 = vmatmul.mubr.msk.f32.gmra.mrb[12].mxu1 %vm2673_vm11, %v2652_v37 }
 0x417   :  { %v1678_v30 = vpop.permute.xlu1 %1677 }
 0x418   :  { %v1488_v35 = vpop.permute.xlu0 %1487  ;;  %v2523_v63 = vsel %vm2466_vm8, %v2458_v55, %v1678_v30 }
 0x419   :  { %v2459_v46 = vsel %vm2401_vm7, %v2394_v33, %v1488_v35 }
 0x41b   :  { %v1106_v34 = vpop.permute.xlu1 %1105 }
 0x41c   :  { %v7466_v50 = vpop.permute.xlu0 %915 }
 0x41f   :  { %v1870_v58 = vpop.permute.xlu1 %1869 }
 0x420   :  { %v1680_v11 = vpop.permute.xlu0 %1679  ;;  %v2588_v0 = vsel %vm2531_vm9, %v2523_v63, %v1870_v58 }
 0x421   :  { %v2524_v28 = vsel %vm2466_vm8, %v2459_v46, %v1680_v11 }
 0x423   :  { %v1298_v60 = vpop.permute.xlu1 %1297 }
 0x424   :  { %v1108_v39 = vpop.permute.xlu0 %1107 }
 0x425   :  { %v3881_v36 = vpop.f32.mrb[40].mxu0 }
 0x426   :  { %v3142_v49 = vadd.f32 %v7379_v57, %v3881_v36  ;;  %v3136_v44 = vpop.f32.mrb[41].mxu0 }
 0x427   :  { %v3137_v5 = vadd.f32 %v7379_v57, %v3136_v44  ;;  %v2062_v3 = vpop.permute.xlu1 %2061 }
 0x428   :  { %v2653_v13 = vsel %vm2596_vm10, %v2588_v0, %v2062_v3  ;;  %v1872_v38 = vpop.permute.xlu0 %1871  ;;  %v3296_v27 = vmax.f32 %v3142_v49, 0.0 }
 0x429   :  { %v3295_v29 = vmax.f32 %v3137_v5, 0.0  ;;  %3903 = vmatprep.mubr.msk.f32.mxu1 %vm2673_vm11, %v2653_v13  ;;  %v2589_v53 = vsel %vm2531_vm9, %v2524_v28, %v1872_v38 }
 0x42a   :  { %v3405_v61 = vsel %vm2206_vm4, %v3296_v27, 0.0 }
 0x42b   :  { %v3403_v20 = vsel %vm2206_vm4, %v3295_v29, 0.0  ;;  %v1490_v45 = vpop.permute.xlu1 %1489 }
 0x42c   :  { %v3404_v15 = vadd.f32 %v3403_v20, %v3402_v17  ;;  %v1300_v23 = vpop.permute.xlu0 %1299  ;;  %v2265_v17 = vsel %vm2206_vm4, %v2200_v24, %v914_v18 }
 0x42d   :  { %v2330_v21 = vsel %vm2271_vm5, %v2265_v17, %v1106_v34 }
 0x42e   :  { %v3406_v26 = vadd.f32 %v3405_v61, %v3404_v15  ;;  %v2395_v32 = vsel %vm2336_vm6, %v2330_v21, %v1298_v60  ;;  %v7964_v60 = vld [vmem:[#allocation90_spill] sm:$0xff]  ;;  %v7966_v21 = vld [vmem:[#allocation92_spill] sm:$0xff] }
 0x42f   :  { %v918_v19 = vpop.permute.xlu1 %917  ;;  %v2460_v30 = vsel %vm2401_vm7, %v2395_v32, %v1490_v45  ;;  %v2201_v55 = vsel %vm2141_vm3, %v7100_v47, %v7964_v60 }
 0x430   :  { %v2064_v25 = vpop.permute.xlu0 %2063  ;;  %v2266_v36 = vsel %vm2206_vm4, %v2201_v55, %v7466_v50  ;;  %v7967_v55 = vld [vmem:[#allocation94_spill] sm:$0xff] }
 0x431   :  { %v2654_v1 = vsel %vm2596_vm10, %v2589_v53, %v2064_v25  ;;  %v2331_v44 = vsel %vm2271_vm5, %v2266_v36, %v1108_v39  ;;  %v2205_v36 = vsel %vm2141_vm3, %v7270_v54, %v7967_v55 }
 0x432   :  { %3904 = vmatmul.mubr.msk.f32.gmra.mrb[14].mxu1 %vm2673_vm11, %v2654_v1  ;;  %v2396_v3 = vsel %vm2336_vm6, %v2331_v44, %v1300_v23  ;;  %v7965_v23 = vld [vmem:[#allocation93_spill] sm:$0xff] }
 0x433   :  { %v1682_v4 = vpop.permute.xlu1 %1681  ;;  %v2202_v33 = vsel %vm2141_vm3, %v7167_v16, %v7965_v23 }
 0x434   :  { %v1492_v48 = vpop.permute.xlu0 %1491  ;;  %v2525_v58 = vsel %vm2466_vm8, %v2460_v30, %v1682_v4  ;;  %v2267_v61 = vsel %vm2206_vm4, %v2202_v33, %v918_v19 }
 0x435   :  { %v2461_v38 = vsel %vm2401_vm7, %v2396_v3, %v1492_v48 }
 0x437   :  { %v1110_v14 = vpop.permute.xlu1 %1109 }
 0x438   :  { %v7496_v62 = vpop.permute.xlu0 %919  ;;  %v2332_v46 = vsel %vm2271_vm5, %v2267_v61, %v1110_v14 }
 0x43b   :  { %v1874_v31 = vpop.permute.xlu1 %1873 }
 0x43c   :  { %v1684_v40 = vpop.permute.xlu0 %1683  ;;  %v2590_v41 = vsel %vm2531_vm9, %v2525_v58, %v1874_v31 }
 0x43d   :  { %v2526_v29 = vsel %vm2466_vm8, %v2461_v38, %v1684_v40 }
 0x43f   :  { %v1302_v10 = vpop.permute.xlu1 %1301 }
 0x440   :  { %v1112_v37 = vpop.permute.xlu0 %1111  ;;  %v2397_v28 = vsel %vm2336_vm6, %v2332_v46, %v1302_v10  ;;  %v2203_v10 = vsel %vm2141_vm3, %v7185_v51, %v7966_v21  ;;  %v4125_v21 = vmov 0.0  }
 0x441   :  { %v3884_v35 = vpop.f32.mrb[0].mxu1  ;;  %v2268_v32 = vsel %vm2206_vm4, %v2203_v10, %v7496_v62  ;;  %3915 = vmatprep.subr.mxu1 %v4125_v21 }
 0x442   :  { %v3152_v11 = vadd.f32 %v7379_v57, %v3884_v35  ;;  %v3146_v2 = vpop.f32.mrb[1].mxu1  ;;  %v2333_v58 = vsel %vm2271_vm5, %v2268_v32, %v1112_v37 }
 0x443   :  { %v3147_v8 = vadd.f32 %v7379_v57, %v3146_v2  ;;  %v2066_v7 = vpop.permute.xlu1 %2065 }
 0x444   :  { %v2655_v18 = vsel %vm2596_vm10, %v2590_v41, %v2066_v7  ;;  %v1876_v34 = vpop.permute.xlu0 %1875  ;;  %v3298_v59 = vmax.f32 %v3152_v11, 0.0 }
 0x445   :  { %v3297_v56 = vmax.f32 %v3147_v8, 0.0  ;;  %3906 = vmatprep.mubr.msk.f32.mxu1 %vm2673_vm11, %v2655_v18  ;;  %v2591_v42 = vsel %vm2531_vm9, %v2526_v29, %v1876_v34 }
 0x446   :  { %v3409_v13 = vsel %vm2206_vm4, %v3298_v59, 0.0 }
 0x447   :  { %v3407_v63 = vsel %vm2206_vm4, %v3297_v56, 0.0  ;;  %v1494_v49 = vpop.permute.xlu1 %1493 }
 0x448   :  { %v3408_v0 = vadd.f32 %v3407_v63, %v3406_v26  ;;  %v1304_v5 = vpop.permute.xlu0 %1303  ;;  %v2462_v25 = vsel %vm2401_vm7, %v2397_v28, %v1494_v49  ;;  %v7968_v63 = vld [vmem:[#allocation95_spill] sm:$0xff] }
 0x449   :  { %v2398_v41 = vsel %vm2336_vm6, %v2333_v58, %v1304_v5  ;;  %v2204_v49 = vsel %vm2141_vm3, %v7252_v52, %v7968_v63  ;;  %v4127_v63 = vmov 0.0|0.0  }
 0x44a   :  { %v3410_v27 = vadd.f32 %v3409_v13, %v3408_v0 }
 0x44b   :  { %v922_v47 = vpop.permute.xlu1 %921 }
 0x44c   :  { %v2068_v50 = vpop.permute.xlu0 %2067  ;;  %v2269_v0 = vsel %vm2206_vm4, %v2204_v49, %v922_v47 }
 0x44d   :  { %v2656_v6 = vsel %vm2596_vm10, %v2591_v42, %v2068_v50 }
 0x44e   :  { %3907 = vmatmul.mubr.msk.f32.gmra.mrb[16].mxu1 %vm2673_vm11, %v2656_v6 }
 0x44f   :  { %v1686_v39 = vpop.permute.xlu1 %1685 }
 0x450   :  { %v1496_v43 = vpop.permute.xlu0 %1495  ;;  %v2527_v4 = vsel %vm2466_vm8, %v2462_v25, %v1686_v39 }
 0x451   :  { %v2463_v7 = vsel %vm2401_vm7, %v2398_v41, %v1496_v43 }
 0x453   :  { %v1114_v20 = vpop.permute.xlu1 %1113 }
 0x454   :  { %v924_v45 = vpop.permute.xlu0 %923  ;;  %v2334_v13 = vsel %vm2271_vm5, %v2269_v0, %v1114_v20 }
 0x455   :  { %v2270_v44 = vsel %vm2206_vm4, %v2205_v36, %v924_v45 }
 0x457   :  { %v1878_v9 = vpop.permute.xlu1 %1877 }
 0x458   :  { %v1688_v15 = vpop.permute.xlu0 %1687  ;;  %v2592_v40 = vsel %vm2531_vm9, %v2527_v4, %v1878_v9 }
 0x459   :  { %v2528_v34 = vsel %vm2466_vm8, %v2463_v7, %v1688_v15 }
 0x45b   :  { %v1306_v26 = vpop.permute.xlu1 %1305 }
 0x45c   :  { %v1116_v53 = vpop.permute.xlu0 %1115  ;;  %v2399_v29 = vsel %vm2336_vm6, %v2334_v13, %v1306_v26 }
 0x45d   :  { %v3887_v1 = vpop.f32.mrb[2].mxu1  ;;  %v2335_v5 = vsel %vm2271_vm5, %v2270_v44, %v1116_v53 }
 0x45e   :  { %v3162_v48 = vadd.f32 %v7379_v57, %v3887_v1  ;;  %v3156_v31 = vpop.f32.mrb[3].mxu1 }
 0x45f   :  { %v3157_v16 = vadd.f32 %v7379_v57, %v3156_v31  ;;  %v2070_v12 = vpop.permute.xlu1 %2069 }
 0x460   :  { %v2657_v19 = vsel %vm2596_vm10, %v2592_v40, %v2070_v12  ;;  %v1880_v14 = vpop.permute.xlu0 %1879  ;;  %v3300_v24 = vmax.f32 %v3162_v48, 0.0 }
 0x461   :  { %v3299_v17 = vmax.f32 %v3157_v16, 0.0  ;;  %3909 = vmatprep.mubr.msk.f32.mxu1 %vm2673_vm11, %v2657_v19  ;;  %v2593_v59 = vsel %vm2531_vm9, %v2528_v34, %v1880_v14 }
 0x462   :  { %v3413_v8 = vsel %vm2206_vm4, %v3300_v24, 0.0 }
 0x463   :  { %v3411_v30 = vsel %vm2206_vm4, %v3299_v17, 0.0  ;;  %v1498_v35 = vpop.permute.xlu1 %1497  ;;  %v3459_v17 = vld [vmem:[%s7698_s3] sm:$0xff] }
 0x464   :  { %v3412_v11 = vadd.f32 %v3411_v30, %v3410_v27  ;;  %v1308_v2 = vpop.permute.xlu0 %1307  ;;  %v2464_v42 = vsel %vm2401_vm7, %v2399_v29, %v1498_v35  ;;  %3916 = vmatpush3.msra.mxu1 %v3459_v17 }
 0x465   :  { %v2400_v38 = vsel %vm2336_vm6, %v2335_v5, %v1308_v2  ;;  %3963 = vmatprep.subr.bf16.mxu1 %v4127_v63 }
 0x466   :  { %v3414_v18 = vadd.f32 %v3413_v8, %v3412_v11 }
 0x467   :  { %v1500_v51 = vpop.permute.xlu1 %1499 }
 0x468   :  { %v2072_v62 = vpop.permute.xlu0 %2071  ;;  %v2465_v54 = vsel %vm2401_vm7, %v2400_v38, %v1500_v51 }
 0x469   :  { %v2658_v56 = vsel %vm2596_vm10, %v2593_v59, %v2072_v62 }
 0x46a   :  { %3910 = vmatmul.mubr.msk.f32.gmra.mrb[18].mxu1 %vm2673_vm11, %v2658_v56 }
 0x46b   :  { %v1692_v37 = vpop.permute.xlu1 %1691 }
 0x46c   :  { %v1690_v60 = vpop.permute.xlu0 %1689  ;;  %v2530_v52 = vsel %vm2466_vm8, %v2465_v54, %v1692_v37 }
 0x46d   :  { %v2529_v50 = vsel %vm2466_vm8, %v2464_v42, %v1690_v60 }
 0x46f   :  { %v1884_v3 = vpop.permute.xlu1 %1883 }
 0x470   :  { %v1882_v27 = vpop.permute.xlu0 %1881  ;;  %v2595_v47 = vsel %vm2531_vm9, %v2530_v52, %v1884_v3 }
 0x471   :  { %v2594_v39 = vsel %vm2531_vm9, %v2529_v50, %v1882_v27 }
 0x473   :  { %v2076_v6 = vpop.permute.xlu1 %2075 }
 0x474   :  { %v2660_v43 = vsel %vm2596_vm10, %v2595_v47, %v2076_v6  ;;  %v2074_v20 = vpop.permute.xlu0 %2073 }
 0x475   :  { %v2659_v45 = vsel %vm2596_vm10, %v2594_v39, %v2074_v20 }
 0x476   :  { %3912 = vmatprep.mubr.msk.f32.mxu1 %vm2673_vm11, %v2659_v45 }
 0x477   :  { %3913 = vmatmul.mubr.msk.f32.gmra.mrb[20].mxu1 %vm2673_vm11, %v2660_v43 }
 0x478   :  { %3917 = vmatprep.mubr.msk.f32.mxu1 %vm4126_vm12, %v4125_v21 }
 0x479   :  { %v3890_v9 = vpop.f32.mrb[4].mxu1 }
 0x47a   :  { %v3172_v15 = vadd.f32 %v7379_v57, %v3890_v9  ;;  %v3166_v23 = vpop.f32.mrb[5].mxu1 }
 0x47b   :  { %v3167_v33 = vadd.f32 %v7379_v57, %v3166_v23 }
 0x47c   :  { %v3302_v61 = vmax.f32 %v3172_v15, 0.0 }
 0x47d   :  { %v3301_v46 = vmax.f32 %v3167_v33, 0.0 }
 0x47e   :  { %v3417_v53 = vsel %vm2206_vm4, %v3302_v61, 0.0 }
 0x47f   :  { %v3415_v26 = vsel %vm2206_vm4, %v3301_v46, 0.0 }
 0x480   :  { %v3416_v28 = vadd.f32 %v3415_v26, %v3414_v18 }
 0x482   :  { %v3418_v25 = vadd.f32 %v3417_v53, %v3416_v28 }
 0x495   :  { %v3893_v1 = vpop.f32.mrb[6].mxu1 }
 0x496   :  { %v3182_v4 = vadd.f32 %v7379_v57, %v3893_v1  ;;  %v3176_v48 = vpop.f32.mrb[7].mxu1 }
 0x497   :  { %v3177_v31 = vadd.f32 %v7379_v57, %v3176_v48 }
 0x498   :  { %v3304_v40 = vmax.f32 %v3182_v4, 0.0 }
 0x499   :  { %v3303_v16 = vmax.f32 %v3177_v31, 0.0 }
 0x49a   :  { %v3421_v14 = vsel %vm2206_vm4, %v3304_v40, 0.0 }
 0x49b   :  { %v3419_v12 = vsel %vm2206_vm4, %v3303_v16, 0.0 }
 0x49c   :  { %v3420_v19 = vadd.f32 %v3419_v12, %v3418_v25 }
 0x49e   :  { %v3422_v24 = vadd.f32 %v3421_v14, %v3420_v19 }
 0x4b1   :  { %v3896_v10 = vpop.f32.mrb[8].mxu1 }
 0x4b2   :  { %v3192_v32 = vadd.f32 %v7379_v57, %v3896_v10  ;;  %v3186_v30 = vpop.f32.mrb[9].mxu1  ;;  %v3382_v10 = vrot.slane %v7156_v22, 4 }
 0x4b3   :  { %v3187_v35 = vadd.f32 %v7379_v57, %v3186_v30 }
 0x4b4   :  { %v3306_v58 = vmax.f32 %v3192_v32, 0.0 }
 0x4b5   :  { %v3305_v11 = vmax.f32 %v3187_v35, 0.0 }
 0x4b6   :  { %v3425_v8 = vsel %vm2206_vm4, %v3306_v58, 0.0 }
 0x4b7   :  { %v3423_v2 = vsel %vm2206_vm4, %v3305_v11, 0.0  ;;  %v3383_v11 = vadd.f32 %v3382_v10, %v7156_v22  ;;  %v3544_v22 = vld [vmem:[%s7700_s5] sm:$0xff] }
 0x4b8   :  { %v3424_v41 = vadd.f32 %v3423_v2, %v3422_v24 }
 0x4ba   :  { %v3426_v7 = vadd.f32 %v3425_v8, %v3424_v41 }
 0x4cd   :  { %v3899_v18 = vpop.f32.mrb[10].mxu1 }
 0x4ce   :  { %v3202_v34 = vadd.f32 %v7379_v57, %v3899_v18  ;;  %v3196_v51 = vpop.f32.mrb[11].mxu1 }
 0x4cf   :  { %v3197_v59 = vadd.f32 %v7379_v57, %v3196_v51 }
 0x4d0   :  { %v3308_v62 = vmax.f32 %v3202_v34, 0.0 }
 0x4d1   :  { %v3307_v56 = vmax.f32 %v3197_v59, 0.0 }
 0x4d2   :  { %v3429_v55 = vsel %vm2206_vm4, %v3308_v62, 0.0 }
 0x4d3   :  { %v3427_v37 = vsel %vm2206_vm4, %v3307_v56, 0.0 }
 0x4d4   :  { %v3428_v60 = vadd.f32 %v3427_v37, %v3426_v7  ;;  %v3384_v7 = vrot.slane %v3383_v11, 2 }
 0x4d6   :  { %v3430_v36 = vadd.f32 %v3429_v55, %v3428_v60  ;;  %v3385_v59 = vadd.f32 %v3384_v7, %v3383_v11 }
 0x4d8   :  { %v3386_v37 = vrot.slane %v3385_v59, 1 }
 0x4e9   :  { %v3902_v49 = vpop.f32.mrb[12].mxu1 }
 0x4ea   :  { %v3212_v44 = vadd.f32 %v7379_v57, %v3902_v49  ;;  %v3206_v0 = vpop.f32.mrb[13].mxu1 }
 0x4eb   :  { %v3207_v5 = vadd.f32 %v7379_v57, %v3206_v0 }
 0x4ec   :  { %v3310_v3 = vmax.f32 %v3212_v44, 0.0 }
 0x4ed   :  { %v3309_v13 = vmax.f32 %v3207_v5, 0.0 }
 0x4ee   :  { %v3433_v29 = vsel %vm2206_vm4, %v3310_v3, 0.0 }
 0x4ef   :  { %v3431_v38 = vsel %vm2206_vm4, %v3309_v13, 0.0  ;;  %v3546_v13 = vld [vmem:[%s7700_s5 + $0x10] sm:$0xff] }
 0x4f0   :  { %v3432_v27 = vadd.f32 %v3431_v38, %v3430_v36  ;;  %v3387_v36 = vadd.f32 %v3386_v37, %v3385_v59  ;;  %v3547_v38 = vld [vmem:[%s7700_s5 + $0x18] sm:$0xff] }
 0x4f2   :  { %v3434_v54 = vadd.f32 %v3433_v29, %v3432_v27  ;;  %v3457_v0 = vmul.f32 0.00390625, %v3387_v36  ;;  %v3967_v29 = vpack.c.bf16 %v3547_v38, %v3546_v13 }
 0x505   :  { %v3905_v42 = vpop.f32.mrb[14].mxu1 }
 0x506   :  { %v3222_v52 = vadd.f32 %v7379_v57, %v3905_v42  ;;  %v3216_v50 = vpop.f32.mrb[15].mxu1  ;;  %v3549_v42 = vld [vmem:[%s7700_s5 + $0x28] sm:$0xff] }
 0x507   :  { %v3217_v47 = vadd.f32 %v7379_v57, %v3216_v50  ;;  %v3550_v50 = vld [vmem:[%s7700_s5 + $0x30] sm:$0xff] }
 0x508   :  { %v3312_v6 = vmax.f32 %v3222_v52, 0.0 }
 0x509   :  { %v3311_v39 = vmax.f32 %v3217_v47, 0.0 }
 0x50a   :  { %v3437_v45 = vsel %vm2206_vm4, %v3312_v6, 0.0  ;;  %v3552_v6 = vld [vmem:[%s7700_s5 + $0x40] sm:$0xff] }
 0x50b   :  { %v3435_v43 = vsel %vm2206_vm4, %v3311_v39, 0.0  ;;  %v3553_v39 = vld [vmem:[%s7700_s5 + $0x48] sm:$0xff] }
 0x50c   :  { %v3436_v20 = vadd.f32 %v3435_v43, %v3434_v54  ;;  %v3548_v54 = vld [vmem:[%s7700_s5 + $0x20] sm:$0xff]  ;;  %v3976_v43 = vpack.c.bf16 %v3553_v39, %v3552_v6 }
 0x50d   :  { %v3970_v52 = vpack.c.bf16 %v3549_v42, %v3548_v54 }
 0x50e   :  { %v3438_v9 = vadd.f32 %v3437_v45, %v3436_v20  ;;  %v3554_v20 = vld [vmem:[%s7700_s5 + $0x50] sm:$0xff]  ;;  %v3555_v45 = vld [vmem:[%s7700_s5 + $0x58] sm:$0xff] }
 0x521   :  { %v3908_v15 = vpop.f32.mrb[16].mxu1 }
 0x522   :  { %v3232_v23 = vadd.f32 %v7379_v57, %v3908_v15  ;;  %v3226_v33 = vpop.f32.mrb[17].mxu1  ;;  %v3556_v15 = vld [vmem:[%s7700_s5 + $0x60] sm:$0xff] }
 0x523   :  { %v3227_v61 = vadd.f32 %v7379_v57, %v3226_v33 }
 0x524   :  { %v3314_v46 = vmax.f32 %v3232_v23, 0.0  ;;  %v3557_v23 = vld [vmem:[%s7700_s5 + $0x68] sm:$0xff] }
 0x525   :  { %v3313_v26 = vmax.f32 %v3227_v61, 0.0  ;;  %v3982_v33 = vpack.c.bf16 %v3557_v23, %v3556_v15  ;;  %v3558_v61 = vld [vmem:[%s7700_s5 + $0x70] sm:$0xff] }
 0x526   :  { %v3441_v25 = vsel %vm2206_vm4, %v3314_v46, 0.0  ;;  %v3559_v46 = vld [vmem:[%s7700_s5 + $0x78] sm:$0xff] }
 0x527   :  { %v3439_v28 = vsel %vm2206_vm4, %v3313_v26, 0.0  ;;  %v3985_v26 = vpack.c.bf16 %v3559_v46, %v3558_v61 }
 0x528   :  { %v3440_v53 = vadd.f32 %v3439_v28, %v3438_v9  ;;  %v3979_v9 = vpack.c.bf16 %v3555_v45, %v3554_v20  ;;  %v3718_v28 = vld [vmem:[%s7699_s4] ss:$0 sm:$0xff] }
 0x52a   :  { %v3442_v1 = vadd.f32 %v3441_v25, %v3440_v53 }
 0x53d   :  { %v3911_v4 = vpop.f32.mrb[18].mxu1 }
 0x53e   :  { %v3242_v48 = vadd.f32 %v7379_v57, %v3911_v4  ;;  %v3236_v31 = vpop.f32.mrb[19].mxu1 }
 0x53f   :  { %v3237_v40 = vadd.f32 %v7379_v57, %v3236_v31 }
 0x540   :  { %v3316_v16 = vmax.f32 %v3242_v48, 0.0 }
 0x541   :  { %v3315_v12 = vmax.f32 %v3237_v40, 0.0 }
 0x542   :  { %v3445_v24 = vsel %vm2206_vm4, %v3316_v16, 0.0 }
 0x543   :  { %v3443_v19 = vsel %vm2206_vm4, %v3315_v12, 0.0 }
 0x544   :  { %v3444_v14 = vadd.f32 %v3443_v19, %v3442_v1 }
 0x546   :  { %v3446_v17 = vadd.f32 %v3445_v24, %v3444_v14 }
 0x54a   :  { %v3914_v32 = vpop.f32.mrb[20].mxu1 }
 0x54b   :  { %v3252_v30 = vadd.f32 %v7379_v57, %v3914_v32  ;;  %v3246_v35 = vpop.f32.mrb[21].mxu1 }
 0x54c   :  { %v3247_v58 = vadd.f32 %v7379_v57, %v3246_v35  ;;  %v3545_v57 = vld [vmem:[%s7700_s5 + $0x8] sm:$0xff] }
 0x54d   :  { %v3318_v2 = vmax.f32 %v3252_v30, 0.0  ;;  %v3964_v3 = vpack.c.bf16 %v3545_v57, %v3544_v22 }
 0x54e   :  { %v3317_v41 = vmax.f32 %v3247_v58, 0.0 }
 0x54f   :  { %v3449_v34 = vsel %vm2206_vm4, %v3318_v2, 0.0 }
 0x550   :  { %v3447_v8 = vsel %vm2206_vm4, %v3317_v41, 0.0 }
 0x551   :  { %v3448_v18 = vadd.f32 %v3447_v8, %v3446_v17 }
 0x553   :  { %v3450_v51 = vadd.f32 %v3449_v34, %v3448_v18 }
 0x555   :  { %v3451_v62 = vrot.slane %v3450_v51, 4 }
 0x557   :  { %v3452_v56 = vadd.f32 %v3451_v62, %v3450_v51 }
 0x559   :  { %v3453_v60 = vrot.slane %v3452_v56, 2 }
 0x55b   :  { %v3454_v55 = vadd.f32 %v3453_v60, %v3452_v56 }
 0x55d   :  { %v3455_v49 = vrot.slane %v3454_v55, 1 }
 0x55f   :  { %v3456_v44 = vadd.f32 %v3455_v49, %v3454_v55 }
 0x561   :  { %v3458_v5 = vmul.f32 0.00390625, %v3456_v44 }
 0x563   :  { %v3470_v27 = vsel %vm3469_vm13, %v3458_v5, %v3457_v0 }
 0x564   :  { %3918 = vmatmul.mubr.msk.f32.vlgmr.msra.gmra.mrb[22].mxu1 %vm2206_vm4, %v3470_v27 }
 0x565   :  { %3965 = vmatpush3.bf16.msra.mxu1 %v3964_v3  ;;  %3952 = vmatprep.mubr.msk.f32.mxu1 %vm4126_vm12, %v4125_v21  ;;  %v3551_v21 = vld [vmem:[%s7700_s5 + $0x38] sm:$0xff]  ;;  %s4093_s5 = scalar_lea.vmem %s3645_s10, 32 }
 0x566   :  { %3966 = vmatprep.subr.bf16.mxu1 %v4127_v63  ;;  %v3973_v47 = vpack.c.bf16 %v3551_v21, %v3550_v50  ;;  %p4094_p0 = scmp.ne.s32.totalorder %s3645_s10, %s4093_s5  ;;  %p4099_p2 = scmp.lt.s32.totalorder %s4093_s5, %s4093_s5 }
 0x568   :  { %p4100_p3 = por %p4099_p2, %p4098_p1 }
 0x569   :  { %3968 = vmatpush3.bf16.msra.mxu1 %v3967_v29 }
 0x56a   :  { %3969 = vmatprep.subr.bf16.mxu1 %v4127_v63  ;;  %p4101_p4 = pnand %p4100_p3, %p4094_p0 }
 0x56d   :  { %3971 = vmatpush3.bf16.msra.mxu1 %v3970_v52 }
 0x56e   :  { %3972 = vmatprep.subr.bf16.mxu1 %v4127_v63 }
 0x571   :  { %3974 = vmatpush3.bf16.msra.mxu1 %v3973_v47 }
 0x572   :  { %3975 = vmatprep.subr.bf16.mxu1 %v4127_v63 }
 0x575   :  { %3977 = vmatpush3.bf16.msra.mxu1 %v3976_v43 }
 0x576   :  { %3978 = vmatprep.subr.bf16.mxu1 %v4127_v63 }
 0x579   :  { %3980 = vmatpush3.bf16.msra.mxu1 %v3979_v9 }
 0x57a   :  { %3981 = vmatprep.subr.bf16.mxu1 %v4127_v63 }
 0x57d   :  { %3983 = vmatpush3.bf16.msra.mxu1 %v3982_v33 }
 0x57e   :  { %3984 = vmatprep.subr.bf16.mxu1 %v4127_v63  ;;  %v3720_v63 = vld [vmem:[%s7701_s6] ss:$0 sm:$0xff] }
 0x581   :  { %3986 = vmatpush3.bf16.msra.mxu1 %v3985_v26 }
 0x637   :  { %v3539_v53 = vpop.f32.mrb[22].mxu1 }
 0x638   :  { %v3540_v25 = vadd.f32 %v3718_v28, %v3539_v53  ;;  %v3919_v1 = vpop.f32.mrb[23].mxu1 }
 0x63a   :  { %v3543_v4 = vmax.f32 %v3540_v25, 0.0 }
 0x63c   :  { %3953 = vmatmul.mubr.f32.vlgmr.msra.gmra.mrb[24].mxu1 %v3543_v4 }
 0x70f   :  { %v3633_v48 = vpop.f32.mrb[24].mxu1 }
 0x710   :  { %v3634_v31 = vadd.f32 %v3720_v63, %v3633_v48  ;;  %v3954_v40 = vpop.f32.mrb[25].mxu1 }
 0x712   :  { %3637 = vst [vmem:[#allocation2] sm:$0x3] %v3634_v31 }
 0x713   :  { %4104 = shalt.err (!%p4101_p4)
}
 0x714   :  { %s4105_s12 = scalar_lea.hbm %s7702_s7, 32 }
 0x715   :  { %p4106_p5 = scmp.ne.s32.totalorder %s7702_s7, %s4105_s12  ;;  %p4109_p6 = scmp.lt.u32.totalorder %s4105_s12, %s7702_s7 }
 0x717   :  { %p4111_p7 = pnand %p4109_p6, %p4106_p5 }
 0x719   :  { %4114 = shalt.err (!%p4111_p7)
}
 0x71a   :  { %3647 = dma.vmem_to_hbm [thread:$0]  %s3645_s10, 32, %s7702_s7, [#allocation3]  }
 0x71b   :  { %4115 = dma.done.wait [#allocation3], 32  }
 0x71c   :  { %4116 = vsyncadd [#allocation3], 4294967264 }
 0x71d   :  { %3651 = vsyncpa [#allocation3], 1 }

</bundles_post_ra>
